<compile_context>
chip_gen: v5e
topology: v5e:2x2
jax: 0.10.0
libtpu: 0.0.40
codegen_flags: <defaults>
</compile_context>

<pallas_src>
import functools
import math

import jax
import jax.numpy as jnp
from jax.experimental import pallas as pl
from jax.experimental.pallas import tpu as pltpu  # noqa: F401  (kept for TPU-specific tuning hooks)

F32 = jnp.float32


def _sigmoid(y):
    # numerically stable sigmoid via the EUP tanh path
    return 0.5 * (jnp.tanh(0.5 * y) + 1.0)


def _leaky_relu(y):
    return jnp.where(y > 0, y, 0.01 * y)


def _fused_kbjnet_kernel(*refs, B, L, F):
    (enc_ref, pe_ref,
     c1w_ref, c1b_ref, c2w_ref, c2b_ref,
     t1_lng_r, t1_lnb_r, t1_wqkv_r, t1_bqkv_r, t1_wo_r, t1_bo_r,
     t1_f1w_r, t1_f1b_r, t1_f2w_r, t1_f2b_r,
     t2_lng_r, t2_lnb_r, t2_wqkv_r, t2_bqkv_r, t2_wo_r, t2_bo_r,
     t2_f1w_r, t2_f1b_r, t2_f2w_r, t2_f2b_r,
     fc1_w1_r, fc1_b1_r, fc1_w2_r, fc1_b2_r,
     fc2_w1_r, fc2_b1_r, fc2_w2_r, fc2_b2_r,
     d1w_r, d1b_r, d2w_r, d2b_r,
     out_ref) = refs

    sqrtF = math.sqrt(F)

    # ---- load every weight exactly once; all tensors are tiny and stay on-chip ----
    pe = pe_ref[...]                               # (L, F)
    c1b, c2b = c1b_ref[...], c2b_ref[...]          # (1, F)
    tblk = [
        dict(lng=t1_lng_r[...], lnb=t1_lnb_r[...], wqkv=t1_wqkv_r[...],
             bqkv=t1_bqkv_r[...], wo=t1_wo_r[...], bo=t1_bo_r[...],
             f1w=t1_f1w_r[...], f1b=t1_f1b_r[...], f2w=t1_f2w_r[...],
             f2b=t1_f2b_r[...]),
        dict(lng=t2_lng_r[...], lnb=t2_lnb_r[...], wqkv=t2_wqkv_r[...],
             bqkv=t2_bqkv_r[...], wo=t2_wo_r[...], bo=t2_bo_r[...],
             f1w=t2_f1w_r[...], f1b=t2_f1b_r[...], f2w=t2_f2w_r[...],
             f2b=t2_f2b_r[...]),
    ]
    fcnp = [
        dict(w1=fc1_w1_r[...], b1=fc1_b1_r[...], w2=fc1_w2_r[...], b2=fc1_b2_r[...]),
        dict(w1=fc2_w1_r[...], b1=fc2_b1_r[...], w2=fc2_w2_r[...], b2=fc2_b2_r[...]),
    ]
    d1w, d1b = d1w_r[...], d1b_r[...]              # (L, 1), (1, 1)
    d2w, d2b = d2w_r[...], d2b_r[...]

    # Causal shift matrices: (S_s @ x)[l] = x[l - s]  (zero for l < s).
    ii = jax.lax.broadcasted_iota(jnp.int32, (L, L), 0)
    jj = jax.lax.broadcasted_iota(jnp.int32, (L, L), 1)
    S1 = (ii == jj + 1).astype(F32)
    S2 = (ii == jj + 2).astype(F32)

    def causal_conv(x_lm, w_ref, b_row):
        # kernel_size == 3, causal left pad (== pad + chomp), length-major (L, Cin).
        return (jnp.dot(jnp.dot(S2, x_lm), w_ref[0], preferred_element_type=F32)
                + jnp.dot(jnp.dot(S1, x_lm), w_ref[1], preferred_element_type=F32)
                + jnp.dot(x_lm, w_ref[2], preferred_element_type=F32)
                + b_row)

    def temporal_block(x_lm):
        h = jnp.maximum(causal_conv(x_lm, c1w_ref, c1b), 0.0)    # conv1 -> ReLU
        g = jnp.maximum(causal_conv(h, c2w_ref, c2b), 0.0)       # conv2 -> ReLU
        return jnp.maximum(g + x_lm, 0.0)                        # identity residual -> ReLU

    def layer_norm(x, g_row, b_row):
        mu = jnp.mean(x, axis=-1, keepdims=True)
        var = jnp.mean((x - mu) ** 2, axis=-1, keepdims=True)
        return (x - mu) * jax.lax.rsqrt(var + 1e-5) * g_row + b_row

    def encoder_block(x, p):
        xn = layer_norm(x, p["lng"], p["lnb"])
        # --- self-attention: nhead == d_model -> head_dim == 1, scale == 1 ---
        qkv = jnp.dot(xn, p["wqkv"], preferred_element_type=F32) + p["bqkv"]  # (L, 3F)
        q = qkv[:, 0:F]                      # (L, H)
        kT = qkv[:, F:2 * F].T               # (H, L)
        vT = qkv[:, 2 * F:3 * F].T           # (H, L)
        s = q[:, :, None] * kT[None, :, :]   # (L, H, L): s[i,h,j] = q[i,h]*k[j,h]
        s = s - jnp.max(s, axis=-1, keepdims=True)
        p_att = jnp.exp(s)
        p_att = p_att * pl.reciprocal(jnp.sum(p_att, axis=-1, keepdims=True), approx=True)
        ctx = jnp.sum(p_att * vT[None, :, :], axis=-1)           # (L, H)
        attn = jnp.dot(ctx, p["wo"], preferred_element_type=F32) + p["bo"]
        x1 = xn + attn                                           # dropout == identity
        # --- FFN with dim_feedforward == 1: VPU reduction + broadcast ---
        h1 = jnp.sum(x1 * p["f1w"], axis=-1, keepdims=True) + p["f1b"]   # (L, 1)
        h1 = _leaky_relu(h1)
        return x1 + (h1 * p["f2w"] + p["f2b"])

    def fcn(x, p):
        h = _leaky_relu(jnp.dot(x, p["w1"], preferred_element_type=F32) + p["b1"])
        return jnp.dot(h, p["w2"], preferred_element_type=F32) + p["b2"]

    def decode(d_lf, w_col, b11):
        # Linear(n_window -> 1) + Sigmoid, as a sublane reduction -> (1, F) row.
        return _sigmoid(jnp.sum(d_lf * w_col, axis=0, keepdims=True) + b11)

    for b in range(B):                       # B == 2, unrolled at trace time
        enc_b = enc_ref[b]                   # (W, F) channel-major (torch NCL)
        encT = enc_b.T                       # (L, W) length-major

        # ---- first pass ----
        g1 = temporal_block(encT)            # (L, F)
        e2 = g1 * sqrtF + pe                 # permute(2,0,1)*sqrt(F) + pos-encoding
        z1 = encoder_block(e2, tblk[0])
        c1 = z1 + fcn(z1, fcnp[0])
        x1 = decode(c1 + encT, d1w, d1b)     # (1, F)  == decoder1(c1.permute(1,2,0)+enc)

        # ---- callback(enc, x1) ----
        g2 = temporal_block(encT + x1)       # src2 = enc + x1 (length-major)
        s2 = g2 * sqrtF + pe
        memory = encoder_block(s2, tblk[1])

        # ---- second pass ----
        z2 = fcn(memory, fcnp[1])
        c2 = z2 + fcn(z2, fcnp[1])
        x2 = decode(c2 + x1, d2w, d2b)       # (1, F)

        out_ref[b] = x2                      # out: (B, 1, F) == x2.permute(0,2,1)


# ------------------------------ wrapper / params ----------------------------

def positional_encoding(max_len, d_model):
    pos = jnp.arange(max_len, dtype=F32)[:, None]
    div = jnp.exp(jnp.arange(0, d_model, 2, dtype=F32) * (-math.log(10000.0) / d_model))
    pe = jnp.zeros((max_len, d_model), F32)
    pe = pe.at[:, 0::2].set(jnp.sin(pos * div))
    pe = pe.at[:, 1::2].set(jnp.cos(pos * div))
    return pe


def init_params(key, F, W):
    ks = jax.random.split(key, 40)

    def rnd(i, shape, scale=0.3):
        return scale * jax.random.normal(ks[i], shape, dtype=F32)

    p = {}
    # TCN (single causal TemporalBlock, kernel_size=3); weights stored (K, Cin, Cout)
    p["tcn_c1_w"] = rnd(0, (3, W, F))
    p["tcn_c1_b"] = rnd(1, (1, F), 0.05)
    p["tcn_c2_w"] = rnd(2, (3, F, F))
    p["tcn_c2_b"] = rnd(3, (1, F), 0.05)
    # Transformer blocks (outer LayerNorm + 1-layer encoder, dim_feedforward=1)
    for i, tag in enumerate(("t1", "t2")):
        base = 4 + i * 6
        p[f"{tag}_ln_g"] = jnp.ones((1, F), F32)
        p[f"{tag}_ln_b"] = jnp.zeros((1, F), F32)
        p[f"{tag}_wqkv"] = rnd(base + 0, (F, 3 * F))     # fused Q|K|V projection
        p[f"{tag}_bqkv"] = jnp.zeros((1, 3 * F), F32)
        p[f"{tag}_wo"] = rnd(base + 1, (F, F))
        p[f"{tag}_bo"] = jnp.zeros((1, F), F32)
        p[f"{tag}_ff1_w"] = rnd(base + 2, (1, F))        # Linear(F -> 1) as a row
        p[f"{tag}_ff1_b"] = jnp.zeros((1, 1), F32)
        p[f"{tag}_ff2_w"] = rnd(base + 3, (1, F))        # Linear(1 -> F) as a row
        p[f"{tag}_ff2_b"] = jnp.zeros((1, F), F32)
    # fcn1 / fcn2
    for i, tag in enumerate(("fcn1", "fcn2")):
        base = 20 + i * 4
        p[f"{tag}_w1"] = rnd(base + 0, (F, F))
        p[f"{tag}_b1"] = rnd(base + 1, (1, F), 0.05)
        p[f"{tag}_w2"] = rnd(base + 2, (F, F))
        p[f"{tag}_b2"] = rnd(base + 3, (1, F), 0.05)
    # decoders: Linear(n_window, 1) + Sigmoid (weight stored as a column)
    p["dec1_w"] = rnd(30, (W, 1))
    p["dec1_b"] = rnd(31, (1, 1), 0.05)
    p["dec2_w"] = rnd(32, (W, 1))
    p["dec2_b"] = rnd(33, (1, 1), 0.05)
    return p


def kbjnet_forward(enc, p):
    B, W, F = enc.shape
    assert W == F, "KBJNet residual adds require n_feats == n_window"
    pe = positional_encoding(W, F)

    args = [enc, pe, p["tcn_c1_w"], p["tcn_c1_b"], p["tcn_c2_w"], p["tcn_c2_b"]]
    for tag in ("t1", "t2"):
        args += [p[f"{tag}_ln_g"], p[f"{tag}_ln_b"], p[f"{tag}_wqkv"], p[f"{tag}_bqkv"],
                 p[f"{tag}_wo"], p[f"{tag}_bo"], p[f"{tag}_ff1_w"], p[f"{tag}_ff1_b"],
                 p[f"{tag}_ff2_w"], p[f"{tag}_ff2_b"]]
    for tag in ("fcn1", "fcn2"):
        args += [p[f"{tag}_w1"], p[f"{tag}_b1"], p[f"{tag}_w2"], p[f"{tag}_b2"]]
    args += [p["dec1_w"], p["dec1_b"], p["dec2_w"], p["dec2_b"]]

    kern = functools.partial(_fused_kbjnet_kernel, B=B, L=F, F=F)
    # Single launch, no grid: every array is one whole-block VMEM resident.
    return pl.pallas_call(
        kern,
        out_shape=jax.ShapeDtypeStruct((B, 1, F), F32),
    )(*args)


if __name__ == "__main__":
    B, F_, W = 2, 8, 8          # n_feats == n_window required by the model's residual adds
    key = jax.random.PRNGKey(0)
    kx, kp = jax.random.split(key)
    enc = jax.random.normal(kx, (B, W, F_), dtype=F32)
    params = init_params(kp, F_, W)

    fwd = jax.jit(kbjnet_forward)
    out = fwd(enc, params)
    jax.block_until_ready(out)
    assert out.shape == (B, 1, F_), out.shape
    assert bool(jnp.all(jnp.isfinite(out)))
    print("KERNEL_OK")
</pallas_src>

<mosaic_0001>
module attributes {stable_mosaic.version = 11 : i64} {
  func.func @_fused_kbjnet_kernel(%arg0: memref<2x8x8xf32, #tpu.memory_space<vmem>>, %arg1: memref<8x8xf32, #tpu.memory_space<vmem>>, %arg2: memref<3x8x8xf32, #tpu.memory_space<vmem>>, %arg3: memref<1x8xf32, #tpu.memory_space<vmem>>, %arg4: memref<3x8x8xf32, #tpu.memory_space<vmem>>, %arg5: memref<1x8xf32, #tpu.memory_space<vmem>>, %arg6: memref<1x8xf32, #tpu.memory_space<vmem>>, %arg7: memref<1x8xf32, #tpu.memory_space<vmem>>, %arg8: memref<8x24xf32, #tpu.memory_space<vmem>>, %arg9: memref<1x24xf32, #tpu.memory_space<vmem>>, %arg10: memref<8x8xf32, #tpu.memory_space<vmem>>, %arg11: memref<1x8xf32, #tpu.memory_space<vmem>>, %arg12: memref<1x8xf32, #tpu.memory_space<vmem>>, %arg13: memref<1x1xf32, #tpu.memory_space<vmem>>, %arg14: memref<1x8xf32, #tpu.memory_space<vmem>>, %arg15: memref<1x8xf32, #tpu.memory_space<vmem>>, %arg16: memref<1x8xf32, #tpu.memory_space<vmem>>, %arg17: memref<1x8xf32, #tpu.memory_space<vmem>>, %arg18: memref<8x24xf32, #tpu.memory_space<vmem>>, %arg19: memref<1x24xf32, #tpu.memory_space<vmem>>, %arg20: memref<8x8xf32, #tpu.memory_space<vmem>>, %arg21: memref<1x8xf32, #tpu.memory_space<vmem>>, %arg22: memref<1x8xf32, #tpu.memory_space<vmem>>, %arg23: memref<1x1xf32, #tpu.memory_space<vmem>>, %arg24: memref<1x8xf32, #tpu.memory_space<vmem>>, %arg25: memref<1x8xf32, #tpu.memory_space<vmem>>, %arg26: memref<8x8xf32, #tpu.memory_space<vmem>>, %arg27: memref<1x8xf32, #tpu.memory_space<vmem>>, %arg28: memref<8x8xf32, #tpu.memory_space<vmem>>, %arg29: memref<1x8xf32, #tpu.memory_space<vmem>>, %arg30: memref<8x8xf32, #tpu.memory_space<vmem>>, %arg31: memref<1x8xf32, #tpu.memory_space<vmem>>, %arg32: memref<8x8xf32, #tpu.memory_space<vmem>>, %arg33: memref<1x8xf32, #tpu.memory_space<vmem>>, %arg34: memref<8x1xf32, #tpu.memory_space<vmem>>, %arg35: memref<1x1xf32, #tpu.memory_space<vmem>>, %arg36: memref<8x1xf32, #tpu.memory_space<vmem>>, %arg37: memref<1x1xf32, #tpu.memory_space<vmem>>, %arg38: memref<2x1x8xf32, #tpu.memory_space<vmem>>) attributes {dimension_semantics = [], scalar_prefetch = 0 : i64, scratch_operands = 0 : i64, tpu.core_type = #tpu.core_type<tc>} {
    %c0 = arith.constant 0 : index
    %c0_0 = arith.constant 0 : index
    %0 = vector.load %arg1[%c0, %c0_0] : memref<8x8xf32, #tpu.memory_space<vmem>>, vector<8x8xf32>
    %c0_1 = arith.constant 0 : index
    %c0_2 = arith.constant 0 : index
    %1 = vector.load %arg3[%c0_1, %c0_2] : memref<1x8xf32, #tpu.memory_space<vmem>>, vector<1x8xf32>
    %c0_3 = arith.constant 0 : index
    %c0_4 = arith.constant 0 : index
    %2 = vector.load %arg5[%c0_3, %c0_4] : memref<1x8xf32, #tpu.memory_space<vmem>>, vector<1x8xf32>
    %c0_5 = arith.constant 0 : index
    %c0_6 = arith.constant 0 : index
    %3 = vector.load %arg6[%c0_5, %c0_6] : memref<1x8xf32, #tpu.memory_space<vmem>>, vector<1x8xf32>
    %c0_7 = arith.constant 0 : index
    %c0_8 = arith.constant 0 : index
    %4 = vector.load %arg7[%c0_7, %c0_8] : memref<1x8xf32, #tpu.memory_space<vmem>>, vector<1x8xf32>
    %c0_9 = arith.constant 0 : index
    %c0_10 = arith.constant 0 : index
    %5 = vector.load %arg8[%c0_9, %c0_10] : memref<8x24xf32, #tpu.memory_space<vmem>>, vector<8x24xf32>
    %c0_11 = arith.constant 0 : index
    %c0_12 = arith.constant 0 : index
    %6 = vector.load %arg9[%c0_11, %c0_12] : memref<1x24xf32, #tpu.memory_space<vmem>>, vector<1x24xf32>
    %c0_13 = arith.constant 0 : index
    %c0_14 = arith.constant 0 : index
    %7 = vector.load %arg10[%c0_13, %c0_14] : memref<8x8xf32, #tpu.memory_space<vmem>>, vector<8x8xf32>
    %c0_15 = arith.constant 0 : index
    %c0_16 = arith.constant 0 : index
    %8 = vector.load %arg11[%c0_15, %c0_16] : memref<1x8xf32, #tpu.memory_space<vmem>>, vector<1x8xf32>
    %c0_17 = arith.constant 0 : index
    %c0_18 = arith.constant 0 : index
    %9 = vector.load %arg12[%c0_17, %c0_18] : memref<1x8xf32, #tpu.memory_space<vmem>>, vector<1x8xf32>
    %c0_19 = arith.constant 0 : index
    %c0_20 = arith.constant 0 : index
    %10 = vector.load %arg13[%c0_19, %c0_20] : memref<1x1xf32, #tpu.memory_space<vmem>>, vector<1x1xf32>
    %c0_21 = arith.constant 0 : index
    %c0_22 = arith.constant 0 : index
    %11 = vector.load %arg14[%c0_21, %c0_22] : memref<1x8xf32, #tpu.memory_space<vmem>>, vector<1x8xf32>
    %c0_23 = arith.constant 0 : index
    %c0_24 = arith.constant 0 : index
    %12 = vector.load %arg15[%c0_23, %c0_24] : memref<1x8xf32, #tpu.memory_space<vmem>>, vector<1x8xf32>
    %c0_25 = arith.constant 0 : index
    %c0_26 = arith.constant 0 : index
    %13 = vector.load %arg16[%c0_25, %c0_26] : memref<1x8xf32, #tpu.memory_space<vmem>>, vector<1x8xf32>
    %c0_27 = arith.constant 0 : index
    %c0_28 = arith.constant 0 : index
    %14 = vector.load %arg17[%c0_27, %c0_28] : memref<1x8xf32, #tpu.memory_space<vmem>>, vector<1x8xf32>
    %c0_29 = arith.constant 0 : index
    %c0_30 = arith.constant 0 : index
    %15 = vector.load %arg18[%c0_29, %c0_30] : memref<8x24xf32, #tpu.memory_space<vmem>>, vector<8x24xf32>
    %c0_31 = arith.constant 0 : index
    %c0_32 = arith.constant 0 : index
    %16 = vector.load %arg19[%c0_31, %c0_32] : memref<1x24xf32, #tpu.memory_space<vmem>>, vector<1x24xf32>
    %c0_33 = arith.constant 0 : index
    %c0_34 = arith.constant 0 : index
    %17 = vector.load %arg20[%c0_33, %c0_34] : memref<8x8xf32, #tpu.memory_space<vmem>>, vector<8x8xf32>
    %c0_35 = arith.constant 0 : index
    %c0_36 = arith.constant 0 : index
    %18 = vector.load %arg21[%c0_35, %c0_36] : memref<1x8xf32, #tpu.memory_space<vmem>>, vector<1x8xf32>
    %c0_37 = arith.constant 0 : index
    %c0_38 = arith.constant 0 : index
    %19 = vector.load %arg22[%c0_37, %c0_38] : memref<1x8xf32, #tpu.memory_space<vmem>>, vector<1x8xf32>
    %c0_39 = arith.constant 0 : index
    %c0_40 = arith.constant 0 : index
    %20 = vector.load %arg23[%c0_39, %c0_40] : memref<1x1xf32, #tpu.memory_space<vmem>>, vector<1x1xf32>
    %c0_41 = arith.constant 0 : index
    %c0_42 = arith.constant 0 : index
    %21 = vector.load %arg24[%c0_41, %c0_42] : memref<1x8xf32, #tpu.memory_space<vmem>>, vector<1x8xf32>
    %c0_43 = arith.constant 0 : index
    %c0_44 = arith.constant 0 : index
    %22 = vector.load %arg25[%c0_43, %c0_44] : memref<1x8xf32, #tpu.memory_space<vmem>>, vector<1x8xf32>
    %c0_45 = arith.constant 0 : index
    %c0_46 = arith.constant 0 : index
    %23 = vector.load %arg26[%c0_45, %c0_46] : memref<8x8xf32, #tpu.memory_space<vmem>>, vector<8x8xf32>
    %c0_47 = arith.constant 0 : index
    %c0_48 = arith.constant 0 : index
    %24 = vector.load %arg27[%c0_47, %c0_48] : memref<1x8xf32, #tpu.memory_space<vmem>>, vector<1x8xf32>
    %c0_49 = arith.constant 0 : index
    %c0_50 = arith.constant 0 : index
    %25 = vector.load %arg28[%c0_49, %c0_50] : memref<8x8xf32, #tpu.memory_space<vmem>>, vector<8x8xf32>
    %c0_51 = arith.constant 0 : index
    %c0_52 = arith.constant 0 : index
    %26 = vector.load %arg29[%c0_51, %c0_52] : memref<1x8xf32, #tpu.memory_space<vmem>>, vector<1x8xf32>
    %c0_53 = arith.constant 0 : index
    %c0_54 = arith.constant 0 : index
    %27 = vector.load %arg30[%c0_53, %c0_54] : memref<8x8xf32, #tpu.memory_space<vmem>>, vector<8x8xf32>
    %c0_55 = arith.constant 0 : index
    %c0_56 = arith.constant 0 : index
    %28 = vector.load %arg31[%c0_55, %c0_56] : memref<1x8xf32, #tpu.memory_space<vmem>>, vector<1x8xf32>
    %c0_57 = arith.constant 0 : index
    %c0_58 = arith.constant 0 : index
    %29 = vector.load %arg32[%c0_57, %c0_58] : memref<8x8xf32, #tpu.memory_space<vmem>>, vector<8x8xf32>
    %c0_59 = arith.constant 0 : index
    %c0_60 = arith.constant 0 : index
    %30 = vector.load %arg33[%c0_59, %c0_60] : memref<1x8xf32, #tpu.memory_space<vmem>>, vector<1x8xf32>
    %c0_61 = arith.constant 0 : index
    %c0_62 = arith.constant 0 : index
    %31 = vector.load %arg34[%c0_61, %c0_62] : memref<8x1xf32, #tpu.memory_space<vmem>>, vector<8x1xf32>
    %c0_63 = arith.constant 0 : index
    %c0_64 = arith.constant 0 : index
    %32 = vector.load %arg35[%c0_63, %c0_64] : memref<1x1xf32, #tpu.memory_space<vmem>>, vector<1x1xf32>
    %c0_65 = arith.constant 0 : index
    %c0_66 = arith.constant 0 : index
    %33 = vector.load %arg36[%c0_65, %c0_66] : memref<8x1xf32, #tpu.memory_space<vmem>>, vector<8x1xf32>
    %c0_67 = arith.constant 0 : index
    %c0_68 = arith.constant 0 : index
    %34 = vector.load %arg37[%c0_67, %c0_68] : memref<1x1xf32, #tpu.memory_space<vmem>>, vector<1x1xf32>
    %35 = tpu.iota {dimensions = array<i32: 0>} : vector<8x8xi32>
    %36 = tpu.iota {dimensions = array<i32: 1>} : vector<8x8xi32>
    %c1_i32 = arith.constant 1 : i32
    %37 = vector.broadcast %c1_i32 : i32 to vector<8x8xi32>
    %38 = arith.addi %36, %37 : vector<8x8xi32>
    %39 = arith.cmpi eq, %35, %38 : vector<8x8xi32>
    %40 = arith.extui %39 : vector<8x8xi1> to vector<8x8xi32>
    %41 = arith.sitofp %40 : vector<8x8xi32> to vector<8x8xf32>
    %c2_i32 = arith.constant 2 : i32
    %42 = vector.broadcast %c2_i32 : i32 to vector<8x8xi32>
    %43 = arith.addi %36, %42 : vector<8x8xi32>
    %44 = arith.cmpi eq, %35, %43 : vector<8x8xi32>
    %45 = arith.extui %44 : vector<8x8xi1> to vector<8x8xi32>
    %46 = arith.sitofp %45 : vector<8x8xi32> to vector<8x8xf32>
    %c0_69 = arith.constant 0 : index
    %c0_70 = arith.constant 0 : index
    %c0_71 = arith.constant 0 : index
    %47 = vector.load %arg0[%c0_69, %c0_70, %c0_71] : memref<2x8x8xf32, #tpu.memory_space<vmem>>, vector<1x8x8xf32>
    %48 = vector.shape_cast %47 : vector<1x8x8xf32> to vector<8x8xf32>
    %49 = tpu.transpose %48, [1, 0] : vector<8x8xf32> -> vector<8x8xf32>
    %cst = arith.constant dense<0.000000e+00> : vector<8x8xf32>
    %50 = tpu.matmul %46, %49, %cst {dimension_numbers = #tpu.dot_dimension_numbers<[1], [0], [0], [1], [0, 0, 1, 1], [], []>} : vector<8x8xf32>, vector<8x8xf32>, vector<8x8xf32> -> vector<8x8xf32>
    %c0_72 = arith.constant 0 : index
    %c0_73 = arith.constant 0 : index
    %c0_74 = arith.constant 0 : index
    %51 = vector.load %arg2[%c0_72, %c0_73, %c0_74] : memref<3x8x8xf32, #tpu.memory_space<vmem>>, vector<1x8x8xf32>
    %52 = vector.shape_cast %51 : vector<1x8x8xf32> to vector<8x8xf32>
    %cst_75 = arith.constant dense<0.000000e+00> : vector<8x8xf32>
    %53 = tpu.matmul %50, %52, %cst_75 {dimension_numbers = #tpu.dot_dimension_numbers<[1], [0], [0], [1], [0, 0, 1, 1], [], []>} : vector<8x8xf32>, vector<8x8xf32>, vector<8x8xf32> -> vector<8x8xf32>
    %cst_76 = arith.constant dense<0.000000e+00> : vector<8x8xf32>
    %54 = tpu.matmul %41, %49, %cst_76 {dimension_numbers = #tpu.dot_dimension_numbers<[1], [0], [0], [1], [0, 0, 1, 1], [], []>} : vector<8x8xf32>, vector<8x8xf32>, vector<8x8xf32> -> vector<8x8xf32>
    %c1 = arith.constant 1 : index
    %c0_77 = arith.constant 0 : index
    %c0_78 = arith.constant 0 : index
    %55 = vector.load %arg2[%c1, %c0_77, %c0_78] : memref<3x8x8xf32, #tpu.memory_space<vmem>>, vector<1x8x8xf32>
    %56 = vector.shape_cast %55 : vector<1x8x8xf32> to vector<8x8xf32>
    %cst_79 = arith.constant dense<0.000000e+00> : vector<8x8xf32>
    %57 = tpu.matmul %54, %56, %cst_79 {dimension_numbers = #tpu.dot_dimension_numbers<[1], [0], [0], [1], [0, 0, 1, 1], [], []>} : vector<8x8xf32>, vector<8x8xf32>, vector<8x8xf32> -> vector<8x8xf32>
    %58 = arith.addf %53, %57 : vector<8x8xf32>
    %c2 = arith.constant 2 : index
    %c0_80 = arith.constant 0 : index
    %c0_81 = arith.constant 0 : index
    %59 = vector.load %arg2[%c2, %c0_80, %c0_81] : memref<3x8x8xf32, #tpu.memory_space<vmem>>, vector<1x8x8xf32>
    %60 = vector.shape_cast %59 : vector<1x8x8xf32> to vector<8x8xf32>
    %cst_82 = arith.constant dense<0.000000e+00> : vector<8x8xf32>
    %61 = tpu.matmul %49, %60, %cst_82 {dimension_numbers = #tpu.dot_dimension_numbers<[1], [0], [0], [1], [0, 0, 1, 1], [], []>} : vector<8x8xf32>, vector<8x8xf32>, vector<8x8xf32> -> vector<8x8xf32>
    %62 = arith.addf %58, %61 : vector<8x8xf32>
    %63 = vector.broadcast %1 : vector<1x8xf32> to vector<8x8xf32>
    %64 = arith.addf %62, %63 : vector<8x8xf32>
    %cst_83 = arith.constant 0.000000e+00 : f32
    %65 = vector.broadcast %cst_83 : f32 to vector<8x8xf32>
    %66 = arith.maximumf %64, %65 : vector<8x8xf32>
    %cst_84 = arith.constant dense<0.000000e+00> : vector<8x8xf32>
    %67 = tpu.matmul %46, %66, %cst_84 {dimension_numbers = #tpu.dot_dimension_numbers<[1], [0], [0], [1], [0, 0, 1, 1], [], []>} : vector<8x8xf32>, vector<8x8xf32>, vector<8x8xf32> -> vector<8x8xf32>
    %c0_85 = arith.constant 0 : index
    %c0_86 = arith.constant 0 : index
    %c0_87 = arith.constant 0 : index
    %68 = vector.load %arg4[%c0_85, %c0_86, %c0_87] : memref<3x8x8xf32, #tpu.memory_space<vmem>>, vector<1x8x8xf32>
    %69 = vector.shape_cast %68 : vector<1x8x8xf32> to vector<8x8xf32>
    %cst_88 = arith.constant dense<0.000000e+00> : vector<8x8xf32>
    %70 = tpu.matmul %67, %69, %cst_88 {dimension_numbers = #tpu.dot_dimension_numbers<[1], [0], [0], [1], [0, 0, 1, 1], [], []>} : vector<8x8xf32>, vector<8x8xf32>, vector<8x8xf32> -> vector<8x8xf32>
    %cst_89 = arith.constant dense<0.000000e+00> : vector<8x8xf32>
    %71 = tpu.matmul %41, %66, %cst_89 {dimension_numbers = #tpu.dot_dimension_numbers<[1], [0], [0], [1], [0, 0, 1, 1], [], []>} : vector<8x8xf32>, vector<8x8xf32>, vector<8x8xf32> -> vector<8x8xf32>
    %c1_90 = arith.constant 1 : index
    %c0_91 = arith.constant 0 : index
    %c0_92 = arith.constant 0 : index
    %72 = vector.load %arg4[%c1_90, %c0_91, %c0_92] : memref<3x8x8xf32, #tpu.memory_space<vmem>>, vector<1x8x8xf32>
    %73 = vector.shape_cast %72 : vector<1x8x8xf32> to vector<8x8xf32>
    %cst_93 = arith.constant dense<0.000000e+00> : vector<8x8xf32>
    %74 = tpu.matmul %71, %73, %cst_93 {dimension_numbers = #tpu.dot_dimension_numbers<[1], [0], [0], [1], [0, 0, 1, 1], [], []>} : vector<8x8xf32>, vector<8x8xf32>, vector<8x8xf32> -> vector<8x8xf32>
    %75 = arith.addf %70, %74 : vector<8x8xf32>
    %c2_94 = arith.constant 2 : index
    %c0_95 = arith.constant 0 : index
    %c0_96 = arith.constant 0 : index
    %76 = vector.load %arg4[%c2_94, %c0_95, %c0_96] : memref<3x8x8xf32, #tpu.memory_space<vmem>>, vector<1x8x8xf32>
    %77 = vector.shape_cast %76 : vector<1x8x8xf32> to vector<8x8xf32>
    %cst_97 = arith.constant dense<0.000000e+00> : vector<8x8xf32>
    %78 = tpu.matmul %66, %77, %cst_97 {dimension_numbers = #tpu.dot_dimension_numbers<[1], [0], [0], [1], [0, 0, 1, 1], [], []>} : vector<8x8xf32>, vector<8x8xf32>, vector<8x8xf32> -> vector<8x8xf32>
    %79 = arith.addf %75, %78 : vector<8x8xf32>
    %80 = vector.broadcast %2 : vector<1x8xf32> to vector<8x8xf32>
    %81 = arith.addf %79, %80 : vector<8x8xf32>
    %cst_98 = arith.constant 0.000000e+00 : f32
    %82 = vector.broadcast %cst_98 : f32 to vector<8x8xf32>
    %83 = arith.maximumf %81, %82 : vector<8x8xf32>
    %84 = arith.addf %83, %49 : vector<8x8xf32>
    %cst_99 = arith.constant 0.000000e+00 : f32
    %85 = vector.broadcast %cst_99 : f32 to vector<8x8xf32>
    %86 = arith.maximumf %84, %85 : vector<8x8xf32>
    %cst_100 = arith.constant 2.82842708 : f32
    %87 = vector.broadcast %cst_100 : f32 to vector<8x8xf32>
    %88 = arith.mulf %86, %87 : vector<8x8xf32>
    %89 = arith.addf %88, %0 : vector<8x8xf32>
    %cst_101 = arith.constant dense<0.000000e+00> : vector<8xf32>
    %90 = vector.multi_reduction <add>, %89, %cst_101 [1] : vector<8x8xf32> to vector<8xf32>
    %91 = vector.shape_cast %90 : vector<8xf32> to vector<8x1xf32>
    %cst_102 = arith.constant 8.000000e+00 : f32
    %92 = vector.broadcast %cst_102 : f32 to vector<8x1xf32>
    %93 = arith.divf %91, %92 : vector<8x1xf32>
    %94 = vector.broadcast %93 : vector<8x1xf32> to vector<8x8xf32>
    %95 = arith.subf %89, %94 : vector<8x8xf32>
    %96 = arith.mulf %95, %95 : vector<8x8xf32>
    %cst_103 = arith.constant dense<0.000000e+00> : vector<8xf32>
    %97 = vector.multi_reduction <add>, %96, %cst_103 [1] : vector<8x8xf32> to vector<8xf32>
    %98 = vector.shape_cast %97 : vector<8xf32> to vector<8x1xf32>
    %cst_104 = arith.constant 8.000000e+00 : f32
    %99 = vector.broadcast %cst_104 : f32 to vector<8x1xf32>
    %100 = arith.divf %98, %99 : vector<8x1xf32>
    %101 = vector.broadcast %93 : vector<8x1xf32> to vector<8x8xf32>
    %102 = arith.subf %89, %101 : vector<8x8xf32>
    %cst_105 = arith.constant 9.99999974E-6 : f32
    %103 = vector.broadcast %cst_105 : f32 to vector<8x1xf32>
    %104 = arith.addf %100, %103 : vector<8x1xf32>
    %105 = math.rsqrt %104 : vector<8x1xf32>
    %106 = vector.broadcast %105 : vector<8x1xf32> to vector<8x8xf32>
    %107 = arith.mulf %102, %106 : vector<8x8xf32>
    %108 = vector.broadcast %3 : vector<1x8xf32> to vector<8x8xf32>
    %109 = arith.mulf %107, %108 : vector<8x8xf32>
    %110 = vector.broadcast %4 : vector<1x8xf32> to vector<8x8xf32>
    %111 = arith.addf %109, %110 : vector<8x8xf32>
    %cst_106 = arith.constant dense<0.000000e+00> : vector<8x24xf32>
    %112 = tpu.matmul %111, %5, %cst_106 {dimension_numbers = #tpu.dot_dimension_numbers<[1], [0], [0], [1], [0, 0, 1, 1], [], []>} : vector<8x8xf32>, vector<8x24xf32>, vector<8x24xf32> -> vector<8x24xf32>
    %113 = vector.broadcast %6 : vector<1x24xf32> to vector<8x24xf32>
    %114 = arith.addf %112, %113 : vector<8x24xf32>
    %115 = vector.extract_strided_slice %114 {offsets = [0, 0], sizes = [8, 8], strides = [1, 1]} : vector<8x24xf32> to vector<8x8xf32>
    %116 = vector.extract_strided_slice %114 {offsets = [0, 8], sizes = [8, 8], strides = [1, 1]} : vector<8x24xf32> to vector<8x8xf32>
    %117 = tpu.transpose %116, [1, 0] : vector<8x8xf32> -> vector<8x8xf32>
    %118 = vector.extract_strided_slice %114 {offsets = [0, 16], sizes = [8, 8], strides = [1, 1]} : vector<8x24xf32> to vector<8x8xf32>
    %119 = tpu.transpose %118, [1, 0] : vector<8x8xf32> -> vector<8x8xf32>
    %120 = vector.shape_cast %115 : vector<8x8xf32> to vector<8x8x1xf32>
    %121 = vector.shape_cast %117 : vector<8x8xf32> to vector<1x8x8xf32>
    %122 = vector.broadcast %120 : vector<8x8x1xf32> to vector<8x8x8xf32>
    %123 = vector.broadcast %121 : vector<1x8x8xf32> to vector<8x8x8xf32>
    %124 = arith.mulf %122, %123 : vector<8x8x8xf32>
    %cst_107 = arith.constant dense<0xFF800000> : vector<8x8xf32>
    %125 = vector.multi_reduction <maximumf>, %124, %cst_107 [2] : vector<8x8x8xf32> to vector<8x8xf32>
    %126 = vector.shape_cast %125 : vector<8x8xf32> to vector<8x8x1xf32>
    %127 = vector.broadcast %126 : vector<8x8x1xf32> to vector<8x8x8xf32>
    %128 = arith.subf %124, %127 : vector<8x8x8xf32>
    %129 = math.exp %128 : vector<8x8x8xf32>
    %cst_108 = arith.constant dense<0.000000e+00> : vector<8x8xf32>
    %130 = vector.multi_reduction <add>, %129, %cst_108 [2] : vector<8x8x8xf32> to vector<8x8xf32>
    %131 = vector.shape_cast %130 : vector<8x8xf32> to vector<8x8x1xf32>
    %132 = tpu.reciprocal %131 {approx = true} : vector<8x8x1xf32> -> vector<8x8x1xf32>
    %133 = vector.broadcast %132 : vector<8x8x1xf32> to vector<8x8x8xf32>
    %134 = arith.mulf %129, %133 : vector<8x8x8xf32>
    %135 = vector.shape_cast %119 : vector<8x8xf32> to vector<1x8x8xf32>
    %136 = vector.broadcast %135 : vector<1x8x8xf32> to vector<8x8x8xf32>
    %137 = arith.mulf %134, %136 : vector<8x8x8xf32>
    %cst_109 = arith.constant dense<0.000000e+00> : vector<8x8xf32>
    %138 = vector.multi_reduction <add>, %137, %cst_109 [2] : vector<8x8x8xf32> to vector<8x8xf32>
    %cst_110 = arith.constant dense<0.000000e+00> : vector<8x8xf32>
    %139 = tpu.matmul %138, %7, %cst_110 {dimension_numbers = #tpu.dot_dimension_numbers<[1], [0], [0], [1], [0, 0, 1, 1], [], []>} : vector<8x8xf32>, vector<8x8xf32>, vector<8x8xf32> -> vector<8x8xf32>
    %140 = vector.broadcast %8 : vector<1x8xf32> to vector<8x8xf32>
    %141 = arith.addf %139, %140 : vector<8x8xf32>
    %142 = arith.addf %111, %141 : vector<8x8xf32>
    %143 = vector.broadcast %9 : vector<1x8xf32> to vector<8x8xf32>
    %144 = arith.mulf %142, %143 : vector<8x8xf32>
    %cst_111 = arith.constant dense<0.000000e+00> : vector<8xf32>
    %145 = vector.multi_reduction <add>, %144, %cst_111 [1] : vector<8x8xf32> to vector<8xf32>
    %146 = vector.shape_cast %145 : vector<8xf32> to vector<8x1xf32>
    %147 = vector.broadcast %10 : vector<1x1xf32> to vector<8x1xf32>
    %148 = arith.addf %146, %147 : vector<8x1xf32>
    %cst_112 = arith.constant 0.000000e+00 : f32
    %149 = vector.broadcast %cst_112 : f32 to vector<8x1xf32>
    %150 = arith.cmpf ogt, %148, %149 : vector<8x1xf32>
    %cst_113 = arith.constant 0.00999999977 : f32
    %151 = vector.broadcast %cst_113 : f32 to vector<8x1xf32>
    %152 = arith.mulf %151, %148 : vector<8x1xf32>
    %153 = arith.select %150, %148, %152 : vector<8x1xi1>, vector<8x1xf32>
    %154 = vector.broadcast %153 : vector<8x1xf32> to vector<8x8xf32>
    %155 = vector.broadcast %11 : vector<1x8xf32> to vector<8x8xf32>
    %156 = arith.mulf %154, %155 : vector<8x8xf32>
    %157 = vector.broadcast %12 : vector<1x8xf32> to vector<8x8xf32>
    %158 = arith.addf %156, %157 : vector<8x8xf32>
    %159 = arith.addf %142, %158 : vector<8x8xf32>
    %cst_114 = arith.constant dense<0.000000e+00> : vector<8x8xf32>
    %160 = tpu.matmul %159, %23, %cst_114 {dimension_numbers = #tpu.dot_dimension_numbers<[1], [0], [0], [1], [0, 0, 1, 1], [], []>} : vector<8x8xf32>, vector<8x8xf32>, vector<8x8xf32> -> vector<8x8xf32>
    %161 = vector.broadcast %24 : vector<1x8xf32> to vector<8x8xf32>
    %162 = arith.addf %160, %161 : vector<8x8xf32>
    %cst_115 = arith.constant 0.000000e+00 : f32
    %163 = vector.broadcast %cst_115 : f32 to vector<8x8xf32>
    %164 = arith.cmpf ogt, %162, %163 : vector<8x8xf32>
    %cst_116 = arith.constant 0.00999999977 : f32
    %165 = vector.broadcast %cst_116 : f32 to vector<8x8xf32>
    %166 = arith.mulf %165, %162 : vector<8x8xf32>
    %167 = arith.select %164, %162, %166 : vector<8x8xi1>, vector<8x8xf32>
    %cst_117 = arith.constant dense<0.000000e+00> : vector<8x8xf32>
    %168 = tpu.matmul %167, %25, %cst_117 {dimension_numbers = #tpu.dot_dimension_numbers<[1], [0], [0], [1], [0, 0, 1, 1], [], []>} : vector<8x8xf32>, vector<8x8xf32>, vector<8x8xf32> -> vector<8x8xf32>
    %169 = vector.broadcast %26 : vector<1x8xf32> to vector<8x8xf32>
    %170 = arith.addf %168, %169 : vector<8x8xf32>
    %171 = arith.addf %159, %170 : vector<8x8xf32>
    %172 = arith.addf %171, %49 : vector<8x8xf32>
    %173 = vector.broadcast %31 : vector<8x1xf32> to vector<8x8xf32>
    %174 = arith.mulf %172, %173 : vector<8x8xf32>
    %cst_118 = arith.constant dense<0.000000e+00> : vector<8xf32>
    %175 = vector.multi_reduction <add>, %174, %cst_118 [0] : vector<8x8xf32> to vector<8xf32>
    %176 = vector.shape_cast %175 : vector<8xf32> to vector<1x8xf32>
    %177 = vector.broadcast %32 : vector<1x1xf32> to vector<1x8xf32>
    %178 = arith.addf %176, %177 : vector<1x8xf32>
    %cst_119 = arith.constant 5.000000e-01 : f32
    %179 = vector.broadcast %cst_119 : f32 to vector<1x8xf32>
    %180 = arith.mulf %179, %178 : vector<1x8xf32>
    %181 = math.tanh %180 : vector<1x8xf32>
    %cst_120 = arith.constant 1.000000e+00 : f32
    %182 = vector.broadcast %cst_120 : f32 to vector<1x8xf32>
    %183 = arith.addf %181, %182 : vector<1x8xf32>
    %cst_121 = arith.constant 5.000000e-01 : f32
    %184 = vector.broadcast %cst_121 : f32 to vector<1x8xf32>
    %185 = arith.mulf %184, %183 : vector<1x8xf32>
    %186 = vector.broadcast %185 : vector<1x8xf32> to vector<8x8xf32>
    %187 = arith.addf %49, %186 : vector<8x8xf32>
    %cst_122 = arith.constant dense<0.000000e+00> : vector<8x8xf32>
    %188 = tpu.matmul %46, %187, %cst_122 {dimension_numbers = #tpu.dot_dimension_numbers<[1], [0], [0], [1], [0, 0, 1, 1], [], []>} : vector<8x8xf32>, vector<8x8xf32>, vector<8x8xf32> -> vector<8x8xf32>
    %c0_123 = arith.constant 0 : index
    %c0_124 = arith.constant 0 : index
    %c0_125 = arith.constant 0 : index
    %189 = vector.load %arg2[%c0_123, %c0_124, %c0_125] : memref<3x8x8xf32, #tpu.memory_space<vmem>>, vector<1x8x8xf32>
    %190 = vector.shape_cast %189 : vector<1x8x8xf32> to vector<8x8xf32>
    %cst_126 = arith.constant dense<0.000000e+00> : vector<8x8xf32>
    %191 = tpu.matmul %188, %190, %cst_126 {dimension_numbers = #tpu.dot_dimension_numbers<[1], [0], [0], [1], [0, 0, 1, 1], [], []>} : vector<8x8xf32>, vector<8x8xf32>, vector<8x8xf32> -> vector<8x8xf32>
    %cst_127 = arith.constant dense<0.000000e+00> : vector<8x8xf32>
    %192 = tpu.matmul %41, %187, %cst_127 {dimension_numbers = #tpu.dot_dimension_numbers<[1], [0], [0], [1], [0, 0, 1, 1], [], []>} : vector<8x8xf32>, vector<8x8xf32>, vector<8x8xf32> -> vector<8x8xf32>
    %c1_128 = arith.constant 1 : index
    %c0_129 = arith.constant 0 : index
    %c0_130 = arith.constant 0 : index
    %193 = vector.load %arg2[%c1_128, %c0_129, %c0_130] : memref<3x8x8xf32, #tpu.memory_space<vmem>>, vector<1x8x8xf32>
    %194 = vector.shape_cast %193 : vector<1x8x8xf32> to vector<8x8xf32>
    %cst_131 = arith.constant dense<0.000000e+00> : vector<8x8xf32>
    %195 = tpu.matmul %192, %194, %cst_131 {dimension_numbers = #tpu.dot_dimension_numbers<[1], [0], [0], [1], [0, 0, 1, 1], [], []>} : vector<8x8xf32>, vector<8x8xf32>, vector<8x8xf32> -> vector<8x8xf32>
    %196 = arith.addf %191, %195 : vector<8x8xf32>
    %c2_132 = arith.constant 2 : index
    %c0_133 = arith.constant 0 : index
    %c0_134 = arith.constant 0 : index
    %197 = vector.load %arg2[%c2_132, %c0_133, %c0_134] : memref<3x8x8xf32, #tpu.memory_space<vmem>>, vector<1x8x8xf32>
    %198 = vector.shape_cast %197 : vector<1x8x8xf32> to vector<8x8xf32>
    %cst_135 = arith.constant dense<0.000000e+00> : vector<8x8xf32>
    %199 = tpu.matmul %187, %198, %cst_135 {dimension_numbers = #tpu.dot_dimension_numbers<[1], [0], [0], [1], [0, 0, 1, 1], [], []>} : vector<8x8xf32>, vector<8x8xf32>, vector<8x8xf32> -> vector<8x8xf32>
    %200 = arith.addf %196, %199 : vector<8x8xf32>
    %201 = vector.broadcast %1 : vector<1x8xf32> to vector<8x8xf32>
    %202 = arith.addf %200, %201 : vector<8x8xf32>
    %cst_136 = arith.constant 0.000000e+00 : f32
    %203 = vector.broadcast %cst_136 : f32 to vector<8x8xf32>
    %204 = arith.maximumf %202, %203 : vector<8x8xf32>
    %cst_137 = arith.constant dense<0.000000e+00> : vector<8x8xf32>
    %205 = tpu.matmul %46, %204, %cst_137 {dimension_numbers = #tpu.dot_dimension_numbers<[1], [0], [0], [1], [0, 0, 1, 1], [], []>} : vector<8x8xf32>, vector<8x8xf32>, vector<8x8xf32> -> vector<8x8xf32>
    %c0_138 = arith.constant 0 : index
    %c0_139 = arith.constant 0 : index
    %c0_140 = arith.constant 0 : index
    %206 = vector.load %arg4[%c0_138, %c0_139, %c0_140] : memref<3x8x8xf32, #tpu.memory_space<vmem>>, vector<1x8x8xf32>
    %207 = vector.shape_cast %206 : vector<1x8x8xf32> to vector<8x8xf32>
    %cst_141 = arith.constant dense<0.000000e+00> : vector<8x8xf32>
    %208 = tpu.matmul %205, %207, %cst_141 {dimension_numbers = #tpu.dot_dimension_numbers<[1], [0], [0], [1], [0, 0, 1, 1], [], []>} : vector<8x8xf32>, vector<8x8xf32>, vector<8x8xf32> -> vector<8x8xf32>
    %cst_142 = arith.constant dense<0.000000e+00> : vector<8x8xf32>
    %209 = tpu.matmul %41, %204, %cst_142 {dimension_numbers = #tpu.dot_dimension_numbers<[1], [0], [0], [1], [0, 0, 1, 1], [], []>} : vector<8x8xf32>, vector<8x8xf32>, vector<8x8xf32> -> vector<8x8xf32>
    %c1_143 = arith.constant 1 : index
    %c0_144 = arith.constant 0 : index
    %c0_145 = arith.constant 0 : index
    %210 = vector.load %arg4[%c1_143, %c0_144, %c0_145] : memref<3x8x8xf32, #tpu.memory_space<vmem>>, vector<1x8x8xf32>
    %211 = vector.shape_cast %210 : vector<1x8x8xf32> to vector<8x8xf32>
    %cst_146 = arith.constant dense<0.000000e+00> : vector<8x8xf32>
    %212 = tpu.matmul %209, %211, %cst_146 {dimension_numbers = #tpu.dot_dimension_numbers<[1], [0], [0], [1], [0, 0, 1, 1], [], []>} : vector<8x8xf32>, vector<8x8xf32>, vector<8x8xf32> -> vector<8x8xf32>
    %213 = arith.addf %208, %212 : vector<8x8xf32>
    %c2_147 = arith.constant 2 : index
    %c0_148 = arith.constant 0 : index
    %c0_149 = arith.constant 0 : index
    %214 = vector.load %arg4[%c2_147, %c0_148, %c0_149] : memref<3x8x8xf32, #tpu.memory_space<vmem>>, vector<1x8x8xf32>
    %215 = vector.shape_cast %214 : vector<1x8x8xf32> to vector<8x8xf32>
    %cst_150 = arith.constant dense<0.000000e+00> : vector<8x8xf32>
    %216 = tpu.matmul %204, %215, %cst_150 {dimension_numbers = #tpu.dot_dimension_numbers<[1], [0], [0], [1], [0, 0, 1, 1], [], []>} : vector<8x8xf32>, vector<8x8xf32>, vector<8x8xf32> -> vector<8x8xf32>
    %217 = arith.addf %213, %216 : vector<8x8xf32>
    %218 = vector.broadcast %2 : vector<1x8xf32> to vector<8x8xf32>
    %219 = arith.addf %217, %218 : vector<8x8xf32>
    %cst_151 = arith.constant 0.000000e+00 : f32
    %220 = vector.broadcast %cst_151 : f32 to vector<8x8xf32>
    %221 = arith.maximumf %219, %220 : vector<8x8xf32>
    %222 = arith.addf %221, %187 : vector<8x8xf32>
    %cst_152 = arith.constant 0.000000e+00 : f32
    %223 = vector.broadcast %cst_152 : f32 to vector<8x8xf32>
    %224 = arith.maximumf %222, %223 : vector<8x8xf32>
    %cst_153 = arith.constant 2.82842708 : f32
    %225 = vector.broadcast %cst_153 : f32 to vector<8x8xf32>
    %226 = arith.mulf %224, %225 : vector<8x8xf32>
    %227 = arith.addf %226, %0 : vector<8x8xf32>
    %cst_154 = arith.constant dense<0.000000e+00> : vector<8xf32>
    %228 = vector.multi_reduction <add>, %227, %cst_154 [1] : vector<8x8xf32> to vector<8xf32>
    %229 = vector.shape_cast %228 : vector<8xf32> to vector<8x1xf32>
    %cst_155 = arith.constant 8.000000e+00 : f32
    %230 = vector.broadcast %cst_155 : f32 to vector<8x1xf32>
    %231 = arith.divf %229, %230 : vector<8x1xf32>
    %232 = vector.broadcast %231 : vector<8x1xf32> to vector<8x8xf32>
    %233 = arith.subf %227, %232 : vector<8x8xf32>
    %234 = arith.mulf %233, %233 : vector<8x8xf32>
    %cst_156 = arith.constant dense<0.000000e+00> : vector<8xf32>
    %235 = vector.multi_reduction <add>, %234, %cst_156 [1] : vector<8x8xf32> to vector<8xf32>
    %236 = vector.shape_cast %235 : vector<8xf32> to vector<8x1xf32>
    %cst_157 = arith.constant 8.000000e+00 : f32
    %237 = vector.broadcast %cst_157 : f32 to vector<8x1xf32>
    %238 = arith.divf %236, %237 : vector<8x1xf32>
    %239 = vector.broadcast %231 : vector<8x1xf32> to vector<8x8xf32>
    %240 = arith.subf %227, %239 : vector<8x8xf32>
    %cst_158 = arith.constant 9.99999974E-6 : f32
    %241 = vector.broadcast %cst_158 : f32 to vector<8x1xf32>
    %242 = arith.addf %238, %241 : vector<8x1xf32>
    %243 = math.rsqrt %242 : vector<8x1xf32>
    %244 = vector.broadcast %243 : vector<8x1xf32> to vector<8x8xf32>
    %245 = arith.mulf %240, %244 : vector<8x8xf32>
    %246 = vector.broadcast %13 : vector<1x8xf32> to vector<8x8xf32>
    %247 = arith.mulf %245, %246 : vector<8x8xf32>
    %248 = vector.broadcast %14 : vector<1x8xf32> to vector<8x8xf32>
    %249 = arith.addf %247, %248 : vector<8x8xf32>
    %cst_159 = arith.constant dense<0.000000e+00> : vector<8x24xf32>
    %250 = tpu.matmul %249, %15, %cst_159 {dimension_numbers = #tpu.dot_dimension_numbers<[1], [0], [0], [1], [0, 0, 1, 1], [], []>} : vector<8x8xf32>, vector<8x24xf32>, vector<8x24xf32> -> vector<8x24xf32>
    %251 = vector.broadcast %16 : vector<1x24xf32> to vector<8x24xf32>
    %252 = arith.addf %250, %251 : vector<8x24xf32>
    %253 = vector.extract_strided_slice %252 {offsets = [0, 0], sizes = [8, 8], strides = [1, 1]} : vector<8x24xf32> to vector<8x8xf32>
    %254 = vector.extract_strided_slice %252 {offsets = [0, 8], sizes = [8, 8], strides = [1, 1]} : vector<8x24xf32> to vector<8x8xf32>
    %255 = tpu.transpose %254, [1, 0] : vector<8x8xf32> -> vector<8x8xf32>
    %256 = vector.extract_strided_slice %252 {offsets = [0, 16], sizes = [8, 8], strides = [1, 1]} : vector<8x24xf32> to vector<8x8xf32>
    %257 = tpu.transpose %256, [1, 0] : vector<8x8xf32> -> vector<8x8xf32>
    %258 = vector.shape_cast %253 : vector<8x8xf32> to vector<8x8x1xf32>
    %259 = vector.shape_cast %255 : vector<8x8xf32> to vector<1x8x8xf32>
    %260 = vector.broadcast %258 : vector<8x8x1xf32> to vector<8x8x8xf32>
    %261 = vector.broadcast %259 : vector<1x8x8xf32> to vector<8x8x8xf32>
    %262 = arith.mulf %260, %261 : vector<8x8x8xf32>
    %cst_160 = arith.constant dense<0xFF800000> : vector<8x8xf32>
    %263 = vector.multi_reduction <maximumf>, %262, %cst_160 [2] : vector<8x8x8xf32> to vector<8x8xf32>
    %264 = vector.shape_cast %263 : vector<8x8xf32> to vector<8x8x1xf32>
    %265 = vector.broadcast %264 : vector<8x8x1xf32> to vector<8x8x8xf32>
    %266 = arith.subf %262, %265 : vector<8x8x8xf32>
    %267 = math.exp %266 : vector<8x8x8xf32>
    %cst_161 = arith.constant dense<0.000000e+00> : vector<8x8xf32>
    %268 = vector.multi_reduction <add>, %267, %cst_161 [2] : vector<8x8x8xf32> to vector<8x8xf32>
    %269 = vector.shape_cast %268 : vector<8x8xf32> to vector<8x8x1xf32>
    %270 = tpu.reciprocal %269 {approx = true} : vector<8x8x1xf32> -> vector<8x8x1xf32>
    %271 = vector.broadcast %270 : vector<8x8x1xf32> to vector<8x8x8xf32>
    %272 = arith.mulf %267, %271 : vector<8x8x8xf32>
    %273 = vector.shape_cast %257 : vector<8x8xf32> to vector<1x8x8xf32>
    %274 = vector.broadcast %273 : vector<1x8x8xf32> to vector<8x8x8xf32>
    %275 = arith.mulf %272, %274 : vector<8x8x8xf32>
    %cst_162 = arith.constant dense<0.000000e+00> : vector<8x8xf32>
    %276 = vector.multi_reduction <add>, %275, %cst_162 [2] : vector<8x8x8xf32> to vector<8x8xf32>
    %cst_163 = arith.constant dense<0.000000e+00> : vector<8x8xf32>
    %277 = tpu.matmul %276, %17, %cst_163 {dimension_numbers = #tpu.dot_dimension_numbers<[1], [0], [0], [1], [0, 0, 1, 1], [], []>} : vector<8x8xf32>, vector<8x8xf32>, vector<8x8xf32> -> vector<8x8xf32>
    %278 = vector.broadcast %18 : vector<1x8xf32> to vector<8x8xf32>
    %279 = arith.addf %277, %278 : vector<8x8xf32>
    %280 = arith.addf %249, %279 : vector<8x8xf32>
    %281 = vector.broadcast %19 : vector<1x8xf32> to vector<8x8xf32>
    %282 = arith.mulf %280, %281 : vector<8x8xf32>
    %cst_164 = arith.constant dense<0.000000e+00> : vector<8xf32>
    %283 = vector.multi_reduction <add>, %282, %cst_164 [1] : vector<8x8xf32> to vector<8xf32>
    %284 = vector.shape_cast %283 : vector<8xf32> to vector<8x1xf32>
    %285 = vector.broadcast %20 : vector<1x1xf32> to vector<8x1xf32>
    %286 = arith.addf %284, %285 : vector<8x1xf32>
    %cst_165 = arith.constant 0.000000e+00 : f32
    %287 = vector.broadcast %cst_165 : f32 to vector<8x1xf32>
    %288 = arith.cmpf ogt, %286, %287 : vector<8x1xf32>
    %cst_166 = arith.constant 0.00999999977 : f32
    %289 = vector.broadcast %cst_166 : f32 to vector<8x1xf32>
    %290 = arith.mulf %289, %286 : vector<8x1xf32>
    %291 = arith.select %288, %286, %290 : vector<8x1xi1>, vector<8x1xf32>
    %292 = vector.broadcast %291 : vector<8x1xf32> to vector<8x8xf32>
    %293 = vector.broadcast %21 : vector<1x8xf32> to vector<8x8xf32>
    %294 = arith.mulf %292, %293 : vector<8x8xf32>
    %295 = vector.broadcast %22 : vector<1x8xf32> to vector<8x8xf32>
    %296 = arith.addf %294, %295 : vector<8x8xf32>
    %297 = arith.addf %280, %296 : vector<8x8xf32>
    %cst_167 = arith.constant dense<0.000000e+00> : vector<8x8xf32>
    %298 = tpu.matmul %297, %27, %cst_167 {dimension_numbers = #tpu.dot_dimension_numbers<[1], [0], [0], [1], [0, 0, 1, 1], [], []>} : vector<8x8xf32>, vector<8x8xf32>, vector<8x8xf32> -> vector<8x8xf32>
    %299 = vector.broadcast %28 : vector<1x8xf32> to vector<8x8xf32>
    %300 = arith.addf %298, %299 : vector<8x8xf32>
    %cst_168 = arith.constant 0.000000e+00 : f32
    %301 = vector.broadcast %cst_168 : f32 to vector<8x8xf32>
    %302 = arith.cmpf ogt, %300, %301 : vector<8x8xf32>
    %cst_169 = arith.constant 0.00999999977 : f32
    %303 = vector.broadcast %cst_169 : f32 to vector<8x8xf32>
    %304 = arith.mulf %303, %300 : vector<8x8xf32>
    %305 = arith.select %302, %300, %304 : vector<8x8xi1>, vector<8x8xf32>
    %cst_170 = arith.constant dense<0.000000e+00> : vector<8x8xf32>
    %306 = tpu.matmul %305, %29, %cst_170 {dimension_numbers = #tpu.dot_dimension_numbers<[1], [0], [0], [1], [0, 0, 1, 1], [], []>} : vector<8x8xf32>, vector<8x8xf32>, vector<8x8xf32> -> vector<8x8xf32>
    %307 = vector.broadcast %30 : vector<1x8xf32> to vector<8x8xf32>
    %308 = arith.addf %306, %307 : vector<8x8xf32>
    %cst_171 = arith.constant dense<0.000000e+00> : vector<8x8xf32>
    %309 = tpu.matmul %308, %27, %cst_171 {dimension_numbers = #tpu.dot_dimension_numbers<[1], [0], [0], [1], [0, 0, 1, 1], [], []>} : vector<8x8xf32>, vector<8x8xf32>, vector<8x8xf32> -> vector<8x8xf32>
    %310 = vector.broadcast %28 : vector<1x8xf32> to vector<8x8xf32>
    %311 = arith.addf %309, %310 : vector<8x8xf32>
    %cst_172 = arith.constant 0.000000e+00 : f32
    %312 = vector.broadcast %cst_172 : f32 to vector<8x8xf32>
    %313 = arith.cmpf ogt, %311, %312 : vector<8x8xf32>
    %cst_173 = arith.constant 0.00999999977 : f32
    %314 = vector.broadcast %cst_173 : f32 to vector<8x8xf32>
    %315 = arith.mulf %314, %311 : vector<8x8xf32>
    %316 = arith.select %313, %311, %315 : vector<8x8xi1>, vector<8x8xf32>
    %cst_174 = arith.constant dense<0.000000e+00> : vector<8x8xf32>
    %317 = tpu.matmul %316, %29, %cst_174 {dimension_numbers = #tpu.dot_dimension_numbers<[1], [0], [0], [1], [0, 0, 1, 1], [], []>} : vector<8x8xf32>, vector<8x8xf32>, vector<8x8xf32> -> vector<8x8xf32>
    %318 = vector.broadcast %30 : vector<1x8xf32> to vector<8x8xf32>
    %319 = arith.addf %317, %318 : vector<8x8xf32>
    %320 = arith.addf %308, %319 : vector<8x8xf32>
    %321 = vector.broadcast %185 : vector<1x8xf32> to vector<8x8xf32>
    %322 = arith.addf %320, %321 : vector<8x8xf32>
    %323 = vector.broadcast %33 : vector<8x1xf32> to vector<8x8xf32>
    %324 = arith.mulf %322, %323 : vector<8x8xf32>
    %cst_175 = arith.constant dense<0.000000e+00> : vector<8xf32>
    %325 = vector.multi_reduction <add>, %324, %cst_175 [0] : vector<8x8xf32> to vector<8xf32>
    %326 = vector.shape_cast %325 : vector<8xf32> to vector<1x8xf32>
    %327 = vector.broadcast %34 : vector<1x1xf32> to vector<1x8xf32>
    %328 = arith.addf %326, %327 : vector<1x8xf32>
    %cst_176 = arith.constant 5.000000e-01 : f32
    %329 = vector.broadcast %cst_176 : f32 to vector<1x8xf32>
    %330 = arith.mulf %329, %328 : vector<1x8xf32>
    %331 = math.tanh %330 : vector<1x8xf32>
    %cst_177 = arith.constant 1.000000e+00 : f32
    %332 = vector.broadcast %cst_177 : f32 to vector<1x8xf32>
    %333 = arith.addf %331, %332 : vector<1x8xf32>
    %cst_178 = arith.constant 5.000000e-01 : f32
    %334 = vector.broadcast %cst_178 : f32 to vector<1x8xf32>
    %335 = arith.mulf %334, %333 : vector<1x8xf32>
    %c0_179 = arith.constant 0 : index
    %c0_180 = arith.constant 0 : index
    %c0_181 = arith.constant 0 : index
    %336 = vector.load %arg38[%c0_179, %c0_180, %c0_181] : memref<2x1x8xf32, #tpu.memory_space<vmem>>, vector<1x1x8xf32>
    %337 = vector.shape_cast %336 : vector<1x1x8xf32> to vector<1x8xf32>
    %338 = vector.shape_cast %335 : vector<1x8xf32> to vector<1x1x8xf32>
    tpu.vector_store %arg38[%c0_179, %c0_180, %c0_181], %338 {strides = array<i32>} : memref<2x1x8xf32, #tpu.memory_space<vmem>>, vector<1x1x8xf32>,
    %c1_182 = arith.constant 1 : index
    %c0_183 = arith.constant 0 : index
    %c0_184 = arith.constant 0 : index
    %339 = vector.load %arg0[%c1_182, %c0_183, %c0_184] : memref<2x8x8xf32, #tpu.memory_space<vmem>>, vector<1x8x8xf32>
    %340 = vector.shape_cast %339 : vector<1x8x8xf32> to vector<8x8xf32>
    %341 = tpu.transpose %340, [1, 0] : vector<8x8xf32> -> vector<8x8xf32>
    %cst_185 = arith.constant dense<0.000000e+00> : vector<8x8xf32>
    %342 = tpu.matmul %46, %341, %cst_185 {dimension_numbers = #tpu.dot_dimension_numbers<[1], [0], [0], [1], [0, 0, 1, 1], [], []>} : vector<8x8xf32>, vector<8x8xf32>, vector<8x8xf32> -> vector<8x8xf32>
    %c0_186 = arith.constant 0 : index
    %c0_187 = arith.constant 0 : index
    %c0_188 = arith.constant 0 : index
    %343 = vector.load %arg2[%c0_186, %c0_187, %c0_188] : memref<3x8x8xf32, #tpu.memory_space<vmem>>, vector<1x8x8xf32>
    %344 = vector.shape_cast %343 : vector<1x8x8xf32> to vector<8x8xf32>
    %cst_189 = arith.constant dense<0.000000e+00> : vector<8x8xf32>
    %345 = tpu.matmul %342, %344, %cst_189 {dimension_numbers = #tpu.dot_dimension_numbers<[1], [0], [0], [1], [0, 0, 1, 1], [], []>} : vector<8x8xf32>, vector<8x8xf32>, vector<8x8xf32> -> vector<8x8xf32>
    %cst_190 = arith.constant dense<0.000000e+00> : vector<8x8xf32>
    %346 = tpu.matmul %41, %341, %cst_190 {dimension_numbers = #tpu.dot_dimension_numbers<[1], [0], [0], [1], [0, 0, 1, 1], [], []>} : vector<8x8xf32>, vector<8x8xf32>, vector<8x8xf32> -> vector<8x8xf32>
    %c1_191 = arith.constant 1 : index
    %c0_192 = arith.constant 0 : index
    %c0_193 = arith.constant 0 : index
    %347 = vector.load %arg2[%c1_191, %c0_192, %c0_193] : memref<3x8x8xf32, #tpu.memory_space<vmem>>, vector<1x8x8xf32>
    %348 = vector.shape_cast %347 : vector<1x8x8xf32> to vector<8x8xf32>
    %cst_194 = arith.constant dense<0.000000e+00> : vector<8x8xf32>
    %349 = tpu.matmul %346, %348, %cst_194 {dimension_numbers = #tpu.dot_dimension_numbers<[1], [0], [0], [1], [0, 0, 1, 1], [], []>} : vector<8x8xf32>, vector<8x8xf32>, vector<8x8xf32> -> vector<8x8xf32>
    %350 = arith.addf %345, %349 : vector<8x8xf32>
    %c2_195 = arith.constant 2 : index
    %c0_196 = arith.constant 0 : index
    %c0_197 = arith.constant 0 : index
    %351 = vector.load %arg2[%c2_195, %c0_196, %c0_197] : memref<3x8x8xf32, #tpu.memory_space<vmem>>, vector<1x8x8xf32>
    %352 = vector.shape_cast %351 : vector<1x8x8xf32> to vector<8x8xf32>
    %cst_198 = arith.constant dense<0.000000e+00> : vector<8x8xf32>
    %353 = tpu.matmul %341, %352, %cst_198 {dimension_numbers = #tpu.dot_dimension_numbers<[1], [0], [0], [1], [0, 0, 1, 1], [], []>} : vector<8x8xf32>, vector<8x8xf32>, vector<8x8xf32> -> vector<8x8xf32>
    %354 = arith.addf %350, %353 : vector<8x8xf32>
    %355 = vector.broadcast %1 : vector<1x8xf32> to vector<8x8xf32>
    %356 = arith.addf %354, %355 : vector<8x8xf32>
    %cst_199 = arith.constant 0.000000e+00 : f32
    %357 = vector.broadcast %cst_199 : f32 to vector<8x8xf32>
    %358 = arith.maximumf %356, %357 : vector<8x8xf32>
    %cst_200 = arith.constant dense<0.000000e+00> : vector<8x8xf32>
    %359 = tpu.matmul %46, %358, %cst_200 {dimension_numbers = #tpu.dot_dimension_numbers<[1], [0], [0], [1], [0, 0, 1, 1], [], []>} : vector<8x8xf32>, vector<8x8xf32>, vector<8x8xf32> -> vector<8x8xf32>
    %c0_201 = arith.constant 0 : index
    %c0_202 = arith.constant 0 : index
    %c0_203 = arith.constant 0 : index
    %360 = vector.load %arg4[%c0_201, %c0_202, %c0_203] : memref<3x8x8xf32, #tpu.memory_space<vmem>>, vector<1x8x8xf32>
    %361 = vector.shape_cast %360 : vector<1x8x8xf32> to vector<8x8xf32>
    %cst_204 = arith.constant dense<0.000000e+00> : vector<8x8xf32>
    %362 = tpu.matmul %359, %361, %cst_204 {dimension_numbers = #tpu.dot_dimension_numbers<[1], [0], [0], [1], [0, 0, 1, 1], [], []>} : vector<8x8xf32>, vector<8x8xf32>, vector<8x8xf32> -> vector<8x8xf32>
    %cst_205 = arith.constant dense<0.000000e+00> : vector<8x8xf32>
    %363 = tpu.matmul %41, %358, %cst_205 {dimension_numbers = #tpu.dot_dimension_numbers<[1], [0], [0], [1], [0, 0, 1, 1], [], []>} : vector<8x8xf32>, vector<8x8xf32>, vector<8x8xf32> -> vector<8x8xf32>
    %c1_206 = arith.constant 1 : index
    %c0_207 = arith.constant 0 : index
    %c0_208 = arith.constant 0 : index
    %364 = vector.load %arg4[%c1_206, %c0_207, %c0_208] : memref<3x8x8xf32, #tpu.memory_space<vmem>>, vector<1x8x8xf32>
    %365 = vector.shape_cast %364 : vector<1x8x8xf32> to vector<8x8xf32>
    %cst_209 = arith.constant dense<0.000000e+00> : vector<8x8xf32>
    %366 = tpu.matmul %363, %365, %cst_209 {dimension_numbers = #tpu.dot_dimension_numbers<[1], [0], [0], [1], [0, 0, 1, 1], [], []>} : vector<8x8xf32>, vector<8x8xf32>, vector<8x8xf32> -> vector<8x8xf32>
    %367 = arith.addf %362, %366 : vector<8x8xf32>
    %c2_210 = arith.constant 2 : index
    %c0_211 = arith.constant 0 : index
    %c0_212 = arith.constant 0 : index
    %368 = vector.load %arg4[%c2_210, %c0_211, %c0_212] : memref<3x8x8xf32, #tpu.memory_space<vmem>>, vector<1x8x8xf32>
    %369 = vector.shape_cast %368 : vector<1x8x8xf32> to vector<8x8xf32>
    %cst_213 = arith.constant dense<0.000000e+00> : vector<8x8xf32>
    %370 = tpu.matmul %358, %369, %cst_213 {dimension_numbers = #tpu.dot_dimension_numbers<[1], [0], [0], [1], [0, 0, 1, 1], [], []>} : vector<8x8xf32>, vector<8x8xf32>, vector<8x8xf32> -> vector<8x8xf32>
    %371 = arith.addf %367, %370 : vector<8x8xf32>
    %372 = vector.broadcast %2 : vector<1x8xf32> to vector<8x8xf32>
    %373 = arith.addf %371, %372 : vector<8x8xf32>
    %cst_214 = arith.constant 0.000000e+00 : f32
    %374 = vector.broadcast %cst_214 : f32 to vector<8x8xf32>
    %375 = arith.maximumf %373, %374 : vector<8x8xf32>
    %376 = arith.addf %375, %341 : vector<8x8xf32>
    %cst_215 = arith.constant 0.000000e+00 : f32
    %377 = vector.broadcast %cst_215 : f32 to vector<8x8xf32>
    %378 = arith.maximumf %376, %377 : vector<8x8xf32>
    %cst_216 = arith.constant 2.82842708 : f32
    %379 = vector.broadcast %cst_216 : f32 to vector<8x8xf32>
    %380 = arith.mulf %378, %379 : vector<8x8xf32>
    %381 = arith.addf %380, %0 : vector<8x8xf32>
    %cst_217 = arith.constant dense<0.000000e+00> : vector<8xf32>
    %382 = vector.multi_reduction <add>, %381, %cst_217 [1] : vector<8x8xf32> to vector<8xf32>
    %383 = vector.shape_cast %382 : vector<8xf32> to vector<8x1xf32>
    %cst_218 = arith.constant 8.000000e+00 : f32
    %384 = vector.broadcast %cst_218 : f32 to vector<8x1xf32>
    %385 = arith.divf %383, %384 : vector<8x1xf32>
    %386 = vector.broadcast %385 : vector<8x1xf32> to vector<8x8xf32>
    %387 = arith.subf %381, %386 : vector<8x8xf32>
    %388 = arith.mulf %387, %387 : vector<8x8xf32>
    %cst_219 = arith.constant dense<0.000000e+00> : vector<8xf32>
    %389 = vector.multi_reduction <add>, %388, %cst_219 [1] : vector<8x8xf32> to vector<8xf32>
    %390 = vector.shape_cast %389 : vector<8xf32> to vector<8x1xf32>
    %cst_220 = arith.constant 8.000000e+00 : f32
    %391 = vector.broadcast %cst_220 : f32 to vector<8x1xf32>
    %392 = arith.divf %390, %391 : vector<8x1xf32>
    %393 = vector.broadcast %385 : vector<8x1xf32> to vector<8x8xf32>
    %394 = arith.subf %381, %393 : vector<8x8xf32>
    %cst_221 = arith.constant 9.99999974E-6 : f32
    %395 = vector.broadcast %cst_221 : f32 to vector<8x1xf32>
    %396 = arith.addf %392, %395 : vector<8x1xf32>
    %397 = math.rsqrt %396 : vector<8x1xf32>
    %398 = vector.broadcast %397 : vector<8x1xf32> to vector<8x8xf32>
    %399 = arith.mulf %394, %398 : vector<8x8xf32>
    %400 = vector.broadcast %3 : vector<1x8xf32> to vector<8x8xf32>
    %401 = arith.mulf %399, %400 : vector<8x8xf32>
    %402 = vector.broadcast %4 : vector<1x8xf32> to vector<8x8xf32>
    %403 = arith.addf %401, %402 : vector<8x8xf32>
    %cst_222 = arith.constant dense<0.000000e+00> : vector<8x24xf32>
    %404 = tpu.matmul %403, %5, %cst_222 {dimension_numbers = #tpu.dot_dimension_numbers<[1], [0], [0], [1], [0, 0, 1, 1], [], []>} : vector<8x8xf32>, vector<8x24xf32>, vector<8x24xf32> -> vector<8x24xf32>
    %405 = vector.broadcast %6 : vector<1x24xf32> to vector<8x24xf32>
    %406 = arith.addf %404, %405 : vector<8x24xf32>
    %407 = vector.extract_strided_slice %406 {offsets = [0, 0], sizes = [8, 8], strides = [1, 1]} : vector<8x24xf32> to vector<8x8xf32>
    %408 = vector.extract_strided_slice %406 {offsets = [0, 8], sizes = [8, 8], strides = [1, 1]} : vector<8x24xf32> to vector<8x8xf32>
    %409 = tpu.transpose %408, [1, 0] : vector<8x8xf32> -> vector<8x8xf32>
    %410 = vector.extract_strided_slice %406 {offsets = [0, 16], sizes = [8, 8], strides = [1, 1]} : vector<8x24xf32> to vector<8x8xf32>
    %411 = tpu.transpose %410, [1, 0] : vector<8x8xf32> -> vector<8x8xf32>
    %412 = vector.shape_cast %407 : vector<8x8xf32> to vector<8x8x1xf32>
    %413 = vector.shape_cast %409 : vector<8x8xf32> to vector<1x8x8xf32>
    %414 = vector.broadcast %412 : vector<8x8x1xf32> to vector<8x8x8xf32>
    %415 = vector.broadcast %413 : vector<1x8x8xf32> to vector<8x8x8xf32>
    %416 = arith.mulf %414, %415 : vector<8x8x8xf32>
    %cst_223 = arith.constant dense<0xFF800000> : vector<8x8xf32>
    %417 = vector.multi_reduction <maximumf>, %416, %cst_223 [2] : vector<8x8x8xf32> to vector<8x8xf32>
    %418 = vector.shape_cast %417 : vector<8x8xf32> to vector<8x8x1xf32>
    %419 = vector.broadcast %418 : vector<8x8x1xf32> to vector<8x8x8xf32>
    %420 = arith.subf %416, %419 : vector<8x8x8xf32>
    %421 = math.exp %420 : vector<8x8x8xf32>
    %cst_224 = arith.constant dense<0.000000e+00> : vector<8x8xf32>
    %422 = vector.multi_reduction <add>, %421, %cst_224 [2] : vector<8x8x8xf32> to vector<8x8xf32>
    %423 = vector.shape_cast %422 : vector<8x8xf32> to vector<8x8x1xf32>
    %424 = tpu.reciprocal %423 {approx = true} : vector<8x8x1xf32> -> vector<8x8x1xf32>
    %425 = vector.broadcast %424 : vector<8x8x1xf32> to vector<8x8x8xf32>
    %426 = arith.mulf %421, %425 : vector<8x8x8xf32>
    %427 = vector.shape_cast %411 : vector<8x8xf32> to vector<1x8x8xf32>
    %428 = vector.broadcast %427 : vector<1x8x8xf32> to vector<8x8x8xf32>
    %429 = arith.mulf %426, %428 : vector<8x8x8xf32>
    %cst_225 = arith.constant dense<0.000000e+00> : vector<8x8xf32>
    %430 = vector.multi_reduction <add>, %429, %cst_225 [2] : vector<8x8x8xf32> to vector<8x8xf32>
    %cst_226 = arith.constant dense<0.000000e+00> : vector<8x8xf32>
    %431 = tpu.matmul %430, %7, %cst_226 {dimension_numbers = #tpu.dot_dimension_numbers<[1], [0], [0], [1], [0, 0, 1, 1], [], []>} : vector<8x8xf32>, vector<8x8xf32>, vector<8x8xf32> -> vector<8x8xf32>
    %432 = vector.broadcast %8 : vector<1x8xf32> to vector<8x8xf32>
    %433 = arith.addf %431, %432 : vector<8x8xf32>
    %434 = arith.addf %403, %433 : vector<8x8xf32>
    %435 = vector.broadcast %9 : vector<1x8xf32> to vector<8x8xf32>
    %436 = arith.mulf %434, %435 : vector<8x8xf32>
    %cst_227 = arith.constant dense<0.000000e+00> : vector<8xf32>
    %437 = vector.multi_reduction <add>, %436, %cst_227 [1] : vector<8x8xf32> to vector<8xf32>
    %438 = vector.shape_cast %437 : vector<8xf32> to vector<8x1xf32>
    %439 = vector.broadcast %10 : vector<1x1xf32> to vector<8x1xf32>
    %440 = arith.addf %438, %439 : vector<8x1xf32>
    %cst_228 = arith.constant 0.000000e+00 : f32
    %441 = vector.broadcast %cst_228 : f32 to vector<8x1xf32>
    %442 = arith.cmpf ogt, %440, %441 : vector<8x1xf32>
    %cst_229 = arith.constant 0.00999999977 : f32
    %443 = vector.broadcast %cst_229 : f32 to vector<8x1xf32>
    %444 = arith.mulf %443, %440 : vector<8x1xf32>
    %445 = arith.select %442, %440, %444 : vector<8x1xi1>, vector<8x1xf32>
    %446 = vector.broadcast %445 : vector<8x1xf32> to vector<8x8xf32>
    %447 = vector.broadcast %11 : vector<1x8xf32> to vector<8x8xf32>
    %448 = arith.mulf %446, %447 : vector<8x8xf32>
    %449 = vector.broadcast %12 : vector<1x8xf32> to vector<8x8xf32>
    %450 = arith.addf %448, %449 : vector<8x8xf32>
    %451 = arith.addf %434, %450 : vector<8x8xf32>
    %cst_230 = arith.constant dense<0.000000e+00> : vector<8x8xf32>
    %452 = tpu.matmul %451, %23, %cst_230 {dimension_numbers = #tpu.dot_dimension_numbers<[1], [0], [0], [1], [0, 0, 1, 1], [], []>} : vector<8x8xf32>, vector<8x8xf32>, vector<8x8xf32> -> vector<8x8xf32>
    %453 = vector.broadcast %24 : vector<1x8xf32> to vector<8x8xf32>
    %454 = arith.addf %452, %453 : vector<8x8xf32>
    %cst_231 = arith.constant 0.000000e+00 : f32
    %455 = vector.broadcast %cst_231 : f32 to vector<8x8xf32>
    %456 = arith.cmpf ogt, %454, %455 : vector<8x8xf32>
    %cst_232 = arith.constant 0.00999999977 : f32
    %457 = vector.broadcast %cst_232 : f32 to vector<8x8xf32>
    %458 = arith.mulf %457, %454 : vector<8x8xf32>
    %459 = arith.select %456, %454, %458 : vector<8x8xi1>, vector<8x8xf32>
    %cst_233 = arith.constant dense<0.000000e+00> : vector<8x8xf32>
    %460 = tpu.matmul %459, %25, %cst_233 {dimension_numbers = #tpu.dot_dimension_numbers<[1], [0], [0], [1], [0, 0, 1, 1], [], []>} : vector<8x8xf32>, vector<8x8xf32>, vector<8x8xf32> -> vector<8x8xf32>
    %461 = vector.broadcast %26 : vector<1x8xf32> to vector<8x8xf32>
    %462 = arith.addf %460, %461 : vector<8x8xf32>
    %463 = arith.addf %451, %462 : vector<8x8xf32>
    %464 = arith.addf %463, %341 : vector<8x8xf32>
    %465 = vector.broadcast %31 : vector<8x1xf32> to vector<8x8xf32>
    %466 = arith.mulf %464, %465 : vector<8x8xf32>
    %cst_234 = arith.constant dense<0.000000e+00> : vector<8xf32>
    %467 = vector.multi_reduction <add>, %466, %cst_234 [0] : vector<8x8xf32> to vector<8xf32>
    %468 = vector.shape_cast %467 : vector<8xf32> to vector<1x8xf32>
    %469 = vector.broadcast %32 : vector<1x1xf32> to vector<1x8xf32>
    %470 = arith.addf %468, %469 : vector<1x8xf32>
    %cst_235 = arith.constant 5.000000e-01 : f32
    %471 = vector.broadcast %cst_235 : f32 to vector<1x8xf32>
    %472 = arith.mulf %471, %470 : vector<1x8xf32>
    %473 = math.tanh %472 : vector<1x8xf32>
    %cst_236 = arith.constant 1.000000e+00 : f32
    %474 = vector.broadcast %cst_236 : f32 to vector<1x8xf32>
    %475 = arith.addf %473, %474 : vector<1x8xf32>
    %cst_237 = arith.constant 5.000000e-01 : f32
    %476 = vector.broadcast %cst_237 : f32 to vector<1x8xf32>
    %477 = arith.mulf %476, %475 : vector<1x8xf32>
    %478 = vector.broadcast %477 : vector<1x8xf32> to vector<8x8xf32>
    %479 = arith.addf %341, %478 : vector<8x8xf32>
    %cst_238 = arith.constant dense<0.000000e+00> : vector<8x8xf32>
    %480 = tpu.matmul %46, %479, %cst_238 {dimension_numbers = #tpu.dot_dimension_numbers<[1], [0], [0], [1], [0, 0, 1, 1], [], []>} : vector<8x8xf32>, vector<8x8xf32>, vector<8x8xf32> -> vector<8x8xf32>
    %c0_239 = arith.constant 0 : index
    %c0_240 = arith.constant 0 : index
    %c0_241 = arith.constant 0 : index
    %481 = vector.load %arg2[%c0_239, %c0_240, %c0_241] : memref<3x8x8xf32, #tpu.memory_space<vmem>>, vector<1x8x8xf32>
    %482 = vector.shape_cast %481 : vector<1x8x8xf32> to vector<8x8xf32>
    %cst_242 = arith.constant dense<0.000000e+00> : vector<8x8xf32>
    %483 = tpu.matmul %480, %482, %cst_242 {dimension_numbers = #tpu.dot_dimension_numbers<[1], [0], [0], [1], [0, 0, 1, 1], [], []>} : vector<8x8xf32>, vector<8x8xf32>, vector<8x8xf32> -> vector<8x8xf32>
    %cst_243 = arith.constant dense<0.000000e+00> : vector<8x8xf32>
    %484 = tpu.matmul %41, %479, %cst_243 {dimension_numbers = #tpu.dot_dimension_numbers<[1], [0], [0], [1], [0, 0, 1, 1], [], []>} : vector<8x8xf32>, vector<8x8xf32>, vector<8x8xf32> -> vector<8x8xf32>
    %c1_244 = arith.constant 1 : index
    %c0_245 = arith.constant 0 : index
    %c0_246 = arith.constant 0 : index
    %485 = vector.load %arg2[%c1_244, %c0_245, %c0_246] : memref<3x8x8xf32, #tpu.memory_space<vmem>>, vector<1x8x8xf32>
    %486 = vector.shape_cast %485 : vector<1x8x8xf32> to vector<8x8xf32>
    %cst_247 = arith.constant dense<0.000000e+00> : vector<8x8xf32>
    %487 = tpu.matmul %484, %486, %cst_247 {dimension_numbers = #tpu.dot_dimension_numbers<[1], [0], [0], [1], [0, 0, 1, 1], [], []>} : vector<8x8xf32>, vector<8x8xf32>, vector<8x8xf32> -> vector<8x8xf32>
    %488 = arith.addf %483, %487 : vector<8x8xf32>
    %c2_248 = arith.constant 2 : index
    %c0_249 = arith.constant 0 : index
    %c0_250 = arith.constant 0 : index
    %489 = vector.load %arg2[%c2_248, %c0_249, %c0_250] : memref<3x8x8xf32, #tpu.memory_space<vmem>>, vector<1x8x8xf32>
    %490 = vector.shape_cast %489 : vector<1x8x8xf32> to vector<8x8xf32>
    %cst_251 = arith.constant dense<0.000000e+00> : vector<8x8xf32>
    %491 = tpu.matmul %479, %490, %cst_251 {dimension_numbers = #tpu.dot_dimension_numbers<[1], [0], [0], [1], [0, 0, 1, 1], [], []>} : vector<8x8xf32>, vector<8x8xf32>, vector<8x8xf32> -> vector<8x8xf32>
    %492 = arith.addf %488, %491 : vector<8x8xf32>
    %493 = vector.broadcast %1 : vector<1x8xf32> to vector<8x8xf32>
    %494 = arith.addf %492, %493 : vector<8x8xf32>
    %cst_252 = arith.constant 0.000000e+00 : f32
    %495 = vector.broadcast %cst_252 : f32 to vector<8x8xf32>
    %496 = arith.maximumf %494, %495 : vector<8x8xf32>
    %cst_253 = arith.constant dense<0.000000e+00> : vector<8x8xf32>
    %497 = tpu.matmul %46, %496, %cst_253 {dimension_numbers = #tpu.dot_dimension_numbers<[1], [0], [0], [1], [0, 0, 1, 1], [], []>} : vector<8x8xf32>, vector<8x8xf32>, vector<8x8xf32> -> vector<8x8xf32>
    %c0_254 = arith.constant 0 : index
    %c0_255 = arith.constant 0 : index
    %c0_256 = arith.constant 0 : index
    %498 = vector.load %arg4[%c0_254, %c0_255, %c0_256] : memref<3x8x8xf32, #tpu.memory_space<vmem>>, vector<1x8x8xf32>
    %499 = vector.shape_cast %498 : vector<1x8x8xf32> to vector<8x8xf32>
    %cst_257 = arith.constant dense<0.000000e+00> : vector<8x8xf32>
    %500 = tpu.matmul %497, %499, %cst_257 {dimension_numbers = #tpu.dot_dimension_numbers<[1], [0], [0], [1], [0, 0, 1, 1], [], []>} : vector<8x8xf32>, vector<8x8xf32>, vector<8x8xf32> -> vector<8x8xf32>
    %cst_258 = arith.constant dense<0.000000e+00> : vector<8x8xf32>
    %501 = tpu.matmul %41, %496, %cst_258 {dimension_numbers = #tpu.dot_dimension_numbers<[1], [0], [0], [1], [0, 0, 1, 1], [], []>} : vector<8x8xf32>, vector<8x8xf32>, vector<8x8xf32> -> vector<8x8xf32>
    %c1_259 = arith.constant 1 : index
    %c0_260 = arith.constant 0 : index
    %c0_261 = arith.constant 0 : index
    %502 = vector.load %arg4[%c1_259, %c0_260, %c0_261] : memref<3x8x8xf32, #tpu.memory_space<vmem>>, vector<1x8x8xf32>
    %503 = vector.shape_cast %502 : vector<1x8x8xf32> to vector<8x8xf32>
    %cst_262 = arith.constant dense<0.000000e+00> : vector<8x8xf32>
    %504 = tpu.matmul %501, %503, %cst_262 {dimension_numbers = #tpu.dot_dimension_numbers<[1], [0], [0], [1], [0, 0, 1, 1], [], []>} : vector<8x8xf32>, vector<8x8xf32>, vector<8x8xf32> -> vector<8x8xf32>
    %505 = arith.addf %500, %504 : vector<8x8xf32>
    %c2_263 = arith.constant 2 : index
    %c0_264 = arith.constant 0 : index
    %c0_265 = arith.constant 0 : index
    %506 = vector.load %arg4[%c2_263, %c0_264, %c0_265] : memref<3x8x8xf32, #tpu.memory_space<vmem>>, vector<1x8x8xf32>
    %507 = vector.shape_cast %506 : vector<1x8x8xf32> to vector<8x8xf32>
    %cst_266 = arith.constant dense<0.000000e+00> : vector<8x8xf32>
    %508 = tpu.matmul %496, %507, %cst_266 {dimension_numbers = #tpu.dot_dimension_numbers<[1], [0], [0], [1], [0, 0, 1, 1], [], []>} : vector<8x8xf32>, vector<8x8xf32>, vector<8x8xf32> -> vector<8x8xf32>
    %509 = arith.addf %505, %508 : vector<8x8xf32>
    %510 = vector.broadcast %2 : vector<1x8xf32> to vector<8x8xf32>
    %511 = arith.addf %509, %510 : vector<8x8xf32>
    %cst_267 = arith.constant 0.000000e+00 : f32
    %512 = vector.broadcast %cst_267 : f32 to vector<8x8xf32>
    %513 = arith.maximumf %511, %512 : vector<8x8xf32>
    %514 = arith.addf %513, %479 : vector<8x8xf32>
    %cst_268 = arith.constant 0.000000e+00 : f32
    %515 = vector.broadcast %cst_268 : f32 to vector<8x8xf32>
    %516 = arith.maximumf %514, %515 : vector<8x8xf32>
    %cst_269 = arith.constant 2.82842708 : f32
    %517 = vector.broadcast %cst_269 : f32 to vector<8x8xf32>
    %518 = arith.mulf %516, %517 : vector<8x8xf32>
    %519 = arith.addf %518, %0 : vector<8x8xf32>
    %cst_270 = arith.constant dense<0.000000e+00> : vector<8xf32>
    %520 = vector.multi_reduction <add>, %519, %cst_270 [1] : vector<8x8xf32> to vector<8xf32>
    %521 = vector.shape_cast %520 : vector<8xf32> to vector<8x1xf32>
    %cst_271 = arith.constant 8.000000e+00 : f32
    %522 = vector.broadcast %cst_271 : f32 to vector<8x1xf32>
    %523 = arith.divf %521, %522 : vector<8x1xf32>
    %524 = vector.broadcast %523 : vector<8x1xf32> to vector<8x8xf32>
    %525 = arith.subf %519, %524 : vector<8x8xf32>
    %526 = arith.mulf %525, %525 : vector<8x8xf32>
    %cst_272 = arith.constant dense<0.000000e+00> : vector<8xf32>
    %527 = vector.multi_reduction <add>, %526, %cst_272 [1] : vector<8x8xf32> to vector<8xf32>
    %528 = vector.shape_cast %527 : vector<8xf32> to vector<8x1xf32>
    %cst_273 = arith.constant 8.000000e+00 : f32
    %529 = vector.broadcast %cst_273 : f32 to vector<8x1xf32>
    %530 = arith.divf %528, %529 : vector<8x1xf32>
    %531 = vector.broadcast %523 : vector<8x1xf32> to vector<8x8xf32>
    %532 = arith.subf %519, %531 : vector<8x8xf32>
    %cst_274 = arith.constant 9.99999974E-6 : f32
    %533 = vector.broadcast %cst_274 : f32 to vector<8x1xf32>
    %534 = arith.addf %530, %533 : vector<8x1xf32>
    %535 = math.rsqrt %534 : vector<8x1xf32>
    %536 = vector.broadcast %535 : vector<8x1xf32> to vector<8x8xf32>
    %537 = arith.mulf %532, %536 : vector<8x8xf32>
    %538 = vector.broadcast %13 : vector<1x8xf32> to vector<8x8xf32>
    %539 = arith.mulf %537, %538 : vector<8x8xf32>
    %540 = vector.broadcast %14 : vector<1x8xf32> to vector<8x8xf32>
    %541 = arith.addf %539, %540 : vector<8x8xf32>
    %cst_275 = arith.constant dense<0.000000e+00> : vector<8x24xf32>
    %542 = tpu.matmul %541, %15, %cst_275 {dimension_numbers = #tpu.dot_dimension_numbers<[1], [0], [0], [1], [0, 0, 1, 1], [], []>} : vector<8x8xf32>, vector<8x24xf32>, vector<8x24xf32> -> vector<8x24xf32>
    %543 = vector.broadcast %16 : vector<1x24xf32> to vector<8x24xf32>
    %544 = arith.addf %542, %543 : vector<8x24xf32>
    %545 = vector.extract_strided_slice %544 {offsets = [0, 0], sizes = [8, 8], strides = [1, 1]} : vector<8x24xf32> to vector<8x8xf32>
    %546 = vector.extract_strided_slice %544 {offsets = [0, 8], sizes = [8, 8], strides = [1, 1]} : vector<8x24xf32> to vector<8x8xf32>
    %547 = tpu.transpose %546, [1, 0] : vector<8x8xf32> -> vector<8x8xf32>
    %548 = vector.extract_strided_slice %544 {offsets = [0, 16], sizes = [8, 8], strides = [1, 1]} : vector<8x24xf32> to vector<8x8xf32>
    %549 = tpu.transpose %548, [1, 0] : vector<8x8xf32> -> vector<8x8xf32>
    %550 = vector.shape_cast %545 : vector<8x8xf32> to vector<8x8x1xf32>
    %551 = vector.shape_cast %547 : vector<8x8xf32> to vector<1x8x8xf32>
    %552 = vector.broadcast %550 : vector<8x8x1xf32> to vector<8x8x8xf32>
    %553 = vector.broadcast %551 : vector<1x8x8xf32> to vector<8x8x8xf32>
    %554 = arith.mulf %552, %553 : vector<8x8x8xf32>
    %cst_276 = arith.constant dense<0xFF800000> : vector<8x8xf32>
    %555 = vector.multi_reduction <maximumf>, %554, %cst_276 [2] : vector<8x8x8xf32> to vector<8x8xf32>
    %556 = vector.shape_cast %555 : vector<8x8xf32> to vector<8x8x1xf32>
    %557 = vector.broadcast %556 : vector<8x8x1xf32> to vector<8x8x8xf32>
    %558 = arith.subf %554, %557 : vector<8x8x8xf32>
    %559 = math.exp %558 : vector<8x8x8xf32>
    %cst_277 = arith.constant dense<0.000000e+00> : vector<8x8xf32>
    %560 = vector.multi_reduction <add>, %559, %cst_277 [2] : vector<8x8x8xf32> to vector<8x8xf32>
    %561 = vector.shape_cast %560 : vector<8x8xf32> to vector<8x8x1xf32>
    %562 = tpu.reciprocal %561 {approx = true} : vector<8x8x1xf32> -> vector<8x8x1xf32>
    %563 = vector.broadcast %562 : vector<8x8x1xf32> to vector<8x8x8xf32>
    %564 = arith.mulf %559, %563 : vector<8x8x8xf32>
    %565 = vector.shape_cast %549 : vector<8x8xf32> to vector<1x8x8xf32>
    %566 = vector.broadcast %565 : vector<1x8x8xf32> to vector<8x8x8xf32>
    %567 = arith.mulf %564, %566 : vector<8x8x8xf32>
    %cst_278 = arith.constant dense<0.000000e+00> : vector<8x8xf32>
    %568 = vector.multi_reduction <add>, %567, %cst_278 [2] : vector<8x8x8xf32> to vector<8x8xf32>
    %cst_279 = arith.constant dense<0.000000e+00> : vector<8x8xf32>
    %569 = tpu.matmul %568, %17, %cst_279 {dimension_numbers = #tpu.dot_dimension_numbers<[1], [0], [0], [1], [0, 0, 1, 1], [], []>} : vector<8x8xf32>, vector<8x8xf32>, vector<8x8xf32> -> vector<8x8xf32>
    %570 = vector.broadcast %18 : vector<1x8xf32> to vector<8x8xf32>
    %571 = arith.addf %569, %570 : vector<8x8xf32>
    %572 = arith.addf %541, %571 : vector<8x8xf32>
    %573 = vector.broadcast %19 : vector<1x8xf32> to vector<8x8xf32>
    %574 = arith.mulf %572, %573 : vector<8x8xf32>
    %cst_280 = arith.constant dense<0.000000e+00> : vector<8xf32>
    %575 = vector.multi_reduction <add>, %574, %cst_280 [1] : vector<8x8xf32> to vector<8xf32>
    %576 = vector.shape_cast %575 : vector<8xf32> to vector<8x1xf32>
    %577 = vector.broadcast %20 : vector<1x1xf32> to vector<8x1xf32>
    %578 = arith.addf %576, %577 : vector<8x1xf32>
    %cst_281 = arith.constant 0.000000e+00 : f32
    %579 = vector.broadcast %cst_281 : f32 to vector<8x1xf32>
    %580 = arith.cmpf ogt, %578, %579 : vector<8x1xf32>
    %cst_282 = arith.constant 0.00999999977 : f32
    %581 = vector.broadcast %cst_282 : f32 to vector<8x1xf32>
    %582 = arith.mulf %581, %578 : vector<8x1xf32>
    %583 = arith.select %580, %578, %582 : vector<8x1xi1>, vector<8x1xf32>
    %584 = vector.broadcast %583 : vector<8x1xf32> to vector<8x8xf32>
    %585 = vector.broadcast %21 : vector<1x8xf32> to vector<8x8xf32>
    %586 = arith.mulf %584, %585 : vector<8x8xf32>
    %587 = vector.broadcast %22 : vector<1x8xf32> to vector<8x8xf32>
    %588 = arith.addf %586, %587 : vector<8x8xf32>
    %589 = arith.addf %572, %588 : vector<8x8xf32>
    %cst_283 = arith.constant dense<0.000000e+00> : vector<8x8xf32>
    %590 = tpu.matmul %589, %27, %cst_283 {dimension_numbers = #tpu.dot_dimension_numbers<[1], [0], [0], [1], [0, 0, 1, 1], [], []>} : vector<8x8xf32>, vector<8x8xf32>, vector<8x8xf32> -> vector<8x8xf32>
    %591 = vector.broadcast %28 : vector<1x8xf32> to vector<8x8xf32>
    %592 = arith.addf %590, %591 : vector<8x8xf32>
    %cst_284 = arith.constant 0.000000e+00 : f32
    %593 = vector.broadcast %cst_284 : f32 to vector<8x8xf32>
    %594 = arith.cmpf ogt, %592, %593 : vector<8x8xf32>
    %cst_285 = arith.constant 0.00999999977 : f32
    %595 = vector.broadcast %cst_285 : f32 to vector<8x8xf32>
    %596 = arith.mulf %595, %592 : vector<8x8xf32>
    %597 = arith.select %594, %592, %596 : vector<8x8xi1>, vector<8x8xf32>
    %cst_286 = arith.constant dense<0.000000e+00> : vector<8x8xf32>
    %598 = tpu.matmul %597, %29, %cst_286 {dimension_numbers = #tpu.dot_dimension_numbers<[1], [0], [0], [1], [0, 0, 1, 1], [], []>} : vector<8x8xf32>, vector<8x8xf32>, vector<8x8xf32> -> vector<8x8xf32>
    %599 = vector.broadcast %30 : vector<1x8xf32> to vector<8x8xf32>
    %600 = arith.addf %598, %599 : vector<8x8xf32>
    %cst_287 = arith.constant dense<0.000000e+00> : vector<8x8xf32>
    %601 = tpu.matmul %600, %27, %cst_287 {dimension_numbers = #tpu.dot_dimension_numbers<[1], [0], [0], [1], [0, 0, 1, 1], [], []>} : vector<8x8xf32>, vector<8x8xf32>, vector<8x8xf32> -> vector<8x8xf32>
    %602 = vector.broadcast %28 : vector<1x8xf32> to vector<8x8xf32>
    %603 = arith.addf %601, %602 : vector<8x8xf32>
    %cst_288 = arith.constant 0.000000e+00 : f32
    %604 = vector.broadcast %cst_288 : f32 to vector<8x8xf32>
    %605 = arith.cmpf ogt, %603, %604 : vector<8x8xf32>
    %cst_289 = arith.constant 0.00999999977 : f32
    %606 = vector.broadcast %cst_289 : f32 to vector<8x8xf32>
    %607 = arith.mulf %606, %603 : vector<8x8xf32>
    %608 = arith.select %605, %603, %607 : vector<8x8xi1>, vector<8x8xf32>
    %cst_290 = arith.constant dense<0.000000e+00> : vector<8x8xf32>
    %609 = tpu.matmul %608, %29, %cst_290 {dimension_numbers = #tpu.dot_dimension_numbers<[1], [0], [0], [1], [0, 0, 1, 1], [], []>} : vector<8x8xf32>, vector<8x8xf32>, vector<8x8xf32> -> vector<8x8xf32>
    %610 = vector.broadcast %30 : vector<1x8xf32> to vector<8x8xf32>
    %611 = arith.addf %609, %610 : vector<8x8xf32>
    %612 = arith.addf %600, %611 : vector<8x8xf32>
    %613 = vector.broadcast %477 : vector<1x8xf32> to vector<8x8xf32>
    %614 = arith.addf %612, %613 : vector<8x8xf32>
    %615 = vector.broadcast %33 : vector<8x1xf32> to vector<8x8xf32>
    %616 = arith.mulf %614, %615 : vector<8x8xf32>
    %cst_291 = arith.constant dense<0.000000e+00> : vector<8xf32>
    %617 = vector.multi_reduction <add>, %616, %cst_291 [0] : vector<8x8xf32> to vector<8xf32>
    %618 = vector.shape_cast %617 : vector<8xf32> to vector<1x8xf32>
    %619 = vector.broadcast %34 : vector<1x1xf32> to vector<1x8xf32>
    %620 = arith.addf %618, %619 : vector<1x8xf32>
    %cst_292 = arith.constant 5.000000e-01 : f32
    %621 = vector.broadcast %cst_292 : f32 to vector<1x8xf32>
    %622 = arith.mulf %621, %620 : vector<1x8xf32>
    %623 = math.tanh %622 : vector<1x8xf32>
    %cst_293 = arith.constant 1.000000e+00 : f32
    %624 = vector.broadcast %cst_293 : f32 to vector<1x8xf32>
    %625 = arith.addf %623, %624 : vector<1x8xf32>
    %cst_294 = arith.constant 5.000000e-01 : f32
    %626 = vector.broadcast %cst_294 : f32 to vector<1x8xf32>
    %627 = arith.mulf %626, %625 : vector<1x8xf32>
    %c1_295 = arith.constant 1 : index
    %c0_296 = arith.constant 0 : index
    %c0_297 = arith.constant 0 : index
    %628 = vector.load %arg38[%c1_295, %c0_296, %c0_297] : memref<2x1x8xf32, #tpu.memory_space<vmem>>, vector<1x1x8xf32>
    %629 = vector.shape_cast %628 : vector<1x1x8xf32> to vector<1x8xf32>
    %630 = vector.shape_cast %627 : vector<1x8xf32> to vector<1x1x8xf32>
    tpu.vector_store %arg38[%c1_295, %c0_296, %c0_297], %630 {strides = array<i32>} : memref<2x1x8xf32, #tpu.memory_space<vmem>>, vector<1x1x8xf32>,
    return
  }
}

</mosaic_0001>

<bundles_post_ra>
// kernel: kbjnet_forward.1
= control target key start
LH: loop header
LB: loop body
LE: loop exit
PB: predicated region body
PF: predicated region fallthrough
CT: control target
= control target key end

     0   :  { %s4382_s6 = smov 1   ;;  %s4383_s10 = smov 2   ;;  %s5259_s0 = inlined_call_operand.smem [shape: u32[39], index: -1, kind: input, shape index: {}] }
   0x1   :  { %s4457_s5 = sld [smem:[%s5259_s0]]   ;;  %s4384_s14 = smov 3  }
   0x2   :  { %s4462_s9 = sld [smem:[%s5259_s0 + %s4382_s6]]   ;;  %s4385_s18 = smov 4  }
   0x3   :  { %s4467_s13 = sld [smem:[%s5259_s0 + %s4383_s10]]   ;;  %s4386_s22 = smov 5  }
   0x4   :  { %s4472_s17 = sld [smem:[%s5259_s0 + %s4384_s14]]   ;;  %s4387_s26 = smov 6  }
   0x5   :  { %s4477_s21 = sld [smem:[%s5259_s0 + %s4385_s18]]   ;;  %s4388_s30 = smov 7  }
   0x6   :  { %s4482_s25 = sld [smem:[%s5259_s0 + %s4386_s22]]   ;;  %s4389_s4 = smov 8  }
   0x7   :  { %5279 = sst [smem:[#allocation52_spill]] %s4457_s5  ;;  %s4390_s10 = smov 9  }
   0x8   :  { %5280 = sst [smem:[#allocation53_spill]] %s4462_s9  ;;  %s4391_s15 = smov 10  }
   0x9   :  { %5281 = sst [smem:[#allocation54_spill]] %s4467_s13  ;;  %s4392_s20 = smov 11  }
   0xa   :  { %5282 = sst [smem:[#allocation55_spill]] %s4472_s17  ;;  %s4394_s1 = smov 13  }
   0xb   :  { %5283 = sst [smem:[#allocation56_spill]] %s4477_s21  ;;  %s4395_s7 = smov 14  }
   0xc   :  { %5284 = sst [smem:[#allocation57_spill]] %s4482_s25  ;;  %s4397_s22 = smov 16  }
   0xd   :  { %s4487_s29 = sld [smem:[%s5259_s0 + %s4387_s26]]   ;;  %s4393_s26 = smov 12  }
   0xe   :  { %s4492_s3 = sld [smem:[%s5259_s0 + %s4388_s30]]   ;;  %s4398_s28 = smov 17  }
   0xf   :  { %s4497_s8 = sld [smem:[%s5259_s0 + %s4389_s4]]  }
  0x10   :  { %s4502_s14 = sld [smem:[%s5259_s0 + %s4390_s10]]   ;;  %s4403_s10 = smov 22  }
  0x11   :  { %s4507_s19 = sld [smem:[%s5259_s0 + %s4391_s15]]   ;;  %s4396_s15 = smov 15  }
  0x12   :  { %s4512_s24 = sld [smem:[%s5259_s0 + %s4392_s20]]  }
  0x13   :  { %s4517_s30 = sld [smem:[%s5259_s0 + %s4393_s26]]  }
  0x14   :  { %s3459_s6 = sld [smem:[%s5259_s0 + %s4394_s1]]  }
  0x15   :  { %5285 = sst [smem:[#allocation58_spill]] %s4497_s8 }
  0x16   :  { %s4525_s12 = sld [smem:[%s5259_s0 + %s4395_s7]]   ;;  %s4399_s7 = smov 18  }
  0x17   :  { %s4530_s20 = sld [smem:[%s5259_s0 + %s4396_s15]]   ;;  %s4400_s15 = smov 19  }
  0x18   :  { %s4535_s27 = sld [smem:[%s5259_s0 + %s4397_s22]]   ;;  %s4401_s22 = smov 20  }
  0x19   :  { %s4540_s4 = sld [smem:[%s5259_s0 + %s4398_s28]]   ;;  %s4402_s28 = smov 21  }
  0x1a   :  { %s4545_s8 = sld [smem:[%s5259_s0 + %s4399_s7]]   ;;  %v82_v0 = vstv %s3459_s6  ;;  %s4404_s6 = smov 24  }
  0x1b   :  { %s4550_s9 = sld [smem:[%s5259_s0 + %s4400_s15]]   ;;  %83 = vst [vmem:[#allocation2] sm:$0x1] %v82_v0 }
  0x1c   :  { %5286 = sst [smem:[#allocation59_spill]] %s4525_s12  ;;  %s4419_s12 = smov 37  }
  0x1d   :  { %s4555_s1 = sld [smem:[%s5259_s0 + %s4401_s22]]   ;;  %s4405_s22 = smov 25  }
  0x1e   :  { %5287 = sst [smem:[#allocation60_spill]] %s4535_s27  ;;  %s4407_s27 = smov 27  }
  0x1f   :  { %5288 = sst [smem:[#allocation61_spill]] %s4540_s4  ;;  %s4406_s4 = smov 26  }
  0x20   :  { %5289 = sst [smem:[#allocation62_spill]] %s4545_s8  ;;  %s4409_s8 = smov 29  }
  0x21   :  { %5290 = sst [smem:[#allocation63_spill]] %s4550_s9 }
  0x22   :  { %s4560_s7 = sld [smem:[%s5259_s0 + %s4402_s28]]   ;;  %s4418_s28 = smov 35  }
  0x23   :  { %s4565_s15 = sld [smem:[%s5259_s0 + %s4403_s10]]  }
  0x24   :  { %s4570_s23 = sld [smem:[%s5259_s0 + %s4404_s6]]   ;;  %s4408_s6 = smov 28  }
  0x25   :  { %s4575_s25 = sld [smem:[%s5259_s0 + %s4405_s22]]  }
  0x26   :  { %s4580_s21 = sld [smem:[%s5259_s0 + %s4406_s4]]   ;;  %s4410_s4 = smov 30  }
  0x27   :  { %s4585_s17 = sld [smem:[%s5259_s0 + %s4407_s27]]   ;;  %s4411_s27 = smov 31  }
  0x28   :  { %5291 = sst [smem:[#allocation64_spill]] %s4560_s7 }
  0x29   :  { %s4595_s13 = sld [smem:[%s5259_s0 + %s4409_s8]]   ;;  %s4413_s8 = smov 33  }
  0x2a   :  { %5292 = sst [smem:[#allocation65_spill]] %s4570_s23 }
  0x2b   :  { %5293 = sst [smem:[#allocation66_spill]] %s4575_s25 }
  0x2c   :  { %s4590_s23 = sld [smem:[%s5259_s0 + %s4408_s6]]   ;;  %s4412_s6 = smov 32  }
  0x2d   :  { %5294 = sst [smem:[#allocation67_spill]] %s4585_s17 }
  0x2e   :  { %s4600_s5 = sld [smem:[%s5259_s0 + %s4410_s4]]   ;;  %s4414_s4 = smov 34  }
  0x2f   :  { %5295 = sst [smem:[#allocation68_spill]] %s4595_s13 }
  0x30   :  { %s4605_s17 = sld [smem:[%s5259_s0 + %s4411_s27]]   ;;  %s4415_s27 = smov 36  }
  0x31   :  { %s4610_s25 = sld [smem:[%s5259_s0 + %s4412_s6]]   ;;  %s4416_s6 = smov 38  }
  0x32   :  { %s4615_s13 = sld [smem:[%s5259_s0 + %s4413_s8]]   ;;  %s4417_s8 = smov 23  }
  0x33   :  { %s4620_s7 = sld [smem:[%s5259_s0 + %s4414_s4]]  }
  0x34   :  { %s4630_s9 = sld [smem:[%s5259_s0 + %s4416_s6]]  }
  0x35   :  { %s3483_s11 = sld [smem:[%s5259_s0 + %s4419_s12]]  }
  0x36   :  { %5296 = sst [smem:[#allocation69_spill]] %s4605_s17 }
  0x37   :  { %s4625_s17 = sld [smem:[%s5259_s0 + %s4415_s27]]  }
  0x38   :  { %5297 = sst [smem:[#allocation70_spill]] %s4615_s13 }
  0x39   :  { %5298 = sst [smem:[#allocation71_spill]] %s4620_s7 }
  0x3a   :  { %s3469_s13 = sld [smem:[%s5259_s0 + %s4417_s8]]  }
  0x3b   :  { %s3481_s7 = sld [smem:[%s5259_s0 + %s4418_s28]]   ;;  %v88_v3 = vstv %s3483_s11 }
  0x3c   :  { %89 = vst [vmem:[#allocation5] sm:$0x1] %v88_v3 }
  0x40   :  { %v84_v1 = vstv %s3469_s13 }
  0x41   :  { %85 = vst [vmem:[#allocation3] sm:$0x1] %v84_v1  ;;  %v86_v2 = vstv %s3481_s7 }
  0x42   :  { %87 = vst [vmem:[#allocation4] sm:$0x1] %v86_v2 }
  0x43   :  { %90 = vsyncpa [#allocation7], 0 }
  0x44   :  { %91 = vsyncpa [#allocation10], 0 }
  0x45   :  { %92 = vsyncpa [#allocation13], 0 }
  0x46   :  { %93 = vsyncpa [#allocation16], 0 }
  0x47   :  { %94 = vsyncpa [#allocation19], 0 }
  0x48   :  { %95 = vsyncpa [#allocation22], 0 }
  0x49   :  { %96 = vsyncpa [#allocation25], 0 }
  0x4a   :  { %97 = vsyncpa [#allocation28], 0 }
  0x4b   :  { %98 = vsyncpa [#allocation31], 0 }
  0x4c   :  { %99 = vsyncpa [#allocation34], 0 }
  0x4d   :  { %100 = vsyncpa [#allocation37], 0  ;;  %s130_s6 = sshll.u32 %s4492_s3, 4  ;;  %s131_s6 = int_to_ptr.hbm [resolvable:$true] %s130_s6 }
  0x4e   :  { %101 = vsyncpa [#allocation8], 0  ;;  %s4420_s0 = smov [#allocation9]   ;;  %s154_s12 = sshll.u32 %s4507_s19, 4  ;;  %s155_s12 = int_to_ptr.hbm [resolvable:$true] %s154_s12 }
  0x4f   :  { %s132_s13 = sshll.u32 %s4420_s0, 4  ;;  %s3830_s7 = sshra.s32 %s131_s6, 4  ;;  %s133_s13 = int_to_ptr.vmem [resolvable:$true] %s132_s13  ;;  %s3831_s7 = int_to_ptr.hbm [resolvable:$true] %s3830_s7 }
  0x50   :  { %s3832_s16 = scalar_lea.hbm %s3831_s7, 1  ;;  %s3834_s18 = scalar_lea.hbm %s4492_s3, 1 }
  0x51   :  { %p3833_p0 = scmp.ne.s32.totalorder %s3831_s7, %s3832_s16  ;;  %p3835_p1 = scmp.lt.s32.totalorder %s3831_s7, %s4492_s3 }
  0x52   :  { %p3836_p2 = scmp.lt.s32.totalorder %s3834_s18, %s3832_s16 }
  0x54   :  { %p3837_p3 = por %p3836_p2, %p3835_p1 }
  0x56   :  { %p3838_p4 = pnand %p3837_p3, %p3833_p0 }
  0x58   :  { %3841 = shalt.err (!%p3838_p4)
}
  0x59   :  { %135 = dma.hbm_to_vmem [thread:$0]  %s131_s6, 16, %s133_s13, [#allocation10]  }
  0x5a   :  { %s4421_s8 = smov [#allocation12]   ;;  %s176_s26 = sshll.u32 %s4517_s30, 4  ;;  %s177_s26 = int_to_ptr.hbm [resolvable:$true] %s176_s26 }
  0x5b   :  { %s156_s22 = sshll.u32 %s4421_s8, 4  ;;  %s3854_s28 = sshra.s32 %s155_s12, 4  ;;  %s157_s22 = int_to_ptr.vmem [resolvable:$true] %s156_s22  ;;  %s3855_s28 = int_to_ptr.hbm [resolvable:$true] %s3854_s28 }
  0x5c   :  { %s3856_s4 = scalar_lea.hbm %s3855_s28, 8  ;;  %s3858_s2 = scalar_lea.hbm %s4507_s19, 8 }
  0x5d   :  { %p3857_p5 = scmp.ne.s32.totalorder %s3855_s28, %s3856_s4  ;;  %p3859_p6 = scmp.lt.s32.totalorder %s3855_s28, %s4507_s19 }
  0x5e   :  { %p3860_p7 = scmp.lt.s32.totalorder %s3858_s2, %s3856_s4 }
  0x60   :  { %p3861_p8 = por %p3860_p7, %p3859_p6 }
  0x62   :  { %p3862_p9 = pnand %p3861_p8, %p3857_p5 }
  0x64   :  { %3865 = shalt.err (!%p3862_p9)
}
  0x65   :  { %159 = dma.hbm_to_vmem [thread:$0]  %s155_s12, 128, %s157_s22, [#allocation13]  }
  0x66   :  { %s200_s3 = sshll.u32 %s4530_s20, 4  ;;  %s4422_s10 = smov [#allocation15]   ;;  %s201_s3 = int_to_ptr.hbm [resolvable:$true] %s200_s3 }
  0x67   :  { %s178_s27 = sshll.u32 %s4422_s10, 4  ;;  %s3878_s11 = sshra.s32 %s177_s26, 4  ;;  %s179_s27 = int_to_ptr.vmem [resolvable:$true] %s178_s27  ;;  %s3879_s11 = int_to_ptr.hbm [resolvable:$true] %s3878_s11 }
  0x68   :  { %s3880_s6 = scalar_lea.hbm %s3879_s11, 1  ;;  %s3882_s0 = scalar_lea.hbm %s4517_s30, 1 }
  0x69   :  { %p3881_p10 = scmp.ne.s32.totalorder %s3879_s11, %s3880_s6  ;;  %p3883_p11 = scmp.lt.s32.totalorder %s3879_s11, %s4517_s30 }
  0x6a   :  { %p3884_p12 = scmp.lt.s32.totalorder %s3882_s0, %s3880_s6 }
  0x6c   :  { %p3885_p13 = por %p3884_p12, %p3883_p11 }
  0x6e   :  { %p3886_p0 = pnand %p3885_p13, %p3881_p10 }
  0x70   :  { %3889 = shalt.err (!%p3886_p0)
}
  0x71   :  { %181 = dma.hbm_to_vmem [thread:$0]  %s177_s26, 16, %s179_s27, [#allocation16]  }
  0x72   :  { %s4423_s19 = smov [#allocation18]   ;;  %s228_s12 = sshll.u32 %s4555_s1, 4  ;;  %s229_s12 = int_to_ptr.hbm [resolvable:$true] %s228_s12 }
  0x73   :  { %s202_s13 = sshll.u32 %s4423_s19, 4  ;;  %s3902_s7 = sshra.s32 %s201_s3, 4  ;;  %s203_s13 = int_to_ptr.vmem [resolvable:$true] %s202_s13  ;;  %s3903_s7 = int_to_ptr.hbm [resolvable:$true] %s3902_s7 }
  0x74   :  { %s3904_s16 = scalar_lea.hbm %s3903_s7, 1  ;;  %s3906_s18 = scalar_lea.hbm %s4530_s20, 1 }
  0x75   :  { %p3905_p1 = scmp.ne.s32.totalorder %s3903_s7, %s3904_s16  ;;  %p3907_p2 = scmp.lt.s32.totalorder %s3903_s7, %s4530_s20 }
  0x76   :  { %p3908_p3 = scmp.lt.s32.totalorder %s3906_s18, %s3904_s16 }
  0x78   :  { %p3909_p4 = por %p3908_p3, %p3907_p2 }
  0x7a   :  { %p3910_p5 = pnand %p3909_p4, %p3905_p1 }
  0x7c   :  { %3913 = shalt.err (!%p3910_p5)
}
  0x7d   :  { %205 = dma.hbm_to_vmem [thread:$0]  %s201_s3, 16, %s203_s13, [#allocation19]  }
  0x7e   :  { %s250_s30 = sshll.u32 %s4565_s15, 4  ;;  %s4424_s8 = smov [#allocation21]   ;;  %s251_s30 = int_to_ptr.hbm [resolvable:$true] %s250_s30 }
  0x7f   :  { %s230_s22 = sshll.u32 %s4424_s8, 4  ;;  %s3926_s26 = sshra.s32 %s229_s12, 4  ;;  %s231_s22 = int_to_ptr.vmem [resolvable:$true] %s230_s22  ;;  %s3927_s26 = int_to_ptr.hbm [resolvable:$true] %s3926_s26 }
  0x80   :  { %s3928_s28 = scalar_lea.hbm %s3927_s26, 8  ;;  %s3930_s4 = scalar_lea.hbm %s4555_s1, 8 }
  0x81   :  { %p3929_p6 = scmp.ne.s32.totalorder %s3927_s26, %s3928_s28  ;;  %p3931_p7 = scmp.lt.s32.totalorder %s3927_s26, %s4555_s1 }
  0x82   :  { %p3932_p8 = scmp.lt.s32.totalorder %s3930_s4, %s3928_s28 }
  0x84   :  { %p3933_p9 = por %p3932_p8, %p3931_p7 }
  0x86   :  { %p3934_p10 = pnand %p3933_p9, %p3929_p6 }
  0x88   :  { %3937 = shalt.err (!%p3934_p10)
}
  0x89   :  { %233 = dma.hbm_to_vmem [thread:$0]  %s229_s12, 128, %s231_s22, [#allocation22]  }
  0x8a   :  { %s4425_s20 = smov [#allocation24]   ;;  %s276_s3 = sshll.u32 %s4580_s21, 4  ;;  %s277_s3 = int_to_ptr.hbm [resolvable:$true] %s276_s3 }
  0x8b   :  { %s252_s2 = sshll.u32 %s4425_s20, 4  ;;  %s3950_s10 = sshra.s32 %s251_s30, 4  ;;  %s253_s2 = int_to_ptr.vmem [resolvable:$true] %s252_s2  ;;  %s3951_s10 = int_to_ptr.hbm [resolvable:$true] %s3950_s10 }
  0x8c   :  { %s3952_s27 = scalar_lea.hbm %s3951_s10, 1  ;;  %s3954_s11 = scalar_lea.hbm %s4565_s15, 1 }
  0x8d   :  { %p3953_p11 = scmp.ne.s32.totalorder %s3951_s10, %s3952_s27  ;;  %p3955_p12 = scmp.lt.s32.totalorder %s3951_s10, %s4565_s15 }
  0x8e   :  { %p3956_p13 = scmp.lt.s32.totalorder %s3954_s11, %s3952_s27 }
  0x90   :  { %p3957_p0 = por %p3956_p13, %p3955_p12 }
  0x92   :  { %p3958_p1 = pnand %p3957_p0, %p3953_p11 }
  0x94   :  { %3961 = shalt.err (!%p3958_p1)
}
  0x95   :  { %255 = dma.hbm_to_vmem [thread:$0]  %s251_s30, 16, %s253_s2, [#allocation25]  }
  0x96   :  { %s298_s1 = sshll.u32 %s4590_s23, 4  ;;  %s4426_s6 = smov [#allocation27]   ;;  %s299_s1 = int_to_ptr.hbm [resolvable:$true] %s298_s1 }
  0x97   :  { %s278_s0 = sshll.u32 %s4426_s6, 4  ;;  %s3974_s19 = sshra.s32 %s277_s3, 4  ;;  %s279_s0 = int_to_ptr.vmem [resolvable:$true] %s278_s0  ;;  %s3975_s19 = int_to_ptr.hbm [resolvable:$true] %s3974_s19 }
  0x98   :  { %s3976_s13 = scalar_lea.hbm %s3975_s19, 8  ;;  %s3978_s12 = scalar_lea.hbm %s4580_s21, 8 }
  0x99   :  { %p3977_p2 = scmp.ne.s32.totalorder %s3975_s19, %s3976_s13  ;;  %p3979_p3 = scmp.lt.s32.totalorder %s3975_s19, %s4580_s21 }
  0x9a   :  { %p3980_p4 = scmp.lt.s32.totalorder %s3978_s12, %s3976_s13 }
  0x9c   :  { %p3981_p5 = por %p3980_p4, %p3979_p3 }
  0x9e   :  { %p3982_p6 = pnand %p3981_p5, %p3977_p2 }
  0xa0   :  { %3985 = shalt.err (!%p3982_p6)
}
  0xa1   :  { %281 = dma.hbm_to_vmem [thread:$0]  %s277_s3, 128, %s279_s0, [#allocation28]  }
  0xa2   :  { %s4427_s15 = smov [#allocation30]   ;;  %s320_s16 = sshll.u32 %s4600_s5, 4  ;;  %s321_s16 = int_to_ptr.hbm [resolvable:$true] %s320_s16 }
  0xa3   :  { %s300_s7 = sshll.u32 %s4427_s15, 4  ;;  %s3998_s18 = sshra.s32 %s299_s1, 4  ;;  %s301_s7 = int_to_ptr.vmem [resolvable:$true] %s300_s7  ;;  %s3999_s18 = int_to_ptr.hbm [resolvable:$true] %s3998_s18 }
  0xa4   :  { %s4000_s30 = scalar_lea.hbm %s3999_s18, 8  ;;  %s4002_s8 = scalar_lea.hbm %s4590_s23, 8 }
  0xa5   :  { %p4001_p7 = scmp.ne.s32.totalorder %s3999_s18, %s4000_s30  ;;  %p4003_p8 = scmp.lt.s32.totalorder %s3999_s18, %s4590_s23 }
  0xa6   :  { %p4004_p9 = scmp.lt.s32.totalorder %s4002_s8, %s4000_s30 }
  0xa8   :  { %p4005_p10 = por %p4004_p9, %p4003_p8 }
  0xaa   :  { %p4006_p11 = pnand %p4005_p10, %p4001_p7 }
  0xac   :  { %4009 = shalt.err (!%p4006_p11)
}
  0xad   :  { %303 = dma.hbm_to_vmem [thread:$0]  %s299_s1, 128, %s301_s7, [#allocation31]  }
  0xae   :  { %s342_s21 = sshll.u32 %s4610_s25, 4  ;;  %s4428_s22 = smov [#allocation33]   ;;  %s343_s21 = int_to_ptr.hbm [resolvable:$true] %s342_s21 }
  0xaf   :  { %s322_s26 = sshll.u32 %s4428_s22, 4  ;;  %s4022_s28 = sshra.s32 %s321_s16, 4  ;;  %s323_s26 = int_to_ptr.vmem [resolvable:$true] %s322_s26  ;;  %s4023_s28 = int_to_ptr.hbm [resolvable:$true] %s4022_s28 }
  0xb0   :  { %s4024_s4 = scalar_lea.hbm %s4023_s28, 8  ;;  %s4026_s20 = scalar_lea.hbm %s4600_s5, 8 }
  0xb1   :  { %p4025_p12 = scmp.ne.s32.totalorder %s4023_s28, %s4024_s4  ;;  %p4027_p13 = scmp.lt.s32.totalorder %s4023_s28, %s4600_s5 }
  0xb2   :  { %p4028_p0 = scmp.lt.s32.totalorder %s4026_s20, %s4024_s4 }
  0xb4   :  { %p4029_p1 = por %p4028_p0, %p4027_p13 }
  0xb6   :  { %p4030_p2 = pnand %p4029_p1, %p4025_p12 }
  0xb8   :  { %4033 = shalt.err (!%p4030_p2)
}
  0xb9   :  { %325 = dma.hbm_to_vmem [thread:$0]  %s321_s16, 128, %s323_s26, [#allocation34]  }
  0xba   :  { %s4429_s23 = smov [#allocation36]   ;;  %s119_s3 = sshll.u32 %s4487_s29, 4  ;;  %s120_s3 = int_to_ptr.hbm [resolvable:$true] %s119_s3 }
  0xbb   :  { %s344_s2 = sshll.u32 %s4429_s23, 4  ;;  %s4046_s10 = sshra.s32 %s343_s21, 4  ;;  %s345_s2 = int_to_ptr.vmem [resolvable:$true] %s344_s2  ;;  %s4047_s10 = int_to_ptr.hbm [resolvable:$true] %s4046_s10 }
  0xbc   :  { %s4048_s27 = scalar_lea.hbm %s4047_s10, 8  ;;  %s4050_s11 = scalar_lea.hbm %s4610_s25, 8 }
  0xbd   :  { %p4049_p3 = scmp.ne.s32.totalorder %s4047_s10, %s4048_s27  ;;  %p4051_p4 = scmp.lt.s32.totalorder %s4047_s10, %s4610_s25 }
  0xbe   :  { %p4052_p5 = scmp.lt.s32.totalorder %s4050_s11, %s4048_s27 }
  0xc0   :  { %p4053_p6 = por %p4052_p5, %p4051_p4 }
  0xc2   :  { %p4054_p7 = pnand %p4053_p6, %p4049_p3 }
  0xc4   :  { %4057 = shalt.err (!%p4054_p7)
}
  0xc5   :  { %347 = dma.hbm_to_vmem [thread:$0]  %s343_s21, 128, %s345_s2, [#allocation37]  }
  0xc6   :  { %s143_s5 = sshll.u32 %s4502_s14, 4  ;;  %s4430_s1 = smov [#allocation6]   ;;  %s144_s5 = int_to_ptr.hbm [resolvable:$true] %s143_s5 }
  0xc7   :  { %s121_s6 = sshll.u32 %s4430_s1, 4  ;;  %s4070_s0 = sshra.s32 %s120_s3, 4  ;;  %s122_s6 = int_to_ptr.vmem [resolvable:$true] %s121_s6  ;;  %s4071_s0 = int_to_ptr.hbm [resolvable:$true] %s4070_s0 }
  0xc8   :  { %s4072_s19 = scalar_lea.hbm %s4071_s0, 1  ;;  %s4074_s13 = scalar_lea.hbm %s4487_s29, 1 }
  0xc9   :  { %p4073_p8 = scmp.ne.s32.totalorder %s4071_s0, %s4072_s19  ;;  %p4075_p9 = scmp.lt.s32.totalorder %s4071_s0, %s4487_s29 }
  0xca   :  { %p4076_p10 = scmp.lt.s32.totalorder %s4074_s13, %s4072_s19 }
  0xcc   :  { %p4077_p11 = por %p4076_p10, %p4075_p9 }
  0xce   :  { %p4078_p12 = pnand %p4077_p11, %p4073_p8 }
  0xd0   :  { %4081 = shalt.err (!%p4078_p12)
}
  0xd1   :  { %124 = dma.hbm_to_vmem [thread:$0]  %s120_s3, 16, %s122_s6, [#allocation7]  }
  0xd2   :  { %s4431_s25 = smov [#allocation11]   ;;  %s165_s15 = sshll.u32 %s4512_s24, 4  ;;  %s166_s15 = int_to_ptr.hbm [resolvable:$true] %s165_s15 }
  0xd3   :  { %s145_s12 = sshll.u32 %s4431_s25, 4  ;;  %s4094_s7 = sshra.s32 %s144_s5, 4  ;;  %s146_s12 = int_to_ptr.vmem [resolvable:$true] %s145_s12  ;;  %s4095_s7 = int_to_ptr.hbm [resolvable:$true] %s4094_s7 }
  0xd4   :  { %s4096_s16 = scalar_lea.hbm %s4095_s7, 1  ;;  %s4098_s18 = scalar_lea.hbm %s4502_s14, 1 }
  0xd5   :  { %p4097_p13 = scmp.ne.s32.totalorder %s4095_s7, %s4096_s16  ;;  %p4099_p0 = scmp.lt.s32.totalorder %s4095_s7, %s4502_s14 }
  0xd6   :  { %p4100_p1 = scmp.lt.s32.totalorder %s4098_s18, %s4096_s16 }
  0xd8   :  { %p4101_p2 = por %p4100_p1, %p4099_p0 }
  0xda   :  { %p4102_p3 = pnand %p4101_p2, %p4097_p13 }
  0xdc   :  { %4105 = shalt.err (!%p4102_p3)
}
  0xdd   :  { %148 = dma.hbm_to_vmem [thread:$0]  %s144_s5, 16, %s146_s12, [#allocation10]  }
  0xde   :  { %s5299_s29 = sld [smem:[#allocation59_spill]]  ;;  %s4432_s8 = smov [#allocation14]  }
  0xdf   :  { %s167_s21 = sshll.u32 %s4432_s8, 4  ;;  %s4118_s22 = sshra.s32 %s166_s15, 4  ;;  %s168_s21 = int_to_ptr.vmem [resolvable:$true] %s167_s21  ;;  %s4119_s22 = int_to_ptr.hbm [resolvable:$true] %s4118_s22 }
  0xe0   :  { %s4120_s26 = scalar_lea.hbm %s4119_s22, 1  ;;  %s4122_s28 = scalar_lea.hbm %s4512_s24, 1 }
  0xe1   :  { %p4121_p4 = scmp.ne.s32.totalorder %s4119_s22, %s4120_s26  ;;  %p4123_p5 = scmp.lt.s32.totalorder %s4119_s22, %s4512_s24 }
  0xe2   :  { %p4124_p6 = scmp.lt.s32.totalorder %s4122_s28, %s4120_s26 }
  0xe4   :  { %s189_s30 = sshll.u32 %s5299_s29, 4  ;;  %p4125_p7 = por %p4124_p6, %p4123_p5  ;;  %s190_s30 = int_to_ptr.hbm [resolvable:$true] %s189_s30 }
  0xe6   :  { %p4126_p8 = pnand %p4125_p7, %p4121_p4 }
  0xe8   :  { %4129 = shalt.err (!%p4126_p8)
}
  0xe9   :  { %170 = dma.hbm_to_vmem [thread:$0]  %s166_s15, 16, %s168_s21, [#allocation13]  }
  0xea   :  { %s5300_s14 = sld [smem:[#allocation63_spill]]  ;;  %s4433_s4 = smov [#allocation17]  }
  0xeb   :  { %s191_s20 = sshll.u32 %s4433_s4, 4  ;;  %s4142_s2 = sshra.s32 %s190_s30, 4  ;;  %s192_s20 = int_to_ptr.vmem [resolvable:$true] %s191_s20  ;;  %s4143_s2 = int_to_ptr.hbm [resolvable:$true] %s4142_s2 }
  0xec   :  { %s4144_s3 = scalar_lea.hbm %s4143_s2, 1  ;;  %s4146_s10 = scalar_lea.hbm %s5299_s29, 1 }
  0xed   :  { %p4145_p9 = scmp.ne.s32.totalorder %s4143_s2, %s4144_s3  ;;  %p4147_p10 = scmp.lt.s32.totalorder %s4143_s2, %s5299_s29 }
  0xee   :  { %p4148_p11 = scmp.lt.s32.totalorder %s4146_s10, %s4144_s3 }
  0xf0   :  { %s217_s23 = sshll.u32 %s5300_s14, 4  ;;  %p4149_p12 = por %p4148_p11, %p4147_p10  ;;  %s218_s23 = int_to_ptr.hbm [resolvable:$true] %s217_s23 }
  0xf2   :  { %p4150_p13 = pnand %p4149_p12, %p4145_p9 }
  0xf4   :  { %4153 = shalt.err (!%p4150_p13)
}
  0xf5   :  { %194 = dma.hbm_to_vmem [thread:$0]  %s190_s30, 16, %s192_s20, [#allocation16]  }
  0xf6   :  { %s5301_s24 = sld [smem:[#allocation64_spill]]  ;;  %s4434_s11 = smov [#allocation20]  }
  0xf7   :  { %s219_s5 = sshll.u32 %s4434_s11, 4  ;;  %s4166_s1 = sshra.s32 %s218_s23, 4  ;;  %s220_s5 = int_to_ptr.vmem [resolvable:$true] %s219_s5  ;;  %s4167_s1 = int_to_ptr.hbm [resolvable:$true] %s4166_s1 }
  0xf8   :  { %s4168_s6 = scalar_lea.hbm %s4167_s1, 1  ;;  %s4170_s0 = scalar_lea.hbm %s5300_s14, 1 }
  0xf9   :  { %p4169_p0 = scmp.ne.s32.totalorder %s4167_s1, %s4168_s6  ;;  %p4171_p1 = scmp.lt.s32.totalorder %s4167_s1, %s5300_s14 }
  0xfa   :  { %p4172_p2 = scmp.lt.s32.totalorder %s4170_s0, %s4168_s6 }
  0xfc   :  { %s239_s27 = sshll.u32 %s5301_s24, 4  ;;  %p4173_p3 = por %p4172_p2, %p4171_p1  ;;  %s240_s27 = int_to_ptr.hbm [resolvable:$true] %s239_s27 }
  0xfe   :  { %p4174_p4 = pnand %p4173_p3, %p4169_p0 }
 0x100   :  { %4177 = shalt.err (!%p4174_p4)
}
 0x101   :  { %222 = dma.hbm_to_vmem [thread:$0]  %s218_s23, 16, %s220_s5, [#allocation19]  }
 0x102   :  { %s5302_s19 = sld [smem:[#allocation66_spill]]  ;;  %s4435_s13 = smov [#allocation23]  }
 0x103   :  { %s241_s25 = sshll.u32 %s4435_s13, 4  ;;  %s4190_s15 = sshra.s32 %s240_s27, 4  ;;  %s242_s25 = int_to_ptr.vmem [resolvable:$true] %s241_s25  ;;  %s4191_s15 = int_to_ptr.hbm [resolvable:$true] %s4190_s15 }
 0x104   :  { %s4192_s7 = scalar_lea.hbm %s4191_s15, 1  ;;  %s4194_s16 = scalar_lea.hbm %s5301_s24, 1 }
 0x105   :  { %p4193_p5 = scmp.ne.s32.totalorder %s4191_s15, %s4192_s7  ;;  %p4195_p6 = scmp.lt.s32.totalorder %s4191_s15, %s5301_s24 }
 0x106   :  { %p4196_p7 = scmp.lt.s32.totalorder %s4194_s16, %s4192_s7 }
 0x108   :  { %s265_s12 = sshll.u32 %s5302_s19, 4  ;;  %p4197_p8 = por %p4196_p7, %p4195_p6  ;;  %s266_s12 = int_to_ptr.hbm [resolvable:$true] %s265_s12 }
 0x10a   :  { %p4198_p9 = pnand %p4197_p8, %p4193_p5 }
 0x10c   :  { %4201 = shalt.err (!%p4198_p9)
}
 0x10d   :  { %244 = dma.hbm_to_vmem [thread:$0]  %s240_s27, 16, %s242_s25, [#allocation22]  }
 0x10e   :  { %s5303_s18 = sld [smem:[#allocation67_spill]]  ;;  %s4436_s30 = smov [#allocation26]  }
 0x10f   :  { %s267_s8 = sshll.u32 %s4436_s30, 4  ;;  %s4214_s21 = sshra.s32 %s266_s12, 4  ;;  %s268_s8 = int_to_ptr.vmem [resolvable:$true] %s267_s8  ;;  %s4215_s21 = int_to_ptr.hbm [resolvable:$true] %s4214_s21 }
 0x110   :  { %s4216_s22 = scalar_lea.hbm %s4215_s21, 1  ;;  %s4218_s26 = scalar_lea.hbm %s5302_s19, 1 }
 0x111   :  { %p4217_p10 = scmp.ne.s32.totalorder %s4215_s21, %s4216_s22  ;;  %p4219_p11 = scmp.lt.s32.totalorder %s4215_s21, %s5302_s19 }
 0x112   :  { %p4220_p12 = scmp.lt.s32.totalorder %s4218_s26, %s4216_s22 }
 0x114   :  { %s287_s29 = sshll.u32 %s5303_s18, 4  ;;  %p4221_p13 = por %p4220_p12, %p4219_p11  ;;  %s288_s29 = int_to_ptr.hbm [resolvable:$true] %s287_s29 }
 0x116   :  { %p4222_p0 = pnand %p4221_p13, %p4217_p10 }
 0x118   :  { %4225 = shalt.err (!%p4222_p0)
}
 0x119   :  { %270 = dma.hbm_to_vmem [thread:$0]  %s266_s12, 16, %s268_s8, [#allocation25]  }
 0x11a   :  { %s5304_s28 = sld [smem:[#allocation68_spill]]  ;;  %s4437_s14 = smov [#allocation29]  }
 0x11b   :  { %s289_s4 = sshll.u32 %s4437_s14, 4  ;;  %s4238_s23 = sshra.s32 %s288_s29, 4  ;;  %s290_s4 = int_to_ptr.vmem [resolvable:$true] %s289_s4  ;;  %s4239_s23 = int_to_ptr.hbm [resolvable:$true] %s4238_s23 }
 0x11c   :  { %s4240_s2 = scalar_lea.hbm %s4239_s23, 1  ;;  %s4242_s3 = scalar_lea.hbm %s5303_s18, 1 }
 0x11d   :  { %p4241_p1 = scmp.ne.s32.totalorder %s4239_s23, %s4240_s2  ;;  %p4243_p2 = scmp.lt.s32.totalorder %s4239_s23, %s5303_s18 }
 0x11e   :  { %p4244_p3 = scmp.lt.s32.totalorder %s4242_s3, %s4240_s2 }
 0x120   :  { %s309_s20 = sshll.u32 %s5304_s28, 4  ;;  %p4245_p4 = por %p4244_p3, %p4243_p2  ;;  %s310_s20 = int_to_ptr.hbm [resolvable:$true] %s309_s20 }
 0x122   :  { %p4246_p5 = pnand %p4245_p4, %p4241_p1 }
 0x124   :  { %4249 = shalt.err (!%p4246_p5)
}
 0x125   :  { %292 = dma.hbm_to_vmem [thread:$0]  %s288_s29, 16, %s290_s4, [#allocation28]  }
 0x126   :  { %s5305_s10 = sld [smem:[#allocation69_spill]]  ;;  %s4438_s27 = smov [#allocation32]  }
 0x127   :  { %s311_s11 = sshll.u32 %s4438_s27, 4  ;;  %s4262_s5 = sshra.s32 %s310_s20, 4  ;;  %s312_s11 = int_to_ptr.vmem [resolvable:$true] %s311_s11  ;;  %s4263_s5 = int_to_ptr.hbm [resolvable:$true] %s4262_s5 }
 0x128   :  { %s4264_s1 = scalar_lea.hbm %s4263_s5, 1  ;;  %s4266_s6 = scalar_lea.hbm %s5304_s28, 1 }
 0x129   :  { %p4265_p6 = scmp.ne.s32.totalorder %s4263_s5, %s4264_s1  ;;  %p4267_p7 = scmp.lt.s32.totalorder %s4263_s5, %s5304_s28 }
 0x12a   :  { %p4268_p8 = scmp.lt.s32.totalorder %s4266_s6, %s4264_s1 }
 0x12c   :  { %s331_s24 = sshll.u32 %s5305_s10, 4  ;;  %p4269_p9 = por %p4268_p8, %p4267_p7  ;;  %s332_s24 = int_to_ptr.hbm [resolvable:$true] %s331_s24 }
 0x12e   :  { %p4270_p10 = pnand %p4269_p9, %p4265_p6 }
 0x130   :  { %4273 = shalt.err (!%p4270_p10)
}
 0x131   :  { %314 = dma.hbm_to_vmem [thread:$0]  %s310_s20, 16, %s312_s11, [#allocation31]  }
 0x132   :  { %s5306_s0 = sld [smem:[#allocation70_spill]]  ;;  %s4439_s19 = smov [#allocation35]  }
 0x133   :  { %s333_s13 = sshll.u32 %s4439_s19, 4  ;;  %s4286_s12 = sshra.s32 %s332_s24, 4  ;;  %s334_s13 = int_to_ptr.vmem [resolvable:$true] %s333_s13  ;;  %s4287_s12 = int_to_ptr.hbm [resolvable:$true] %s4286_s12 }
 0x134   :  { %s4288_s15 = scalar_lea.hbm %s4287_s12, 1  ;;  %s4290_s7 = scalar_lea.hbm %s5305_s10, 1 }
 0x135   :  { %p4289_p11 = scmp.ne.s32.totalorder %s4287_s12, %s4288_s15  ;;  %p4291_p12 = scmp.lt.s32.totalorder %s4287_s12, %s5305_s10 }
 0x136   :  { %p4292_p13 = scmp.lt.s32.totalorder %s4290_s7, %s4288_s15 }
 0x138   :  { %s353_s25 = sshll.u32 %s5306_s0, 4  ;;  %p4293_p0 = por %p4292_p13, %p4291_p12  ;;  %s354_s25 = int_to_ptr.hbm [resolvable:$true] %s353_s25 }
 0x13a   :  { %p4294_p1 = pnand %p4293_p0, %p4289_p11 }
 0x13c   :  { %4297 = shalt.err (!%p4294_p1)
}
 0x13d   :  { %336 = dma.hbm_to_vmem [thread:$0]  %s332_s24, 16, %s334_s13, [#allocation34]  }
 0x13e   :  { %s4440_s16 = smov [#allocation38]   ;;  %s4310_s29 = sshra.s32 %s354_s25, 4  ;;  %s4311_s29 = int_to_ptr.hbm [resolvable:$true] %s4310_s29 }
 0x13f   :  { %s355_s18 = sshll.u32 %s4440_s16, 4  ;;  %s4312_s30 = scalar_lea.hbm %s4311_s29, 1  ;;  %s356_s18 = int_to_ptr.vmem [resolvable:$true] %s355_s18 }
 0x140   :  { %p4313_p2 = scmp.ne.s32.totalorder %s4311_s29, %s4312_s30  ;;  %s4314_s8 = scalar_lea.hbm %s5306_s0, 1 }
 0x141   :  { %p4315_p3 = scmp.lt.s32.totalorder %s4311_s29, %s5306_s0  ;;  %p4316_p4 = scmp.lt.s32.totalorder %s4314_s8, %s4312_s30 }
 0x143   :  { %p4317_p5 = por %p4316_p4, %p4315_p3 }
 0x145   :  { %p4318_p6 = pnand %p4317_p5, %p4313_p2 }
 0x147   :  { %4321 = shalt.err (!%p4318_p6)
}
 0x148   :  { %358 = dma.hbm_to_vmem [thread:$0]  %s354_s25, 16, %s356_s18, [#allocation37]  }
 0x149   :  { %4358 = dma.done.wait [#allocation7], 16  }
 0x14a   :  { %4359 = vsyncadd [#allocation7], 4294967280 }
 0x14b   :  { %4360 = dma.done.wait [#allocation10], 32  }
 0x14c   :  { %4361 = vsyncadd [#allocation10], 4294967264 }
 0x14d   :  { %4362 = dma.done.wait [#allocation13], 144  }
 0x14e   :  { %4363 = vsyncadd [#allocation13], 4294967152 }
 0x14f   :  { %4364 = dma.done.wait [#allocation16], 32  }
 0x150   :  { %4365 = vsyncadd [#allocation16], 4294967264 }
 0x151   :  { %4366 = dma.done.wait [#allocation19], 32  }
 0x152   :  { %4367 = vsyncadd [#allocation19], 4294967264 }
 0x153   :  { %4368 = dma.done.wait [#allocation22], 144  }
 0x154   :  { %4369 = vsyncadd [#allocation22], 4294967152 }
 0x155   :  { %4370 = dma.done.wait [#allocation25], 32  }
 0x156   :  { %4371 = vsyncadd [#allocation25], 4294967264 }
 0x157   :  { %4372 = dma.done.wait [#allocation28], 144  }
 0x158   :  { %4373 = vsyncadd [#allocation28], 4294967152 }
 0x159   :  { %4374 = dma.done.wait [#allocation31], 144  }
 0x15a   :  { %4375 = vsyncadd [#allocation31], 4294967152 }
 0x15b   :  { %4376 = dma.done.wait [#allocation34], 144  }
 0x15c   :  { %4377 = vsyncadd [#allocation34], 4294967152 }
 0x15d   :  { %4378 = dma.done.wait [#allocation37], 144  }
 0x15e   :  { %4379 = vsyncadd [#allocation37], 4294967152  ;;  %s5307_s21 = sld [smem:[#allocation52_spill]]  ;;  %v486_v5 = vlaneseq  ;;  %v4441_v10 = vmov 0.0   ;;  %vm531_vm2 = vcmask 64512   ;;  %v4442_v46 = vmov 8.0  }
 0x15f   :  { %s5308_s22 = sld [smem:[#allocation54_spill]]  ;;  %3659 = vrcp.f32 %v4442_v46  ;;  %s4443_s23 = smov 120   ;;  %vm1119_vm7 = vcmask 1041409   ;;  %vm1121_vm8 = vcmask 1042434   ;;  %vm1123_vm9 = vcmask 1043459  }
 0x160   :  { %v4705_v6 = vshrl.u32 %v486_v5, 7  ;;  %v4709_v7 = vand.u32 127, %v486_v5  ;;  %s5309_s26 = sld [smem:[#allocation55_spill]]  ;;  %s4444_s2 = smov 112   ;;  %vm1125_vm10 = vcmask 1044484   ;;  %vm1127_vm11 = vcmask 1045509  }
 0x161   :  { %s5310_s28 = sld [smem:[#allocation56_spill]]  ;;  %vm1129_vm12 = vcmask 1046534   ;;  %vm1131_vm13 = vcmask 1047559   ;;  %s3424_s1 = sshll.u32 %s4630_s9, 4  ;;  %s3425_s1 = int_to_ptr.hbm [resolvable:$true] %s3424_s1 }
 0x162   :  { %3623 = vset.pattern.permute.xlu2 %v4705_v6  ;;  %3624 = vset.pattern.permute.xlu1 %v4705_v6  ;;  %v494_v8 = vadd.s32 2, %v4709_v7  ;;  %v490_v9 = vadd.s32 1, %v4709_v7  ;;  %s5311_s14 = sld [smem:[#allocation57_spill]]  ;;  %s4346_s6 = sshra.s32 %s3425_s1, 4  ;;  %s4347_s6 = int_to_ptr.hbm [resolvable:$true] %s4346_s6 }
 0x163   :  { %s5312_s4 = sld [smem:[#allocation53_spill]]  ;;  %s4348_s0 = scalar_lea.hbm %s4347_s6, 2 }
 0x164   :  { %v498_v4 = vld [vmem:[%s5307_s21] sm:$0xff]  ;;  %vm495_vm0 = vcmp.eq.s32.totalorder %v4705_v6, %v494_v8  ;;  %vm491_vm1 = vcmp.eq.s32.totalorder %v4705_v6, %v490_v9  ;;  %s5313_s20 = sld [smem:[#allocation58_spill]]  ;;  %p4349_p7 = scmp.ne.s32.totalorder %s4347_s6, %s4348_s0 }
 0x165   :  { %499 = vxpose.xlu0.b32.start.end [1/1] (short) (narrow) %v498_v4, 8  ;;  %v4715_v11 = vsel %vm495_vm0, 1.0, %v4441_v10  ;;  %v4717_v12 = vsel %vm491_vm1, 1.0, %v4441_v10  ;;  %v4722_v14 = vld [vmem:[%s5308_s22 + $0x10] sm:$0xff]  ;;  %v4734_v15 = vld [vmem:[%s5308_s22 + $0x8] sm:$0xff]  ;;  %v4737_v16 = vld [vmem:[%s5308_s22] sm:$0xff]  ;;  %v3660_v47 = vpop.eup %3659  ;;  %p4351_p8 = scmp.lt.s32.totalorder %s4347_s6, %s4630_s9 }
 0x166   :  { %599 = vmatpush.msra.mxu2 %v4734_v15  ;;  %622 = vmatpush.msra.mxu3 %v4737_v16  ;;  %v4744_v22 = vld [vmem:[%s5309_s26] ss:$0 sm:$0xff]  ;;  %v786_v48 = vmul.f32 8.0, %v3660_v47  ;;  %vm790_vm3 = vweird.f32 %v3660_v47  ;;  %v3639_v4 = vld [vmem:[#allocation6] ss:$0 sm:$0xff]  ;;  %s5314_s3 = sld [smem:[#allocation71_spill]] }
 0x167   :  { %v4748_v27 = vld [vmem:[%s5310_s28 + $0x10] sm:$0xff]  ;;  %v4757_v28 = vld [vmem:[%s5310_s28 + $0x8] sm:$0xff]  ;;  %v4761_v29 = vld [vmem:[%s5310_s28] sm:$0xff]  ;;  %s5315_s10 = sld [smem:[#allocation62_spill]]  ;;  %s4350_s19 = scalar_lea.hbm %s4630_s9, 2 }
 0x168   :  { %719 = vmatpush.msrb.mxu3 %v4757_v28  ;;  %v4767_v35 = vld [vmem:[%s5311_s14] ss:$0 sm:$0xff]  ;;  %v787_v49 = vsub.f32 1.0, %v786_v48  ;;  %v3640_v9 = vld [vmem:[#allocation9] ss:$0 sm:$0xff]  ;;  %s5316_s24 = sld [smem:[#allocation60_spill]]  ;;  %p4352_p9 = scmp.lt.s32.totalorder %s4350_s19, %s4348_s0 }
 0x169   :  { %v4772_v42 = vld [vmem:[%s5312_s4] sm:$0xff]  ;;  %s5317_s27 = sld [smem:[#allocation61_spill]] }
 0x16a   :  { %v788_v50 = vmul.f32 %v3660_v47, %v787_v49  ;;  %v456_v58 = vld [vmem:[%s5313_s20] sm:$0xff]  ;;  %s5318_s11 = sld [smem:[#allocation65_spill]]  ;;  %p4353_p10 = por %p4352_p9, %p4351_p8 }
 0x16c   :  { %v789_v51 = vadd.f32 %v3660_v47, %v788_v50  ;;  %p4354_p11 = pnand %p4353_p10, %p4349_p7 }
 0x16e   :  { %v4776_v52 = vsel %vm790_vm3, %v3660_v47, %v789_v51 }
 0x209   :  { %v4719_v13 = vpop.trf.xlu0 }
 0x20a   :  { %550 = vmatpush.msra.mxu0 %v4719_v13  ;;  %574 = vmatpush.msra.mxu1 %v4719_v13 }
 0x20b   :  { %3487 = vmatmul.msk.f32.vlgmr.msra.gmra.mxu0 %vm531_vm2, %v4715_v11  ;;  %3488 = vmatmul.msk.f32.vlgmr.msra.gmra.mxu1 %vm531_vm2, %v4717_v12 }
 0x20c   :  { %647 = vmatpush.msrb.mxu0 %v4722_v14 }
 0x20e   :  { %742 = vmatpush.msra.mxu0 %v4761_v29 }
 0x213   :  { %3493 = vmatmul.msk.f32.vlgmr.msrb.gmra.mxu0 %vm531_vm2, %v4719_v13 }
 0x288   :  { %v552_v17 = vpop.f32.mrf.mxu0  ;;  %v576_v18 = vpop.f32.mrf.mxu1 }
 0x289   :  { %3490 = vmatmul.msk.f32.vlgmr.msra.gmra.mxu2 %vm531_vm2, %v576_v18  ;;  %3491 = vmatmul.msk.f32.vlgmr.msra.gmra.mxu3 %vm531_vm2, %v552_v17  ;;  %v3641_v18 = vld [vmem:[#allocation11] ss:$0 sm:$0xff] }
 0x290   :  { %v649_v23 = vpop.f32.mrf.mxu0 }
 0x30c   :  { %v601_v19 = vpop.f32.mrf.mxu2  ;;  %v624_v20 = vpop.f32.mrf.mxu3 }
 0x30d   :  { %v625_v21 = vadd.f32 %v624_v20, %v601_v19 }
 0x30f   :  { %v652_v24 = vadd.f32 %v649_v23, %v625_v21 }
 0x311   :  { %v656_v25 = vadd.f32 %v4744_v22, %v652_v24 }
 0x313   :  { %v657_v26 = vmax.f32 %v656_v25, 0.0 }
 0x315   :  { %673 = vmatpush.msrb.mxu1 %v657_v26  ;;  %694 = vmatpush.msrb.mxu2 %v657_v26 }
 0x316   :  { %3494 = vmatmul.msk.f32.vlgmr.msrb.gmra.mxu1 %vm531_vm2, %v4715_v11  ;;  %3495 = vmatmul.msk.f32.vlgmr.msrb.gmra.mxu2 %vm531_vm2, %v4717_v12 }
 0x317   :  { %767 = vmatpush.msra.mxu1 %v4748_v27  ;;  %840 = vmatpush.msra.mxu2 %v456_v58 }
 0x31e   :  { %3500 = vmatmul.msk.f32.vlgmr.msra.gmra.mxu1 %vm531_vm2, %v657_v26 }
 0x393   :  { %v675_v30 = vpop.f32.mrf.mxu1 }
 0x394   :  { %3498 = vmatmul.msk.f32.vlgmr.msra.gmra.mxu0 %vm531_vm2, %v675_v30 }
 0x399   :  { %v696_v31 = vpop.f32.mrf.mxu2 }
 0x39a   :  { %3497 = vmatmul.msk.f32.vlgmr.msrb.gmra.mxu3 %vm531_vm2, %v696_v31 }
 0x39b   :  { %v769_v36 = vpop.f32.mrf.mxu1 }
 0x411   :  { %v744_v32 = vpop.f32.mrf.mxu0 }
 0x41d   :  { %v721_v33 = vpop.f32.mrf.mxu3 }
 0x41e   :  { %v745_v34 = vadd.f32 %v744_v32, %v721_v33 }
 0x420   :  { %v772_v37 = vadd.f32 %v769_v36, %v745_v34 }
 0x422   :  { %v776_v38 = vadd.f32 %v4767_v35, %v772_v37 }
 0x424   :  { %v777_v39 = vmax.f32 %v776_v38, 0.0 }
 0x426   :  { %v778_v40 = vadd.f32 %v777_v39, %v4719_v13 }
 0x428   :  { %v779_v41 = vmax.f32 %v778_v40, 0.0 }
 0x42a   :  { %v780_v43 = vmul.f32 2.828427, %v779_v41 }
 0x42c   :  { %v781_v44 = vadd.f32 %v780_v43, %v4772_v42 }
 0x42e   :  { %v782_v45 = vsel %vm531_vm2, %v781_v44, 0.0 }
 0x42f   :  { %783 = vadd.xlane.f32.xlu0 %v782_v45 }
 0x4a2   :  { %v784_v53 = vpop.xlane.xlu0 %783 }
 0x4a3   :  { %v792_v54 = vmul.f32 %v4776_v52, %v784_v53 }
 0x4a5   :  { %v793_v55 = vsub.f32 %v781_v44, %v792_v54 }
 0x4a7   :  { %v794_v56 = vmul.f32 %v793_v55, %v793_v55 }
 0x4a9   :  { %v795_v57 = vsel %vm531_vm2, %v794_v56, 0.0 }
 0x4aa   :  { %796 = vadd.xlane.f32.xlu1 %v795_v57 }
 0x51d   :  { %v797_v59 = vpop.xlane.xlu1 %796 }
 0x51e   :  { %v798_v60 = vmul.f32 %v797_v59, %v4776_v52 }
 0x520   :  { %v799_v61 = vadd.f32 1e-05, %v798_v60 }
 0x522   :  { %3661 = vrsqrt.f32 %v799_v61  ;;  %vm806_vm5 = vweird.f32 %v799_v61 }
 0x528   :  { %v3662_v62 = vpop.eup %3661 }
 0x529   :  { %v801_v63 = vmul.f32 %v3662_v62, %v799_v61  ;;  %vm807_vm4 = vweird.f32 %v3662_v62 }
 0x52a   :  { %vm808_vm6 = vmor %vm806_vm5, %vm807_vm4 }
 0x52b   :  { %v802_v0 = vmul.f32 %v3662_v62, %v801_v63 }
 0x52d   :  { %v803_v1 = vmul.f32 0.5, %v802_v0 }
 0x52f   :  { %v804_v2 = vsub.f32 1.5, %v803_v1 }
 0x531   :  { %v805_v3 = vmul.f32 %v3662_v62, %v804_v2 }
 0x533   :  { %v809_v5 = vsel %vm808_vm6, %v3662_v62, %v805_v3 }
 0x534   :  { %v810_v8 = vmul.f32 %v809_v5, %v793_v55 }
 0x536   :  { %v814_v10 = vmul.f32 %v3639_v4, %v810_v8 }
 0x538   :  { %v4782_v17 = vadd.f32 %v3640_v9, %v814_v10 }
 0x53a   :  { %3501 = vmatmul.msk.f32.vlgmr.msra.gmra.mxu2 %vm531_vm2, %v4782_v17 }
 0x5bd   :  { %v842_v19 = vpop.f32.mrf.mxu2 }
 0x5be   :  { %v843_v20 = vadd.f32 %v3641_v18, %v842_v19 }
 0x5c0   :  { %846 = vrot.lane.b32.xlu1 %v843_v20, %s4443_s23  ;;  %v916_v21 = vperm.slane %v843_v20, 0  ;;  %v951_v23 = vperm.slane %v843_v20, 5  ;;  %v923_v24 = vperm.slane %v843_v20, 1  ;;  %v965_v25 = vperm.slane %v843_v20, 7 }
 0x5c1   :  { %v930_v26 = vperm.slane %v843_v20, 2  ;;  %v937_v30 = vperm.slane %v843_v20, 3  ;;  %v944_v31 = vperm.slane %v843_v20, 4  ;;  %v958_v32 = vperm.slane %v843_v20, 6 }
 0x5c2   :  { %921 = vperm.xlu2 %3623, %v916_v21  }
 0x5c8   :  { %956 = vperm.xlu1 %3624, %v951_v23  }
 0x5ca   :  { %928 = vperm.xlu2 %3623, %v923_v24  }
 0x5d0   :  { %970 = vperm.xlu1 %3624, %v965_v25  }
 0x5d2   :  { %935 = vperm.xlu2 %3623, %v930_v26  }
 0x5da   :  { %942 = vperm.xlu2 %3623, %v937_v30  }
 0x5e2   :  { %949 = vperm.xlu2 %3623, %v944_v31  }
 0x5ea   :  { %963 = vperm.xlu2 %3623, %v958_v32  }
 0x61c   :  { %v922_v34 = vpop.permute.xlu2 %921 }
 0x624   :  { %v929_v36 = vpop.permute.xlu2 %928 }
 0x62c   :  { %v936_v37 = vpop.permute.xlu2 %935 }
 0x632   :  { %v847_v33 = vpop.permute.xlu1 %846 }
 0x633   :  { %849 = vxpose.xlu2.b32.start.end [1/1] (short) (narrow) %v847_v33, 8 }
 0x634   :  { %v943_v38 = vpop.permute.xlu2 %942 }
 0x63a   :  { %v957_v56 = vpop.permute.xlu1 %956 }
 0x63c   :  { %v950_v39 = vpop.permute.xlu2 %949 }
 0x642   :  { %v971_v59 = vpop.permute.xlu1 %970 }
 0x644   :  { %v964_v40 = vpop.permute.xlu2 %963 }
 0x6cc   :  { %v865_v41 = vpop.trf.xlu2 }
 0x6cd   :  { %v4787_v43 = vmul.f32 %v964_v40, %v865_v41  ;;  %v973_v44 = vmul.f32 %v929_v36, %v865_v41  ;;  %v972_v45 = vmul.f32 %v922_v34, %v865_v41  ;;  %v974_v49 = vmul.f32 %v936_v37, %v865_v41 }
 0x6ce   :  { %v975_v51 = vmul.f32 %v943_v38, %v865_v41  ;;  %v976_v54 = vmul.f32 %v950_v39, %v865_v41  ;;  %v977_v57 = vmul.f32 %v957_v56, %v865_v41  ;;  %v979_v60 = vmul.f32 %v971_v59, %v865_v41 }
 0x6cf   :  { %v998_v46 = vsel %vm531_vm2, %v4787_v43, -inf  ;;  %v983_v47 = vsel %vm531_vm2, %v973_v44, -inf  ;;  %v980_v48 = vsel %vm531_vm2, %v972_v45, -inf  ;;  %v986_v50 = vsel %vm531_vm2, %v974_v49, -inf }
 0x6d0   :  { %999 = vmax.xlane.f32.xlu0 %v998_v46  ;;  %984 = vmax.xlane.f32.xlu2 %v983_v47  ;;  %v989_v53 = vsel %vm531_vm2, %v975_v51, -inf  ;;  %v992_v55 = vsel %vm531_vm2, %v976_v54, -inf  ;;  %v995_v58 = vsel %vm531_vm2, %v977_v57, -inf  ;;  %v1001_v61 = vsel %vm531_vm2, %v979_v60, -inf }
 0x6d1   :  { %981 = vmax.xlane.f32.xlu1 %v980_v48 }
 0x6d9   :  { %987 = vmax.xlane.f32.xlu1 %v986_v50 }
 0x6e1   :  { %990 = vmax.xlane.f32.xlu1 %v989_v53 }
 0x6e4   :  { %881 = vrot.lane.b32.xlu0 %v843_v20, %s4444_s2 }
 0x6e9   :  { %993 = vmax.xlane.f32.xlu1 %v992_v55 }
 0x6f1   :  { %996 = vmax.xlane.f32.xlu1 %v995_v58 }
 0x6f9   :  { %1002 = vmax.xlane.f32.xlu1 %v1001_v61 }
 0x743   :  { %v985_v63 = vpop.xlane.xlu2 %984  ;;  %v1000_v36 = vpop.xlane.xlu0 %999 }
 0x744   :  { %v982_v62 = vpop.xlane.xlu1 %981  ;;  %v1005_v2 = vsub.f32 %v973_v44, %v985_v63  ;;  %v1010_v40 = vsub.f32 %v4787_v43, %v1000_v36 }
 0x745   :  { %v1004_v0 = vsub.f32 %v972_v45, %v982_v62 }
 0x746   :  { %v1014_v3 = vmul.f32 1.442695, %v1005_v2  ;;  %v1024_v44 = vmul.f32 1.442695, %v1010_v40 }
 0x747   :  { %v1012_v1 = vmul.f32 1.442695, %v1004_v0 }
 0x749   :  { %3663 = vpow2.f32 %v1012_v1 }
 0x74a   :  { %3665 = vpow2.f32 %v1014_v3 }
 0x74c   :  { %v988_v4 = vpop.xlane.xlu1 %987 }
 0x74d   :  { %v1006_v8 = vsub.f32 %v974_v49, %v988_v4 }
 0x74f   :  { %v4799_v5 = vpop.eup %3663  ;;  %v1016_v10 = vmul.f32 1.442695, %v1006_v8 }
 0x750   :  { %v1028_v9 = vsel %vm531_vm2, %v4799_v5, 0.0  ;;  %v4803_v20 = vpop.eup %3665 }
 0x751   :  { %1029 = vadd.xlane.f32.xlu1 %v1028_v9  ;;  %3667 = vpow2.f32 %v1016_v10  ;;  %v1031_v23 = vsel %vm531_vm2, %v4803_v20, 0.0 }
 0x754   :  { %v991_v18 = vpop.xlane.xlu1 %990 }
 0x755   :  { %v1007_v19 = vsub.f32 %v975_v51, %v991_v18 }
 0x757   :  { %v1018_v21 = vmul.f32 1.442695, %v1007_v19  ;;  %v3668_v26 = vpop.eup %3667 }
 0x758   :  { %v1034_v33 = vsel %vm531_vm2, %v3668_v26, 0.0 }
 0x759   :  { %3669 = vpow2.f32 %v1018_v21  ;;  %1032 = vadd.xlane.f32.xlu1 %v1031_v23 }
 0x75c   :  { %v994_v24 = vpop.xlane.xlu1 %993 }
 0x75d   :  { %v1008_v25 = vsub.f32 %v976_v54, %v994_v24  ;;  %v882_v54 = vpop.permute.xlu0 %881 }
 0x75f   :  { %v4807_v30 = vpop.eup %3669  ;;  %v1020_v31 = vmul.f32 1.442695, %v1008_v25 }
 0x760   :  { %v1037_v32 = vsel %vm531_vm2, %v4807_v30, 0.0 }
 0x761   :  { %3671 = vpow2.f32 %v1020_v31  ;;  %1038 = vadd.xlane.f32.xlu0 %v1037_v32  ;;  %1035 = vadd.xlane.f32.xlu1 %v1034_v33 }
 0x764   :  { %v997_v34 = vpop.xlane.xlu1 %996 }
 0x765   :  { %v1009_v37 = vsub.f32 %v977_v57, %v997_v34 }
 0x767   :  { %v3672_v38 = vpop.eup %3671  ;;  %v1022_v39 = vmul.f32 1.442695, %v1009_v37 }
 0x768   :  { %v1040_v41 = vsel %vm531_vm2, %v3672_v38, 0.0 }
 0x769   :  { %3673 = vpow2.f32 %v1022_v39  ;;  %1041 = vadd.xlane.f32.xlu1 %v1040_v41 }
 0x76a   :  { %3675 = vpow2.f32 %v1024_v44 }
 0x76c   :  { %v1003_v45 = vpop.xlane.xlu1 %1002 }
 0x76d   :  { %v1011_v47 = vsub.f32 %v979_v60, %v1003_v45 }
 0x76f   :  { %v4814_v46 = vpop.eup %3673  ;;  %v1026_v49 = vmul.f32 1.442695, %v1011_v47 }
 0x770   :  { %v1043_v48 = vsel %vm531_vm2, %v4814_v46, 0.0  ;;  %v3676_v50 = vpop.eup %3675 }
 0x771   :  { %1044 = vadd.xlane.f32.xlu1 %v1043_v48  ;;  %3677 = vpow2.f32 %v1026_v49  ;;  %v1046_v51 = vsel %vm531_vm2, %v3676_v50, 0.0 }
 0x777   :  { %v3678_v43 = vpop.eup %3677 }
 0x778   :  { %v1049_v53 = vsel %vm531_vm2, %v3678_v43, 0.0 }
 0x779   :  { %1047 = vadd.xlane.f32.xlu1 %v1046_v51 }
 0x781   :  { %1050 = vadd.xlane.f32.xlu1 %v1049_v53 }
 0x7bb   :  { %884 = vxpose.xlu1.b32.start.end [1/1] (short) (narrow) %v882_v54, 8 }
 0x7c4   :  { %v1030_v55 = vpop.xlane.xlu1 %1029 }
 0x7c5   :  { %3679 = vrcp.f32 %v1030_v55 }
 0x7cb   :  { %v3680_v62 = vpop.eup %3679 }
 0x7cc   :  { %v1033_v56 = vpop.xlane.xlu1 %1032  ;;  %v1060_v1 = vmul.f32 %v3680_v62, %v4799_v5 }
 0x7d4   :  { %v1036_v57 = vpop.xlane.xlu1 %1035  ;;  %v1039_v2 = vpop.xlane.xlu0 %1038 }
 0x7d5   :  { %3681 = vrcp.f32 %v1036_v57 }
 0x7d6   :  { %3683 = vrcp.f32 %v1033_v56 }
 0x7db   :  { %v3682_v63 = vpop.eup %3681 }
 0x7dc   :  { %v1042_v58 = vpop.xlane.xlu1 %1041  ;;  %v1062_v0 = vmul.f32 %v3682_v63, %v3668_v26  ;;  %v3684_v4 = vpop.eup %3683 }
 0x7dd   :  { %3685 = vrcp.f32 %v1042_v58  ;;  %v1061_v23 = vmul.f32 %v3684_v4, %v4803_v20 }
 0x7de   :  { %3687 = vrcp.f32 %v1039_v2 }
 0x7e3   :  { %v3686_v10 = vpop.eup %3685 }
 0x7e4   :  { %v1045_v59 = vpop.xlane.xlu1 %1044  ;;  %v1064_v21 = vmul.f32 %v3686_v10, %v3672_v38  ;;  %v3688_v5 = vpop.eup %3687 }
 0x7e5   :  { %v1063_v34 = vmul.f32 %v3688_v5, %v4807_v30 }
 0x7ec   :  { %v1048_v60 = vpop.xlane.xlu1 %1047 }
 0x7ed   :  { %3689 = vrcp.f32 %v1048_v60 }
 0x7ee   :  { %3691 = vrcp.f32 %v1045_v59 }
 0x7f3   :  { %v3690_v26 = vpop.eup %3689 }
 0x7f4   :  { %v1051_v61 = vpop.xlane.xlu1 %1050  ;;  %v1066_v33 = vmul.f32 %v3690_v26, %v3676_v50  ;;  %v3692_v39 = vpop.eup %3691  ;;  %v4832_v50 = vld [vmem:[#allocation12] sm:$0xff]  ;;  %v4445_v26 = vmov 0  }
 0x7f5   :  { %3693 = vrcp.f32 %v1051_v61  ;;  %v1065_v40 = vmul.f32 %v3692_v39, %v4814_v46  ;;  %1150 = vmatpush.msra.mxu3 %v4832_v50  ;;  %3625 = vset.pattern.permute.xlu0 %v4445_v26  ;;  %v3646_v39 = vld [vmem:[#allocation18] ss:$0 sm:$0xff] }
 0x7f6   :  { %3626 = vset.pattern.permute.xlu2 %v4445_v26 }
 0x7fb   :  { %v3694_v44 = vpop.eup %3693 }
 0x7fc   :  { %v1067_v47 = vmul.f32 %v3694_v44, %v3678_v43  ;;  %v4862_v44 = vld [vmem:[#allocation30] sm:$0xff] }
 0x7fd   :  { %1234 = vmatpush.msrb.mxu1 %v4862_v44 }
 0x7ff   :  { %1347 = vmatpush.msra.mxu1 %v4737_v16 }
 0x80e   :  { %3627 = vset.pattern.permute.xlu1 %v4445_v26 }
 0x85f   :  { %v900_v3 = vpop.trf.xlu1 }
 0x860   :  { %v1070_v8 = vmul.f32 %v1062_v0, %v900_v3  ;;  %v1068_v9 = vmul.f32 %v1060_v1, %v900_v3  ;;  %v1072_v24 = vmul.f32 %v1064_v21, %v900_v3  ;;  %v1069_v25 = vmul.f32 %v1061_v23, %v900_v3  ;;  %v3643_v23 = vld [vmem:[#allocation15] ss:$0 sm:$0xff] }
 0x861   :  { %v1074_v36 = vmul.f32 %v1066_v33, %v900_v3  ;;  %v1071_v37 = vmul.f32 %v1063_v34, %v900_v3  ;;  %v1073_v41 = vmul.f32 %v1065_v40, %v900_v3  ;;  %v1075_v48 = vmul.f32 %v1067_v47, %v900_v3  ;;  %v482_v47 = vld [vmem:[%s5314_s3] sm:$0xff] }
 0x862   :  { %v1082_v18 = vsel %vm531_vm2, %v1070_v8, 0.0  ;;  %v1076_v19 = vsel %vm531_vm2, %v1068_v9, 0.0  ;;  %v1088_v31 = vsel %vm531_vm2, %v1072_v24, 0.0  ;;  %v1079_v32 = vsel %vm531_vm2, %v1069_v25, 0.0 }
 0x863   :  { %1083 = vadd.xlane.f32.xlu2 %v1082_v18  ;;  %1077 = vadd.xlane.f32.xlu0 %v1076_v19  ;;  %v1094_v38 = vsel %vm531_vm2, %v1074_v36, 0.0  ;;  %v1085_v20 = vsel %vm531_vm2, %v1071_v37, 0.0  ;;  %v1091_v45 = vsel %vm531_vm2, %v1073_v41, 0.0  ;;  %v1097_v30 = vsel %vm531_vm2, %v1075_v48, 0.0  ;;  %v3642_v18 = vld [vmem:[#allocation14] ss:$0 sm:$0xff] }
 0x864   :  { %v3645_v37 = vld [vmem:[#allocation17] ss:$0 sm:$0xff] }
 0x86b   :  { %1089 = vadd.xlane.f32.xlu2 %v1088_v31  ;;  %1080 = vadd.xlane.f32.xlu0 %v1079_v32  ;;  %v3644_v31 = vld [vmem:[#allocation2] ss:$0 sm:$0xff] }
 0x873   :  { %1095 = vadd.xlane.f32.xlu2 %v1094_v38  ;;  %1086 = vadd.xlane.f32.xlu0 %v1085_v20 }
 0x87b   :  { %1092 = vadd.xlane.f32.xlu0 %v1091_v45  ;;  %v483_v45 = vld [vmem:[#allocation4] sm:$0x1] }
 0x87c   :  { %1256 = vperm.xlu1 %3627, %v483_v45  }
 0x883   :  { %1098 = vadd.xlane.f32.xlu0 %v1097_v30 }
 0x884   :  { %3630 = vset.pattern.permute.xlu1 %v4705_v6 }
 0x8d6   :  { %v1078_v49 = vpop.xlane.xlu0 %1077  ;;  %v1084_v53 = vpop.xlane.xlu2 %1083 }
 0x8d7   :  { %v1111_v56 = vperm.slane %v1078_v49, %v4709_v7  ;;  %v1113_v58 = vperm.slane %v1084_v53, %v4709_v7  ;;  %v3648_v53 = vld [vmem:[#allocation32] ss:$0 sm:$0xff] }
 0x8de   :  { %v1081_v51 = vpop.xlane.xlu0 %1080  ;;  %v1090_v55 = vpop.xlane.xlu2 %1089 }
 0x8df   :  { %v1112_v46 = vperm.slane %v1081_v51, %v4709_v7  ;;  %v1115_v63 = vperm.slane %v1090_v55, %v4709_v7 }
 0x8e1   :  { %v1120_v43 = vsel %vm1119_vm7, %v1112_v46, %v1111_v56 }
 0x8e2   :  { %v1122_v60 = vsel %vm1121_vm8, %v1113_v58, %v1120_v43 }
 0x8e6   :  { %v1087_v54 = vpop.xlane.xlu0 %1086  ;;  %v1096_v0 = vpop.xlane.xlu2 %1095 }
 0x8e7   :  { %v1114_v57 = vperm.slane %v1087_v54, %v4709_v7  ;;  %v1117_v3 = vperm.slane %v1096_v0, %v4709_v7 }
 0x8e9   :  { %v1124_v61 = vsel %vm1123_vm9, %v1114_v57, %v1122_v60 }
 0x8ea   :  { %v1126_v1 = vsel %vm1125_vm10, %v1115_v63, %v1124_v61 }
 0x8ee   :  { %v1093_v59 = vpop.xlane.xlu0 %1092  ;;  %v4876_v61 = vpop.permute.xlu1 %1256 }
 0x8ef   :  { %v1116_v62 = vperm.slane %v1093_v59, %v4709_v7 }
 0x8f1   :  { %v1128_v2 = vsel %vm1127_vm11, %v1116_v62, %v1126_v1 }
 0x8f2   :  { %v1130_v9 = vsel %vm1129_vm12, %v1117_v3, %v1128_v2 }
 0x8f6   :  { %v1099_v4 = vpop.xlane.xlu0 %1098 }
 0x8f7   :  { %v1118_v8 = vperm.slane %v1099_v4, %v4709_v7 }
 0x8f9   :  { %v1132_v10 = vsel %vm1131_vm13, %v1118_v8, %v1130_v9 }
 0x8fa   :  { %3502 = vmatmul.msk.f32.vlgmr.msra.gmra.mxu3 %vm531_vm2, %v1132_v10 }
 0x97d   :  { %v1152_v19 = vpop.f32.mrf.mxu3 }
 0x97e   :  { %v1153_v21 = vadd.f32 %v3642_v18, %v1152_v19 }
 0x980   :  { %v1155_v24 = vadd.f32 %v1153_v21, %v4782_v17  ;;  %v4857_v17 = vld [vmem:[#allocation27] sm:$0xff] }
 0x981   :  { %1205 = vmatpush.msrb.mxu0 %v4857_v17 }
 0x982   :  { %v1159_v25 = vmul.f32 %v3643_v23, %v1155_v24 }
 0x983   :  { %1324 = vmatpush.msra.mxu0 %v4734_v15  ;;  %v3647_v15 = vld [vmem:[#allocation29] ss:$0 sm:$0xff] }
 0x984   :  { %v1160_v5 = vsel %vm531_vm2, %v1159_v25, 0.0 }
 0x985   :  { %1161 = vadd.xlane.f32.xlu2 %v1160_v5 }
 0x99d   :  { %1243 = vperm.xlu2 %3626, %v482_v47  }
 0x9a5   :  { %3629 = vset.pattern.permute.xlu2 %v4705_v6 }
 0x9f8   :  { %v1162_v32 = vpop.xlane.xlu2 %1161 }
 0x9f9   :  { %v1166_v33 = vadd.f32 %v3644_v31, %v1162_v32 }
 0x9fb   :  { %v1168_v34 = vmul.f32 0.01, %v1166_v33  ;;  %vm1167_vm14 = vcmp.gt.f32.partialorder %v1166_v33, 0.0 }
 0x9fd   :  { %v1169_v36 = vsel %vm1167_vm14, %v1166_v33, %v1168_v34 }
 0x9fe   :  { %1172 = vperm.xlu0 %3625, %v1169_v36  }
 0xa00   :  { %v4871_v56 = vpop.permute.xlu2 %1243 }
 0xa06   :  { %3628 = vset.pattern.permute.xlu0 %v4705_v6 }
 0xa70   :  { %v1173_v38 = vpop.permute.xlu0 %1172 }
 0xa71   :  { %v1178_v20 = vmul.f32 %v3645_v37, %v1173_v38 }
 0xa73   :  { %v1182_v40 = vadd.f32 %v3646_v39, %v1178_v20 }
 0xa75   :  { %v1183_v41 = vadd.f32 %v1182_v40, %v1155_v24 }
 0xa77   :  { %3503 = vmatmul.msk.f32.vlgmr.msrb.gmra.mxu0 %vm531_vm2, %v1183_v41 }
 0xaf4   :  { %v1207_v48 = vpop.f32.mrf.mxu0 }
 0xaf5   :  { %v1208_v30 = vadd.f32 %v3647_v15, %v1207_v48 }
 0xaf7   :  { %vm1210_vm15 = vcmp.gt.f32.partialorder %v1208_v30, 0.0  ;;  %v1211_v49 = vmul.f32 0.01, %v1208_v30 }
 0xaf9   :  { %v1212_v51 = vsel %vm1210_vm15, %v1208_v30, %v1211_v49  ;;  %v466_v30 = vld [vmem:[%s5315_s10] sm:$0xff] }
 0xafa   :  { %3504 = vmatmul.msk.f32.vlgmr.msrb.gmra.mxu1 %vm531_vm2, %v1212_v51 }
 0xafb   :  { %1436 = vmatpush.msrb.mxu1 %v4757_v28  ;;  %v1259_v28 = vperm.slane %v4876_v61, 0 }
 0xb77   :  { %v1236_v54 = vpop.f32.mrf.mxu1 }
 0xb78   :  { %v1237_v55 = vadd.f32 %v3648_v53, %v1236_v54 }
 0xb7a   :  { %v1239_v46 = vadd.f32 %v1237_v55, %v1183_v41 }
 0xb7c   :  { %v1240_v16 = vadd.f32 %v1239_v46, %v4719_v13 }
 0xb7e   :  { %v1246_v43 = vmul.f32 %v4871_v56, %v1240_v16 }
 0xb80   :  { %v1247_v57 = vsel %vm531_vm2, %v1246_v43, 0.0  ;;  %v3649_v43 = vld [vmem:[%s5316_s24] ss:$0 sm:$0xff] }
 0xb81   :  { %v1248_v58 = vrot.slane %v1247_v57, 4 }
 0xb83   :  { %v1249_v59 = vadd.f32 %v1248_v58, %v1247_v57 }
 0xb85   :  { %v1250_v60 = vrot.slane %v1249_v59, 2 }
 0xb87   :  { %v1251_v62 = vadd.f32 %v1250_v60, %v1249_v59  ;;  %v3650_v59 = vld [vmem:[%s5317_s27] ss:$0 sm:$0xff] }
 0xb89   :  { %v1252_v63 = vrot.slane %v1251_v62, 1 }
 0xb8b   :  { %v1253_v0 = vadd.f32 %v1252_v63, %v1251_v62  ;;  %v3651_v63 = vld [vmem:[#allocation20] ss:$0 sm:$0xff] }
 0xb8d   :  { %v1260_v1 = vadd.f32 %v1259_v28, %v1253_v0 }
 0xb8f   :  { %v1261_v2 = vmul.f32 0.5, %v1260_v1 }
 0xb91   :  { %3695 = vtanh.f32 %v1261_v2 }
 0xb97   :  { %v3696_v3 = vpop.eup %3695 }
 0xb98   :  { %v1263_v4 = vadd.f32 1.0, %v3696_v3 }
 0xb9a   :  { %v4881_v8 = vmul.f32 0.5, %v1263_v4 }
 0xb9c   :  { %v1265_v9 = vadd.f32 %v4881_v8, %v4719_v13 }
 0xb9e   :  { %1281 = vmatpush.msrb.mxu2 %v1265_v9  ;;  %1301 = vmatpush.msrb.mxu3 %v1265_v9 }
 0xb9f   :  { %3505 = vmatmul.msk.f32.vlgmr.msrb.gmra.mxu2 %vm531_vm2, %v4715_v11  ;;  %3506 = vmatmul.msk.f32.vlgmr.msrb.gmra.mxu3 %vm531_vm2, %v4717_v12 }
 0xba0   :  { %1370 = vmatpush.msra.mxu2 %v4722_v14 }
 0xba2   :  { %1459 = vmatpush.msrb.mxu2 %v4761_v29 }
 0xba7   :  { %3509 = vmatmul.msk.f32.vlgmr.msra.gmra.mxu2 %vm531_vm2, %v1265_v9 }
 0xc22   :  { %v1283_v10 = vpop.f32.mrf.mxu2  ;;  %v1303_v18 = vpop.f32.mrf.mxu3 }
 0xc23   :  { %3507 = vmatmul.msk.f32.vlgmr.msra.gmra.mxu0 %vm531_vm2, %v1303_v18  ;;  %3508 = vmatmul.msk.f32.vlgmr.msra.gmra.mxu1 %vm531_vm2, %v1283_v10 }
 0xc2a   :  { %v1372_v23 = vpop.f32.mrf.mxu2 }
 0xca0   :  { %v1326_v13 = vpop.f32.mrf.mxu0  ;;  %v1349_v19 = vpop.f32.mrf.mxu1 }
 0xca1   :  { %v1350_v21 = vadd.f32 %v1349_v19, %v1326_v13 }
 0xca3   :  { %v1375_v24 = vadd.f32 %v1372_v23, %v1350_v21 }
 0xca5   :  { %v1376_v25 = vadd.f32 %v4744_v22, %v1375_v24 }
 0xca7   :  { %v1377_v5 = vmax.f32 %v1376_v25, 0.0 }
 0xca9   :  { %1393 = vmatpush.msra.mxu3 %v1377_v5  ;;  %1413 = vmatpush.msrb.mxu0 %v1377_v5 }
 0xcaa   :  { %3510 = vmatmul.msk.f32.vlgmr.msra.gmra.mxu3 %vm531_vm2, %v4715_v11  ;;  %3511 = vmatmul.msk.f32.vlgmr.msrb.gmra.mxu0 %vm531_vm2, %v4717_v12 }
 0xcab   :  { %1482 = vmatpush.msrb.mxu3 %v4748_v27  ;;  %1545 = vmatpush.msra.mxu0 %v466_v30 }
 0xcb2   :  { %3514 = vmatmul.msk.f32.vlgmr.msrb.gmra.mxu3 %vm531_vm2, %v1377_v5 }
 0xd27   :  { %v1415_v14 = vpop.f32.mrf.mxu0 }
 0xd28   :  { %3512 = vmatmul.msk.f32.vlgmr.msrb.gmra.mxu1 %vm531_vm2, %v1415_v14 }
 0xd2d   :  { %v1395_v29 = vpop.f32.mrf.mxu3 }
 0xd2e   :  { %3513 = vmatmul.msk.f32.vlgmr.msrb.gmra.mxu2 %vm531_vm2, %v1395_v29 }
 0xd35   :  { %v1484_v33 = vpop.f32.mrf.mxu3 }
 0xda5   :  { %v1438_v22 = vpop.f32.mrf.mxu1 }
 0xdb1   :  { %v1461_v31 = vpop.f32.mrf.mxu2 }
 0xdb2   :  { %v1462_v32 = vadd.f32 %v1461_v31, %v1438_v22 }
 0xdb4   :  { %v1487_v34 = vadd.f32 %v1484_v33, %v1462_v32 }
 0xdb6   :  { %v1488_v36 = vadd.f32 %v4767_v35, %v1487_v34 }
 0xdb8   :  { %v1489_v37 = vmax.f32 %v1488_v36, 0.0 }
 0xdba   :  { %v1490_v39 = vadd.f32 %v1489_v37, %v1265_v9 }
 0xdbc   :  { %v1491_v38 = vmax.f32 %v1490_v39, 0.0 }
 0xdbe   :  { %v1492_v27 = vmul.f32 2.828427, %v1491_v38 }
 0xdc0   :  { %v1493_v20 = vadd.f32 %v1492_v27, %v4772_v42 }
 0xdc2   :  { %v1494_v40 = vsel %vm531_vm2, %v1493_v20, 0.0 }
 0xdc3   :  { %1495 = vadd.xlane.f32.xlu2 %v1494_v40 }
 0xe36   :  { %v1496_v41 = vpop.xlane.xlu2 %1495 }
 0xe37   :  { %v1497_v45 = vmul.f32 %v1496_v41, %v4776_v52 }
 0xe39   :  { %v1498_v47 = vsub.f32 %v1493_v20, %v1497_v45 }
 0xe3b   :  { %v1499_v15 = vmul.f32 %v1498_v47, %v1498_v47 }
 0xe3d   :  { %v1500_v48 = vsel %vm531_vm2, %v1499_v15, 0.0 }
 0xe3e   :  { %1501 = vadd.xlane.f32.xlu0 %v1500_v48 }
 0xeb1   :  { %v1502_v35 = vpop.xlane.xlu0 %1501 }
 0xeb2   :  { %v1503_v49 = vmul.f32 %v1502_v35, %v4776_v52 }
 0xeb4   :  { %v1504_v51 = vadd.f32 1e-05, %v1503_v49 }
 0xeb6   :  { %3697 = vrsqrt.f32 %v1504_v51  ;;  %vm1511_vm1 = vweird.f32 %v1504_v51 }
 0xebc   :  { %v3698_v42 = vpop.eup %3697 }
 0xebd   :  { %v1506_v53 = vmul.f32 %v3698_v42, %v1504_v51  ;;  %vm1512_vm0 = vweird.f32 %v3698_v42 }
 0xebe   :  { %vm1513_vm3 = vmor %vm1511_vm1, %vm1512_vm0 }
 0xebf   :  { %v1507_v54 = vmul.f32 %v3698_v42, %v1506_v53 }
 0xec1   :  { %v1508_v55 = vmul.f32 0.5, %v1507_v54 }
 0xec3   :  { %v1509_v46 = vsub.f32 1.5, %v1508_v55 }
 0xec5   :  { %v1510_v16 = vmul.f32 %v3698_v42, %v1509_v46 }
 0xec7   :  { %v1514_v57 = vsel %vm1513_vm3, %v3698_v42, %v1510_v16 }
 0xec8   :  { %v1515_v58 = vmul.f32 %v1514_v57, %v1498_v47 }
 0xeca   :  { %v1519_v60 = vmul.f32 %v3649_v43, %v1515_v58 }
 0xecc   :  { %v4912_v62 = vadd.f32 %v3650_v59, %v1519_v60 }
 0xece   :  { %3515 = vmatmul.msk.f32.vlgmr.msra.gmra.mxu0 %vm531_vm2, %v4912_v62 }
 0xf4b   :  { %v1547_v0 = vpop.f32.mrf.mxu0 }
 0xf4c   :  { %v1548_v1 = vadd.f32 %v3651_v63, %v1547_v0 }
 0xf4e   :  { %1551 = vrot.lane.b32.xlu2 %v1548_v1, %s4443_s23  ;;  %v1642_v2 = vperm.slane %v1548_v1, 3  ;;  %v1621_v3 = vperm.slane %v1548_v1, 0  ;;  %v1628_v4 = vperm.slane %v1548_v1, 1  ;;  %v1656_v9 = vperm.slane %v1548_v1, 5 }
 0xf4f   :  { %v1635_v10 = vperm.slane %v1548_v1, 2  ;;  %v1670_v18 = vperm.slane %v1548_v1, 7  ;;  %v1649_v13 = vperm.slane %v1548_v1, 4  ;;  %v1663_v19 = vperm.slane %v1548_v1, 6 }
 0xf50   :  { %1647 = vperm.xlu1 %3630, %v1642_v2   ;;  %1626 = vperm.xlu0 %3628, %v1621_v3  }
 0xf56   :  { %1633 = vperm.xlu2 %3629, %v1628_v4  }
 0xf58   :  { %1661 = vperm.xlu1 %3630, %v1656_v9  }
 0xf5e   :  { %1640 = vperm.xlu2 %3629, %v1635_v10  }
 0xf60   :  { %1675 = vperm.xlu1 %3630, %v1670_v18  }
 0xf66   :  { %1654 = vperm.xlu2 %3629, %v1649_v13  }
 0xf68   :  { %3631 = vset.pattern.permute.xlu1 %v4445_v26 }
 0xf6e   :  { %1668 = vperm.xlu2 %3629, %v1663_v19  }
 0xfa8   :  { %v1552_v21 = vpop.permute.xlu2 %1551 }
 0xfa9   :  { %1554 = vxpose.xlu2.b32.start.end [1/1] (short) (narrow) %v1552_v21, 8 }
 0xfb0   :  { %v1634_v23 = vpop.permute.xlu2 %1633 }
 0xfb8   :  { %v1641_v24 = vpop.permute.xlu2 %1640 }
 0xfc0   :  { %v1655_v25 = vpop.permute.xlu2 %1654 }
 0xfc2   :  { %v1627_v14 = vpop.permute.xlu0 %1626  ;;  %v1648_v33 = vpop.permute.xlu1 %1647 }
 0xfc8   :  { %v1669_v5 = vpop.permute.xlu2 %1668 }
 0xfca   :  { %v1662_v40 = vpop.permute.xlu1 %1661 }
 0xfd2   :  { %v1676_v48 = vpop.permute.xlu1 %1675 }
0x1042   :  { %v1570_v29 = vpop.trf.xlu2 }
0x1043   :  { %v1679_v22 = vmul.f32 %v1641_v24, %v1570_v29  ;;  %v1678_v31 = vmul.f32 %v1634_v23, %v1570_v29  ;;  %v1677_v32 = vmul.f32 %v1627_v14, %v1570_v29  ;;  %v1681_v39 = vmul.f32 %v1655_v25, %v1570_v29 }
0x1044   :  { %v1680_v38 = vmul.f32 %v1648_v33, %v1570_v29  ;;  %v1683_v41 = vmul.f32 %v1669_v5, %v1570_v29  ;;  %v1682_v45 = vmul.f32 %v1662_v40, %v1570_v29  ;;  %v1684_v30 = vmul.f32 %v1676_v48, %v1570_v29 }
0x1045   :  { %v1691_v34 = vsel %vm531_vm2, %v1679_v22, -inf  ;;  %v1688_v36 = vsel %vm531_vm2, %v1678_v31, -inf  ;;  %v1685_v37 = vsel %vm531_vm2, %v1677_v32, -inf  ;;  %v1697_v27 = vsel %vm531_vm2, %v1681_v39, -inf }
0x1046   :  { %1692 = vmax.xlane.f32.xlu2 %v1691_v34  ;;  %1689 = vmax.xlane.f32.xlu1 %v1688_v36  ;;  %v1694_v20 = vsel %vm531_vm2, %v1680_v38, -inf  ;;  %v1703_v47 = vsel %vm531_vm2, %v1683_v41, -inf  ;;  %v1700_v15 = vsel %vm531_vm2, %v1682_v45, -inf  ;;  %v1706_v35 = vsel %vm531_vm2, %v1684_v30, -inf }
0x1047   :  { %1686 = vmax.xlane.f32.xlu0 %v1685_v37 }
0x104e   :  { %1698 = vmax.xlane.f32.xlu1 %v1697_v27 }
0x104f   :  { %1695 = vmax.xlane.f32.xlu0 %v1694_v20 }
0x1056   :  { %1704 = vmax.xlane.f32.xlu1 %v1703_v47 }
0x1057   :  { %1701 = vmax.xlane.f32.xlu0 %v1700_v15 }
0x105f   :  { %1707 = vmax.xlane.f32.xlu0 %v1706_v35 }
0x106f   :  { %1586 = vrot.lane.b32.xlu1 %v1548_v1, %s4444_s2 }
0x10b9   :  { %v1690_v51 = vpop.xlane.xlu1 %1689  ;;  %v1693_v16 = vpop.xlane.xlu2 %1692 }
0x10ba   :  { %v1687_v49 = vpop.xlane.xlu0 %1686  ;;  %v1710_v54 = vsub.f32 %v1678_v31, %v1690_v51  ;;  %v1711_v59 = vsub.f32 %v1679_v22, %v1693_v16 }
0x10bb   :  { %v1709_v42 = vsub.f32 %v1677_v32, %v1687_v49 }
0x10bc   :  { %v1719_v55 = vmul.f32 1.442695, %v1710_v54  ;;  %v1721_v63 = vmul.f32 1.442695, %v1711_v59 }
0x10bd   :  { %v1717_v53 = vmul.f32 1.442695, %v1709_v42 }
0x10bf   :  { %3699 = vpow2.f32 %v1717_v53 }
0x10c0   :  { %3701 = vpow2.f32 %v1719_v55 }
0x10c1   :  { %v1699_v0 = vpop.xlane.xlu1 %1698 }
0x10c2   :  { %v1696_v46 = vpop.xlane.xlu0 %1695  ;;  %v1713_v3 = vsub.f32 %v1681_v39, %v1699_v0 }
0x10c3   :  { %v1712_v43 = vsub.f32 %v1680_v38, %v1696_v46 }
0x10c4   :  { %v1725_v10 = vmul.f32 1.442695, %v1713_v3 }
0x10c5   :  { %v1723_v57 = vmul.f32 1.442695, %v1712_v43  ;;  %v4927_v58 = vpop.eup %3699 }
0x10c6   :  { %v1733_v60 = vsel %vm531_vm2, %v4927_v58, 0.0  ;;  %v4931_v1 = vpop.eup %3701 }
0x10c7   :  { %3703 = vpow2.f32 %v1723_v57  ;;  %1734 = vadd.xlane.f32.xlu0 %v1733_v60  ;;  %v1736_v9 = vsel %vm531_vm2, %v4931_v1, 0.0 }
0x10c8   :  { %3705 = vpow2.f32 %v1721_v63 }
0x10c9   :  { %3707 = vpow2.f32 %v1725_v10  ;;  %v1705_v24 = vpop.xlane.xlu1 %1704 }
0x10ca   :  { %v1702_v18 = vpop.xlane.xlu0 %1701  ;;  %v1715_v5 = vsub.f32 %v1683_v41, %v1705_v24 }
0x10cb   :  { %v1714_v19 = vsub.f32 %v1682_v45, %v1702_v18 }
0x10cc   :  { %v1729_v29 = vmul.f32 1.442695, %v1715_v5 }
0x10cd   :  { %v3704_v2 = vpop.eup %3703  ;;  %v1727_v23 = vmul.f32 1.442695, %v1714_v19 }
0x10ce   :  { %v1742_v4 = vsel %vm531_vm2, %v3704_v2, 0.0  ;;  %v4936_v13 = vpop.eup %3705 }
0x10cf   :  { %1743 = vadd.xlane.f32.xlu1 %v1742_v4  ;;  %1737 = vadd.xlane.f32.xlu0 %v1736_v9  ;;  %v1739_v21 = vsel %vm531_vm2, %v4936_v13, 0.0  ;;  %v4940_v25 = vpop.eup %3707  ;;  %3709 = vpow2.f32 %v1727_v23 }
0x10d0   :  { %v1745_v14 = vsel %vm531_vm2, %v4940_v25, 0.0  ;;  %3711 = vpow2.f32 %v1729_v29 }
0x10d2   :  { %v1708_v22 = vpop.xlane.xlu0 %1707 }
0x10d3   :  { %v1716_v32 = vsub.f32 %v1684_v30, %v1708_v22 }
0x10d5   :  { %v3710_v31 = vpop.eup %3709  ;;  %v1731_v34 = vmul.f32 1.442695, %v1716_v32 }
0x10d6   :  { %v1748_v33 = vsel %vm531_vm2, %v3710_v31, 0.0  ;;  %v3712_v36 = vpop.eup %3711 }
0x10d7   :  { %1740 = vadd.xlane.f32.xlu0 %v1739_v21  ;;  %3713 = vpow2.f32 %v1731_v34  ;;  %v1751_v37 = vsel %vm531_vm2, %v3712_v36, 0.0 }
0x10dd   :  { %v3714_v39 = vpop.eup %3713 }
0x10de   :  { %v1754_v38 = vsel %vm531_vm2, %v3714_v39, 0.0 }
0x10df   :  { %1746 = vadd.xlane.f32.xlu0 %v1745_v14 }
0x10e1   :  { %v1587_v27 = vpop.permute.xlu1 %1586 }
0x10e7   :  { %1749 = vadd.xlane.f32.xlu0 %v1748_v33 }
0x10ef   :  { %1752 = vadd.xlane.f32.xlu0 %v1751_v37 }
0x10f7   :  { %1755 = vadd.xlane.f32.xlu0 %v1754_v38 }
0x1120   :  { %1589 = vxpose.xlu0.b32.start.end [1/1] (short) (narrow) %v1587_v27, 8 }
0x113a   :  { %v1735_v20 = vpop.xlane.xlu0 %1734 }
0x113b   :  { %3715 = vrcp.f32 %v1735_v20 }
0x1141   :  { %v3716_v35 = vpop.eup %3715 }
0x1142   :  { %v1738_v40 = vpop.xlane.xlu0 %1737  ;;  %v1744_v48 = vpop.xlane.xlu1 %1743  ;;  %v1765_v54 = vmul.f32 %v3716_v35, %v4927_v58 }
0x1143   :  { %3717 = vrcp.f32 %v1744_v48 }
0x1149   :  { %v3718_v49 = vpop.eup %3717 }
0x114a   :  { %v1741_v41 = vpop.xlane.xlu0 %1740  ;;  %v1768_v53 = vmul.f32 %v3718_v49, %v3704_v2 }
0x1152   :  { %v1747_v45 = vpop.xlane.xlu0 %1746 }
0x115a   :  { %v1750_v47 = vpop.xlane.xlu0 %1749 }
0x1162   :  { %v1753_v15 = vpop.xlane.xlu0 %1752 }
0x1163   :  { %3719 = vrcp.f32 %v1753_v15 }
0x1164   :  { %3721 = vrcp.f32 %v1750_v47 }
0x1165   :  { %3723 = vrcp.f32 %v1738_v40 }
0x1166   :  { %3725 = vrcp.f32 %v1741_v41 }
0x1167   :  { %3727 = vrcp.f32 %v1747_v45 }
0x1169   :  { %v3720_v51 = vpop.eup %3719 }
0x116a   :  { %v1756_v30 = vpop.xlane.xlu0 %1755  ;;  %v1771_v42 = vmul.f32 %v3720_v51, %v3712_v36  ;;  %v3722_v57 = vpop.eup %3721 }
0x116b   :  { %v3724_v59 = vpop.eup %3723  ;;  %v1770_v3 = vmul.f32 %v3722_v57, %v3710_v31  ;;  %3729 = vrcp.f32 %v1756_v30  ;;  %v3653_v57 = vld [vmem:[#allocation24] ss:$0 sm:$0xff] }
0x116c   :  { %v1766_v2 = vmul.f32 %v3724_v59, %v4931_v1  ;;  %v3726_v9 = vpop.eup %3725 }
0x116d   :  { %v1767_v19 = vmul.f32 %v3726_v9, %v4936_v13  ;;  %v3728_v23 = vpop.eup %3727  ;;  %v4959_v13 = vld [vmem:[#allocation21] sm:$0xff] }
0x116e   :  { %v1769_v1 = vmul.f32 %v3728_v23, %v4940_v25  ;;  %1848 = vmatpush.msra.mxu1 %v4959_v13  ;;  %v4981_v9 = vld [vmem:[#allocation33] sm:$0xff] }
0x116f   :  { %1903 = vmatpush.msra.mxu2 %v4981_v9  ;;  %1955 = vmatpush.msrb.mxu0 %v4981_v9 }
0x1171   :  { %v3730_v14 = vpop.eup %3729 }
0x1172   :  { %v1772_v22 = vmul.f32 %v3730_v14, %v3714_v39  ;;  %v3657_v14 = vld [vmem:[#allocation35] ss:$0 sm:$0xff] }
0x11c4   :  { %v1605_v55 = vpop.trf.xlu0 }
0x11c5   :  { %v1779_v46 = vmul.f32 %v1771_v42, %v1605_v55  ;;  %v1776_v16 = vmul.f32 %v1768_v53, %v1605_v55  ;;  %v1773_v43 = vmul.f32 %v1765_v54, %v1605_v55  ;;  %v1778_v58 = vmul.f32 %v1770_v3, %v1605_v55 }
0x11c6   :  { %v1774_v4 = vmul.f32 %v1766_v2, %v1605_v55  ;;  %v1775_v21 = vmul.f32 %v1767_v19, %v1605_v55  ;;  %v1777_v5 = vmul.f32 %v1769_v1, %v1605_v55  ;;  %v1780_v31 = vmul.f32 %v1772_v22, %v1605_v55  ;;  %v4988_v1 = vld [vmem:[#allocation36] sm:$0xff] }
0x11c7   :  { %v1799_v60 = vsel %vm531_vm2, %v1779_v46, 0.0  ;;  %v1790_v63 = vsel %vm531_vm2, %v1776_v16, 0.0  ;;  %v1781_v0 = vsel %vm531_vm2, %v1773_v43, 0.0  ;;  %v1796_v10 = vsel %vm531_vm2, %v1778_v58, 0.0  ;;  %v3652_v46 = vld [vmem:[#allocation23] ss:$0 sm:$0xff]  ;;  %1932 = vmatpush.msra.mxu3 %v4988_v1  ;;  %1981 = vmatpush.msrb.mxu1 %v4988_v1 }
0x11c8   :  { %1800 = vadd.xlane.f32.xlu0 %v1799_v60  ;;  %1791 = vadd.xlane.f32.xlu2 %v1790_v63  ;;  %v1784_v18 = vsel %vm531_vm2, %v1774_v4, 0.0  ;;  %v1787_v24 = vsel %vm531_vm2, %v1775_v21, 0.0  ;;  %v1793_v29 = vsel %vm531_vm2, %v1777_v5, 0.0  ;;  %v1802_v32 = vsel %vm531_vm2, %v1780_v31, 0.0 }
0x11c9   :  { %1782 = vadd.xlane.f32.xlu1 %v1781_v0  ;;  %v3654_v0 = vld [vmem:[#allocation3] ss:$0 sm:$0xff] }
0x11d0   :  { %1797 = vadd.xlane.f32.xlu2 %v1796_v10  ;;  %v3655_v10 = vld [vmem:[%s5318_s11] ss:$0 sm:$0xff] }
0x11d1   :  { %1785 = vadd.xlane.f32.xlu1 %v1784_v18  ;;  %v3656_v18 = vld [vmem:[#allocation26] ss:$0 sm:$0xff] }
0x11d9   :  { %1788 = vadd.xlane.f32.xlu1 %v1787_v24 }
0x11e1   :  { %1794 = vadd.xlane.f32.xlu1 %v1793_v29 }
0x11e9   :  { %1803 = vadd.xlane.f32.xlu1 %v1802_v32 }
0x123b   :  { %v1792_v36 = vpop.xlane.xlu2 %1791  ;;  %v1801_v30 = vpop.xlane.xlu0 %1800 }
0x123c   :  { %v1783_v33 = vpop.xlane.xlu1 %1782  ;;  %v1819_v41 = vperm.slane %v1792_v36, %v4709_v7  ;;  %v1822_v51 = vperm.slane %v1801_v30, %v4709_v7 }
0x123d   :  { %v1816_v27 = vperm.slane %v1783_v33, %v4709_v7  ;;  %v5002_v33 = vld [vmem:[%s5308_s22 + $0x10] sm:$0xff] }
0x1243   :  { %v1798_v47 = vpop.xlane.xlu2 %1797 }
0x1244   :  { %v1786_v34 = vpop.xlane.xlu1 %1785  ;;  %v1821_v35 = vperm.slane %v1798_v47, %v4709_v7 }
0x1245   :  { %v1817_v25 = vperm.slane %v1786_v34, %v4709_v7  ;;  %v3658_v34 = vld [vmem:[#allocation38] ss:$0 sm:$0xff] }
0x1247   :  { %v1824_v39 = vsel %vm1119_vm7, %v1817_v25, %v1816_v27  ;;  %v2068_v27 = vld [vmem:[%s5308_s22] sm:$0xff] }
0x124c   :  { %v1789_v37 = vpop.xlane.xlu1 %1788 }
0x124d   :  { %v1818_v38 = vperm.slane %v1789_v37, %v4709_v7 }
0x124f   :  { %v1825_v20 = vsel %vm1121_vm8, %v1818_v38, %v1824_v39  ;;  %v3524_v38 = vld [vmem:[%s5308_s22 + $0x8] sm:$0xff] }
0x1250   :  { %v1826_v15 = vsel %vm1123_vm9, %v1819_v41, %v1825_v20  ;;  %2108 = vmatpush.msra.mxu0 %v3524_v38 }
0x1254   :  { %v1795_v40 = vpop.xlane.xlu1 %1794 }
0x1255   :  { %v1820_v45 = vperm.slane %v1795_v40, %v4709_v7 }
0x1257   :  { %v1827_v48 = vsel %vm1125_vm10, %v1820_v45, %v1826_v15 }
0x1258   :  { %v1828_v49 = vsel %vm1127_vm11, %v1821_v35, %v1827_v48 }
0x1259   :  { %v1829_v54 = vsel %vm1129_vm12, %v1822_v51, %v1828_v49  ;;  %v5019_v51 = vld [vmem:[%s5309_s26] ss:$0 sm:$0xff] }
0x125c   :  { %v1804_v42 = vpop.xlane.xlu1 %1803 }
0x125d   :  { %v1823_v53 = vperm.slane %v1804_v42, %v4709_v7 }
0x125f   :  { %v1830_v55 = vsel %vm1131_vm13, %v1823_v53, %v1829_v54  ;;  %v5023_v54 = vld [vmem:[%s5310_s28 + $0x10] sm:$0xff] }
0x1260   :  { %3516 = vmatmul.msk.f32.vlgmr.msra.gmra.mxu1 %vm531_vm2, %v1830_v55  ;;  %v3806_v55 = vld [vmem:[%s5313_s20] sm:$0xff] }
0x1261   :  { %2131 = vmatpush.msra.mxu1 %v2068_v27 }
0x12dd   :  { %v1850_v16 = vpop.f32.mrf.mxu1 }
0x12de   :  { %v1851_v43 = vadd.f32 %v3652_v46, %v1850_v16  ;;  %v5034_v46 = vld [vmem:[%s5310_s28] sm:$0xff]  ;;  %v5038_v16 = vld [vmem:[%s5310_s28 + $0x8] sm:$0xff] }
0x12e0   :  { %v1853_v59 = vadd.f32 %v1851_v43, %v4912_v62  ;;  %v3521_v62 = vld [vmem:[%s5307_s21 + $0x8] sm:$0xff] }
0x12e2   :  { %v1857_v60 = vmul.f32 %v3653_v57, %v1853_v59 }
0x12e4   :  { %v1858_v63 = vsel %vm531_vm2, %v1857_v60, 0.0 }
0x12e5   :  { %1859 = vadd.xlane.f32.xlu2 %v1858_v63 }
0x130e   :  { %2016 = vxpose.xlu2.b32.start.end [1/1] (short) (narrow) %v3521_v62, 8  ;;  %v5051_v62 = vld [vmem:[%s5312_s4] sm:$0xff] }
0x1358   :  { %v1860_v3 = vpop.xlane.xlu2 %1859 }
0x1359   :  { %v1864_v2 = vadd.f32 %v3654_v0, %v1860_v3  ;;  %v5046_v3 = vld [vmem:[%s5311_s14] ss:$0 sm:$0xff] }
0x135b   :  { %v1866_v58 = vmul.f32 0.01, %v1864_v2  ;;  %vm1865_vm4 = vcmp.gt.f32.partialorder %v1864_v2, 0.0 }
0x135d   :  { %v1867_v4 = vsel %vm1865_vm4, %v1864_v2, %v1866_v58 }
0x135e   :  { %1870 = vperm.xlu1 %3631, %v1867_v4  }
0x1366   :  { %3632 = vset.pattern.permute.xlu1 %v4705_v6 }
0x13a7   :  { %v4992_v5 = vpop.trf.xlu2 }
0x13a8   :  { %2063 = vmatpush.msrb.mxu2 %v4992_v5  ;;  %2084 = vmatpush.msrb.mxu3 %v4992_v5 }
0x13d0   :  { %v1871_v19 = vpop.permute.xlu1 %1870 }
0x13d1   :  { %v1876_v21 = vmul.f32 %v3655_v10, %v1871_v19 }
0x13d3   :  { %v1880_v23 = vadd.f32 %v3656_v18, %v1876_v21 }
0x13d5   :  { %v1881_v24 = vadd.f32 %v1880_v23, %v1853_v59 }
0x13d7   :  { %3517 = vmatmul.msk.f32.vlgmr.msra.gmra.mxu2 %vm531_vm2, %v1881_v24 }
0x13d8   :  { %2155 = vmatpush.msra.mxu2 %v5002_v33 }
0x13df   :  { %3522 = vmatmul.msk.f32.vlgmr.msrb.gmra.mxu2 %vm531_vm2, %v4715_v11 }
0x13e0   :  { %2246 = vmatpush.msrb.mxu2 %v5034_v46 }
0x13e7   :  { %3528 = vmatmul.msk.f32.vlgmr.msra.gmra.mxu2 %vm531_vm2, %v4992_v5 }
0x13e8   :  { %2664 = vmatpush.msra.mxu2 %v4857_v17 }
0x145a   :  { %v1905_v29 = vpop.f32.mrf.mxu2 }
0x145b   :  { %v1906_v22 = vadd.f32 %v3657_v14, %v1905_v29 }
0x145d   :  { %vm1908_vm5 = vcmp.gt.f32.partialorder %v1906_v22, 0.0  ;;  %v1909_v31 = vmul.f32 0.01, %v1906_v22 }
0x145f   :  { %v1910_v32 = vsel %vm1908_vm5, %v1906_v22, %v1909_v31 }
0x1460   :  { %3518 = vmatmul.msk.f32.vlgmr.msra.gmra.mxu3 %vm531_vm2, %v1910_v32 }
0x1462   :  { %v2065_v45 = vpop.f32.mrf.mxu2 }
0x1468   :  { %3523 = vmatmul.msk.f32.vlgmr.msrb.gmra.mxu3 %vm531_vm2, %v4717_v12 }
0x146a   :  { %v2157_v35 = vpop.f32.mrf.mxu2 }
0x14e3   :  { %v1934_v36 = vpop.f32.mrf.mxu3 }
0x14e4   :  { %v5007_v37 = vadd.f32 %v3658_v34, %v1934_v36 }
0x14e6   :  { %3519 = vmatmul.msk.f32.vlgmr.msrb.gmra.mxu0 %vm531_vm2, %v5007_v37 }
0x14eb   :  { %v2086_v25 = vpop.f32.mrf.mxu3 }
0x14ee   :  { %3525 = vmatmul.msk.f32.vlgmr.msra.gmra.mxu0 %vm531_vm2, %v2086_v25 }
0x1563   :  { %v1957_v39 = vpop.f32.mrf.mxu0 }
0x1564   :  { %v1958_v20 = vadd.f32 %v3657_v14, %v1957_v39 }
0x1566   :  { %vm1960_vm6 = vcmp.gt.f32.partialorder %v1958_v20, 0.0  ;;  %v1961_v40 = vmul.f32 0.01, %v1958_v20 }
0x1568   :  { %v1962_v41 = vsel %vm1960_vm6, %v1958_v20, %v1961_v40  ;;  %v3809_v40 = vld [vmem:[#allocation6] ss:$0 sm:$0xff] }
0x1569   :  { %3520 = vmatmul.msk.f32.vlgmr.msrb.gmra.mxu1 %vm531_vm2, %v1962_v41 }
0x156a   :  { %2223 = vmatpush.msrb.mxu1 %v5038_v16 }
0x156b   :  { %v2110_v15 = vpop.f32.mrf.mxu0 }
0x1571   :  { %3526 = vmatmul.msk.f32.vlgmr.msra.gmra.mxu1 %vm531_vm2, %v2065_v45  ;;  %v3810_v45 = vld [vmem:[#allocation9] ss:$0 sm:$0xff] }
0x1572   :  { %2624 = vmatpush.msra.mxu1 %v4832_v50 }
0x15e6   :  { %v5016_v47 = vpop.f32.mrf.mxu1 }
0x15ee   :  { %v2133_v48 = vpop.f32.mrf.mxu1 }
0x15ef   :  { %v2134_v30 = vadd.f32 %v2133_v48, %v2110_v15 }
0x15f1   :  { %v2160_v49 = vadd.f32 %v2157_v35, %v2134_v30  ;;  %v3811_v30 = vld [vmem:[#allocation11] ss:$0 sm:$0xff] }
0x15f3   :  { %v2161_v42 = vadd.f32 %v5019_v51, %v2160_v49 }
0x15f5   :  { %v2162_v53 = vmax.f32 %v2161_v42, 0.0 }
0x15f7   :  { %2178 = vmatpush.msra.mxu3 %v2162_v53  ;;  %2199 = vmatpush.msrb.mxu0 %v2162_v53 }
0x15f8   :  { %3529 = vmatmul.msk.f32.vlgmr.msra.gmra.mxu3 %vm531_vm2, %v4715_v11  ;;  %3530 = vmatmul.msk.f32.vlgmr.msrb.gmra.mxu0 %vm531_vm2, %v4717_v12 }
0x15f9   :  { %2270 = vmatpush.msrb.mxu3 %v5023_v54  ;;  %2324 = vmatpush.msra.mxu0 %v3806_v55 }
0x15fb   :  { %2690 = vmatpush.msra.mxu3 %v4862_v44 }
0x1600   :  { %3535 = vmatmul.msk.f32.vlgmr.msrb.gmra.mxu3 %vm531_vm2, %v2162_v53 }
0x1601   :  { %2792 = vmatpush.msrb.mxu3 %v2068_v27 }
0x1675   :  { %v2201_v43 = vpop.f32.mrf.mxu0 }
0x1676   :  { %3532 = vmatmul.msk.f32.vlgmr.msrb.gmra.mxu1 %vm531_vm2, %v2201_v43 }
0x167b   :  { %v2180_v44 = vpop.f32.mrf.mxu3 }
0x167c   :  { %3533 = vmatmul.msk.f32.vlgmr.msrb.gmra.mxu2 %vm531_vm2, %v2180_v44 }
0x167d   :  { %2769 = vmatpush.msrb.mxu2 %v3524_v38 }
0x1683   :  { %v2272_v63 = vpop.f32.mrf.mxu3 }
0x16f3   :  { %v2225_v57 = vpop.f32.mrf.mxu1 }
0x16ff   :  { %v2248_v59 = vpop.f32.mrf.mxu2 }
0x1700   :  { %v2249_v60 = vadd.f32 %v2248_v59, %v2225_v57 }
0x1702   :  { %v2275_v0 = vadd.f32 %v2272_v63, %v2249_v60 }
0x1704   :  { %v2276_v17 = vadd.f32 %v5046_v3, %v2275_v0 }
0x1706   :  { %v2277_v2 = vmax.f32 %v2276_v17, 0.0 }
0x1708   :  { %v2278_v50 = vadd.f32 %v2277_v2, %v4992_v5 }
0x170a   :  { %v2279_v58 = vmax.f32 %v2278_v50, 0.0 }
0x170c   :  { %v2280_v4 = vmul.f32 2.828427, %v2279_v58 }
0x170e   :  { %v2281_v10 = vadd.f32 %v5051_v62, %v2280_v4 }
0x1710   :  { %v2282_v18 = vsel %vm531_vm2, %v2281_v10, 0.0 }
0x1711   :  { %2283 = vadd.xlane.f32.xlu1 %v2282_v18 }
0x1784   :  { %v2284_v19 = vpop.xlane.xlu1 %2283 }
0x1785   :  { %v2285_v21 = vmul.f32 %v2284_v19, %v4776_v52 }
0x1787   :  { %v2286_v23 = vsub.f32 %v2281_v10, %v2285_v21 }
0x1789   :  { %v2287_v24 = vmul.f32 %v2286_v23, %v2286_v23 }
0x178b   :  { %v2288_v14 = vsel %vm531_vm2, %v2287_v24, 0.0 }
0x178c   :  { %2289 = vadd.xlane.f32.xlu2 %v2288_v14 }
0x17ff   :  { %v2290_v29 = vpop.xlane.xlu2 %2289 }
0x1800   :  { %v2291_v22 = vmul.f32 %v2290_v29, %v4776_v52 }
0x1802   :  { %v2292_v31 = vadd.f32 1e-05, %v2291_v22 }
0x1804   :  { %3731 = vrsqrt.f32 %v2292_v31  ;;  %vm2299_vm15 = vweird.f32 %v2292_v31 }
0x180a   :  { %v3732_v32 = vpop.eup %3731 }
0x180b   :  { %v2294_v34 = vmul.f32 %v3732_v32, %v2292_v31  ;;  %vm2300_vm14 = vweird.f32 %v3732_v32 }
0x180c   :  { %vm2301_vm0 = vmor %vm2299_vm15, %vm2300_vm14 }
0x180d   :  { %v2295_v36 = vmul.f32 %v3732_v32, %v2294_v34 }
0x180f   :  { %v2296_v25 = vmul.f32 0.5, %v2295_v36 }
0x1811   :  { %v2297_v38 = vsub.f32 1.5, %v2296_v25 }
0x1813   :  { %v2298_v27 = vmul.f32 %v3732_v32, %v2297_v38 }
0x1815   :  { %v2302_v39 = vsel %vm2301_vm0, %v3732_v32, %v2298_v27 }
0x1816   :  { %v2303_v20 = vmul.f32 %v2302_v39, %v2286_v23 }
0x1818   :  { %v2304_v41 = vmul.f32 %v3809_v40, %v2303_v20 }
0x181a   :  { %v5058_v15 = vadd.f32 %v3810_v45, %v2304_v41 }
0x181c   :  { %3536 = vmatmul.msk.f32.vlgmr.msra.gmra.mxu0 %vm531_vm2, %v5058_v15 }
0x1899   :  { %v2326_v48 = vpop.f32.mrf.mxu0 }
0x189a   :  { %v2327_v35 = vadd.f32 %v3811_v30, %v2326_v48 }
0x189c   :  { %2330 = vrot.lane.b32.xlu1 %v2327_v35, %s4443_s23  ;;  %v2414_v49 = vperm.slane %v2327_v35, 2  ;;  %v2400_v42 = vperm.slane %v2327_v35, 0  ;;  %v2442_v53 = vperm.slane %v2327_v35, 6  ;;  %v2407_v55 = vperm.slane %v2327_v35, 1 }
0x189d   :  { %v2421_v43 = vperm.slane %v2327_v35, 3  ;;  %v2428_v44 = vperm.slane %v2327_v35, 4  ;;  %v2435_v57 = vperm.slane %v2327_v35, 5  ;;  %v2449_v59 = vperm.slane %v2327_v35, 7 }
0x189e   :  { %2419 = vperm.xlu0 %3628, %v2414_v49  }
0x18a4   :  { %2405 = vperm.xlu1 %3632, %v2400_v42  }
0x18a6   :  { %2447 = vperm.xlu0 %3628, %v2442_v53  }
0x18ac   :  { %2412 = vperm.xlu1 %3632, %v2407_v55  }
0x18b4   :  { %2426 = vperm.xlu1 %3632, %v2421_v43  }
0x18bc   :  { %2433 = vperm.xlu1 %3632, %v2428_v44  }
0x18c4   :  { %2440 = vperm.xlu1 %3632, %v2435_v57  }
0x18cc   :  { %2454 = vperm.xlu1 %3632, %v2449_v59  }
0x18d4   :  { %3633 = vset.pattern.permute.xlu1 %v4445_v26 }
0x190e   :  { %v2331_v60 = vpop.permute.xlu1 %2330 }
0x190f   :  { %2333 = vxpose.xlu0.b32.start.end [1/1] (short) (narrow) %v2331_v60, 8 }
0x1910   :  { %v2420_v0 = vpop.permute.xlu0 %2419 }
0x1916   :  { %v2406_v63 = vpop.permute.xlu1 %2405 }
0x1918   :  { %v2448_v2 = vpop.permute.xlu0 %2447 }
0x191e   :  { %v2413_v17 = vpop.permute.xlu1 %2412 }
0x1926   :  { %v2427_v50 = vpop.permute.xlu1 %2426 }
0x192e   :  { %v2434_v29 = vpop.permute.xlu1 %2433 }
0x1936   :  { %v2441_v36 = vpop.permute.xlu1 %2440 }
0x193e   :  { %v2455_v27 = vpop.permute.xlu1 %2454 }
0x19b3   :  { %v2349_v58 = vpop.trf.xlu0 }
0x19b4   :  { %v2456_v4 = vmul.f32 %v2406_v63, %v2349_v58  ;;  %v2457_v10 = vmul.f32 %v2413_v17, %v2349_v58  ;;  %v2459_v18 = vmul.f32 %v2427_v50, %v2349_v58  ;;  %v2462_v24 = vmul.f32 %v2448_v2, %v2349_v58 }
0x19b5   :  { %v2458_v14 = vmul.f32 %v2420_v0, %v2349_v58  ;;  %v2460_v32 = vmul.f32 %v2434_v29, %v2349_v58  ;;  %v2461_v25 = vmul.f32 %v2441_v36, %v2349_v58  ;;  %v2463_v39 = vmul.f32 %v2455_v27, %v2349_v58 }
0x19b6   :  { %v2464_v19 = vsel %vm531_vm2, %v2456_v4, -inf  ;;  %v2467_v21 = vsel %vm531_vm2, %v2457_v10, -inf  ;;  %v2473_v23 = vsel %vm531_vm2, %v2459_v18, -inf  ;;  %v2482_v22 = vsel %vm531_vm2, %v2462_v24, -inf }
0x19b7   :  { %2465 = vmax.xlane.f32.xlu1 %v2464_v19  ;;  %2468 = vmax.xlane.f32.xlu2 %v2467_v21  ;;  %v2470_v31 = vsel %vm531_vm2, %v2458_v14, -inf  ;;  %v2476_v34 = vsel %vm531_vm2, %v2460_v32, -inf  ;;  %v2479_v38 = vsel %vm531_vm2, %v2461_v25, -inf  ;;  %v2485_v20 = vsel %vm531_vm2, %v2463_v39, -inf }
0x19b8   :  { %2474 = vmax.xlane.f32.xlu0 %v2473_v23 }
0x19bf   :  { %2483 = vmax.xlane.f32.xlu1 %v2482_v22  ;;  %2471 = vmax.xlane.f32.xlu2 %v2470_v31 }
0x19c7   :  { %2477 = vmax.xlane.f32.xlu2 %v2476_v34 }
0x19cf   :  { %2480 = vmax.xlane.f32.xlu2 %v2479_v38 }
0x19d7   :  { %2486 = vmax.xlane.f32.xlu2 %v2485_v20 }
0x19d8   :  { %2365 = vrot.lane.b32.xlu1 %v2327_v35, %s4444_s2 }
0x1a2a   :  { %v2469_v40 = vpop.xlane.xlu2 %2468  ;;  %v2466_v41 = vpop.xlane.xlu1 %2465 }
0x1a2b   :  { %v2475_v45 = vpop.xlane.xlu0 %2474  ;;  %v2488_v48 = vsub.f32 %v2456_v4, %v2466_v41  ;;  %v2489_v53 = vsub.f32 %v2457_v10, %v2469_v40 }
0x1a2c   :  { %v2491_v30 = vsub.f32 %v2459_v18, %v2475_v45 }
0x1a2d   :  { %v2496_v49 = vmul.f32 1.442695, %v2488_v48  ;;  %v2498_v43 = vmul.f32 1.442695, %v2489_v53 }
0x1a2e   :  { %v2502_v42 = vmul.f32 1.442695, %v2491_v30 }
0x1a30   :  { %3733 = vpow2.f32 %v2502_v42 }
0x1a31   :  { %3735 = vpow2.f32 %v2496_v49 }
0x1a32   :  { %v2472_v55 = vpop.xlane.xlu2 %2471  ;;  %3737 = vpow2.f32 %v2498_v43  ;;  %v2484_v23 = vpop.xlane.xlu1 %2483 }
0x1a33   :  { %v2490_v59 = vsub.f32 %v2458_v14, %v2472_v55  ;;  %v2494_v29 = vsub.f32 %v2462_v24, %v2484_v23 }
0x1a35   :  { %v2500_v0 = vmul.f32 1.442695, %v2490_v59  ;;  %v2508_v31 = vmul.f32 1.442695, %v2494_v29 }
0x1a36   :  { %v5073_v44 = vpop.eup %3733 }
0x1a37   :  { %v3736_v57 = vpop.eup %3735  ;;  %v2521_v35 = vsel %vm531_vm2, %v5073_v44, 0.0  ;;  %3739 = vpow2.f32 %v2500_v0 }
0x1a38   :  { %2522 = vadd.xlane.f32.xlu1 %v2521_v35  ;;  %v2512_v60 = vsel %vm531_vm2, %v3736_v57, 0.0  ;;  %v5078_v17 = vpop.eup %3737 }
0x1a39   :  { %2513 = vadd.xlane.f32.xlu2 %v2512_v60  ;;  %v2515_v50 = vsel %vm531_vm2, %v5078_v17, 0.0 }
0x1a3a   :  { %v2478_v63 = vpop.xlane.xlu2 %2477 }
0x1a3b   :  { %v2492_v2 = vsub.f32 %v2460_v32, %v2478_v63 }
0x1a3d   :  { %v2504_v58 = vmul.f32 1.442695, %v2492_v2  ;;  %v5082_v10 = vpop.eup %3739 }
0x1a3e   :  { %v2518_v19 = vsel %vm531_vm2, %v5082_v10, 0.0 }
0x1a3f   :  { %3741 = vpow2.f32 %v2504_v58 }
0x1a41   :  { %2516 = vadd.xlane.f32.xlu2 %v2515_v50 }
0x1a42   :  { %v2481_v4 = vpop.xlane.xlu2 %2480 }
0x1a43   :  { %v2493_v18 = vsub.f32 %v2461_v25, %v2481_v4 }
0x1a45   :  { %v2506_v21 = vmul.f32 1.442695, %v2493_v18  ;;  %v5086_v14 = vpop.eup %3741 }
0x1a46   :  { %v2524_v22 = vsel %vm531_vm2, %v5086_v14, 0.0 }
0x1a47   :  { %3743 = vpow2.f32 %v2506_v21 }
0x1a48   :  { %3745 = vpow2.f32 %v2508_v31 }
0x1a49   :  { %2519 = vadd.xlane.f32.xlu2 %v2518_v19 }
0x1a4a   :  { %v2487_v32 = vpop.xlane.xlu2 %2486  ;;  %v2366_v41 = vpop.permute.xlu1 %2365 }
0x1a4b   :  { %v2495_v36 = vsub.f32 %v2463_v39, %v2487_v32 }
0x1a4d   :  { %v3744_v34 = vpop.eup %3743  ;;  %v2510_v38 = vmul.f32 1.442695, %v2495_v36 }
0x1a4e   :  { %v2527_v25 = vsel %vm531_vm2, %v3744_v34, 0.0  ;;  %v3746_v27 = vpop.eup %3745 }
0x1a4f   :  { %3747 = vpow2.f32 %v2510_v38  ;;  %v2530_v20 = vsel %vm531_vm2, %v3746_v27, 0.0 }
0x1a51   :  { %2525 = vadd.xlane.f32.xlu2 %v2524_v22 }
0x1a55   :  { %v3748_v24 = vpop.eup %3747 }
0x1a56   :  { %v2533_v40 = vsel %vm531_vm2, %v3748_v24, 0.0 }
0x1a59   :  { %2528 = vadd.xlane.f32.xlu2 %v2527_v25 }
0x1a61   :  { %2531 = vadd.xlane.f32.xlu2 %v2530_v20 }
0x1a69   :  { %2534 = vadd.xlane.f32.xlu2 %v2533_v40 }
0x1a92   :  { %2368 = vxpose.xlu2.b32.start.end [1/1] (short) (narrow) %v2366_v41, 8 }
0x1aab   :  { %v2523_v53 = vpop.xlane.xlu1 %2522 }
0x1aac   :  { %v2514_v45 = vpop.xlane.xlu2 %2513  ;;  %3749 = vrcp.f32 %v2523_v53 }
0x1aad   :  { %3751 = vrcp.f32 %v2514_v45 }
0x1ab2   :  { %v3750_v43 = vpop.eup %3749 }
0x1ab3   :  { %v3752_v59 = vpop.eup %3751  ;;  %v2547_v0 = vmul.f32 %v3750_v43, %v5073_v44 }
0x1ab4   :  { %v2517_v48 = vpop.xlane.xlu2 %2516  ;;  %v2544_v63 = vmul.f32 %v3752_v59, %v3736_v57 }
0x1abc   :  { %v2520_v30 = vpop.xlane.xlu2 %2519 }
0x1ac4   :  { %v2526_v49 = vpop.xlane.xlu2 %2525 }
0x1acc   :  { %v2529_v39 = vpop.xlane.xlu2 %2528 }
0x1ad4   :  { %v2532_v42 = vpop.xlane.xlu2 %2531 }
0x1adc   :  { %v2535_v55 = vpop.xlane.xlu2 %2534 }
0x1add   :  { %3753 = vrcp.f32 %v2535_v55 }
0x1ade   :  { %3755 = vrcp.f32 %v2517_v48 }
0x1adf   :  { %3757 = vrcp.f32 %v2529_v39 }
0x1ae0   :  { %3759 = vrcp.f32 %v2520_v30 }
0x1ae1   :  { %3761 = vrcp.f32 %v2526_v49 }
0x1ae2   :  { %3763 = vrcp.f32 %v2532_v42 }
0x1ae3   :  { %v3754_v35 = vpop.eup %3753 }
0x1ae4   :  { %v2551_v60 = vmul.f32 %v3754_v35, %v3748_v24  ;;  %v3756_v18 = vpop.eup %3755 }
0x1ae5   :  { %v3758_v19 = vpop.eup %3757  ;;  %v2545_v57 = vmul.f32 %v3756_v18, %v5078_v17 }
0x1ae6   :  { %v2549_v22 = vmul.f32 %v3758_v19, %v3744_v34  ;;  %v3760_v32 = vpop.eup %3759 }
0x1ae7   :  { %v2546_v38 = vmul.f32 %v3760_v32, %v5082_v10  ;;  %v3762_v24 = vpop.eup %3761 }
0x1ae8   :  { %v2548_v17 = vmul.f32 %v3762_v24, %v5086_v14  ;;  %v3764_v41 = vpop.eup %3763  ;;  %v3814_v24 = vld [vmem:[#allocation2] ss:$0 sm:$0xff] }
0x1ae9   :  { %v2550_v48 = vmul.f32 %v3764_v41, %v3746_v27 }
0x1b2b   :  { %v2384_v2 = vpop.trf.xlu2 }
0x1b2c   :  { %v2559_v50 = vmul.f32 %v2551_v60, %v2384_v2  ;;  %v2552_v58 = vmul.f32 %v2544_v63, %v2384_v2  ;;  %v2555_v4 = vmul.f32 %v2547_v0, %v2384_v2  ;;  %v2553_v44 = vmul.f32 %v2545_v57, %v2384_v2 }
0x1b2d   :  { %v2557_v31 = vmul.f32 %v2549_v22, %v2384_v2  ;;  %v2554_v20 = vmul.f32 %v2546_v38, %v2384_v2  ;;  %v2556_v34 = vmul.f32 %v2548_v17, %v2384_v2  ;;  %v2558_v30 = vmul.f32 %v2550_v48, %v2384_v2 }
0x1b2e   :  { %v2581_v21 = vsel %vm531_vm2, %v2559_v50, 0.0  ;;  %v2560_v23 = vsel %vm531_vm2, %v2552_v58, 0.0  ;;  %v2569_v29 = vsel %vm531_vm2, %v2555_v4, 0.0  ;;  %v2563_v36 = vsel %vm531_vm2, %v2553_v44, 0.0  ;;  %v3812_v44 = vld [vmem:[#allocation14] ss:$0 sm:$0xff] }
0x1b2f   :  { %2582 = vadd.xlane.f32.xlu2 %v2581_v21  ;;  %2561 = vadd.xlane.f32.xlu1 %v2560_v23  ;;  %v2575_v25 = vsel %vm531_vm2, %v2557_v31, 0.0  ;;  %v2566_v40 = vsel %vm531_vm2, %v2554_v20, 0.0  ;;  %v2572_v45 = vsel %vm531_vm2, %v2556_v34, 0.0  ;;  %v2578_v49 = vsel %vm531_vm2, %v2558_v30, 0.0  ;;  %v3816_v30 = vld [vmem:[#allocation18] ss:$0 sm:$0xff] }
0x1b30   :  { %2570 = vadd.xlane.f32.xlu0 %v2569_v29 }
0x1b37   :  { %2564 = vadd.xlane.f32.xlu1 %v2563_v36  ;;  %v3813_v36 = vld [vmem:[#allocation15] ss:$0 sm:$0xff] }
0x1b38   :  { %2576 = vadd.xlane.f32.xlu0 %v2575_v25 }
0x1b3f   :  { %2567 = vadd.xlane.f32.xlu1 %v2566_v40 }
0x1b47   :  { %2573 = vadd.xlane.f32.xlu1 %v2572_v45  ;;  %v3815_v45 = vld [vmem:[#allocation17] ss:$0 sm:$0xff] }
0x1b4f   :  { %2579 = vadd.xlane.f32.xlu1 %v2578_v49 }
0x1ba2   :  { %v2562_v39 = vpop.xlane.xlu1 %2561  ;;  %v2583_v50 = vpop.xlane.xlu2 %2582 }
0x1ba3   :  { %v2571_v55 = vpop.xlane.xlu0 %2570  ;;  %v2592_v14 = vperm.slane %v2562_v39, %v4709_v7  ;;  %v2599_v21 = vperm.slane %v2583_v50, %v4709_v7 }
0x1ba4   :  { %v2595_v63 = vperm.slane %v2571_v55, %v4709_v7 }
0x1baa   :  { %v2565_v10 = vpop.xlane.xlu1 %2564 }
0x1bab   :  { %v2593_v43 = vperm.slane %v2565_v10, %v4709_v7  ;;  %v2577_v0 = vpop.xlane.xlu0 %2576  ;;  %v3817_v10 = vld [vmem:[#allocation29] ss:$0 sm:$0xff] }
0x1bac   :  { %v2597_v4 = vperm.slane %v2577_v0, %v4709_v7 }
0x1bad   :  { %v2600_v35 = vsel %vm1119_vm7, %v2593_v43, %v2592_v14 }
0x1bb2   :  { %v2568_v53 = vpop.xlane.xlu1 %2567 }
0x1bb3   :  { %v2594_v42 = vperm.slane %v2568_v53, %v4709_v7 }
0x1bb5   :  { %v2601_v60 = vsel %vm1121_vm8, %v2594_v42, %v2600_v35 }
0x1bb6   :  { %v2602_v2 = vsel %vm1123_vm9, %v2595_v63, %v2601_v60 }
0x1bba   :  { %v2574_v59 = vpop.xlane.xlu1 %2573 }
0x1bbb   :  { %v2596_v27 = vperm.slane %v2574_v59, %v4709_v7 }
0x1bbd   :  { %v2603_v58 = vsel %vm1125_vm10, %v2596_v27, %v2602_v2 }
0x1bbe   :  { %v2604_v23 = vsel %vm1127_vm11, %v2597_v4, %v2603_v58 }
0x1bc2   :  { %v2580_v18 = vpop.xlane.xlu1 %2579 }
0x1bc3   :  { %v2598_v19 = vperm.slane %v2580_v18, %v4709_v7 }
0x1bc5   :  { %v2605_v29 = vsel %vm1129_vm12, %v2598_v19, %v2604_v23 }
0x1bc6   :  { %v2606_v57 = vsel %vm1131_vm13, %v2599_v21, %v2605_v29 }
0x1bc7   :  { %3537 = vmatmul.msk.f32.vlgmr.msra.gmra.mxu1 %vm531_vm2, %v2606_v57 }
0x1c44   :  { %v2626_v22 = vpop.f32.mrf.mxu1 }
0x1c45   :  { %v2627_v31 = vadd.f32 %v3812_v44, %v2626_v22 }
0x1c47   :  { %v2629_v32 = vadd.f32 %v2627_v31, %v5058_v15  ;;  %v3819_v31 = vld [vmem:[%s5315_s10] sm:$0xff] }
0x1c49   :  { %v2630_v25 = vmul.f32 %v3813_v36, %v2629_v32 }
0x1c4b   :  { %v2631_v38 = vsel %vm531_vm2, %v2630_v25, 0.0 }
0x1c4c   :  { %2632 = vadd.xlane.f32.xlu0 %v2631_v38 }
0x1cbf   :  { %v2633_v20 = vpop.xlane.xlu0 %2632 }
0x1cc0   :  { %v2634_v40 = vadd.f32 %v3814_v24, %v2633_v20 }
0x1cc2   :  { %vm2635_vm1 = vcmp.gt.f32.partialorder %v2634_v40, 0.0  ;;  %v2636_v17 = vmul.f32 0.01, %v2634_v40 }
0x1cc4   :  { %v2637_v34 = vsel %vm2635_vm1, %v2634_v40, %v2636_v17 }
0x1cc5   :  { %2640 = vperm.xlu1 %3633, %v2637_v34  }
0x1ccd   :  { %3634 = vset.pattern.permute.xlu1 %v4705_v6  ;;  %v3818_v6 = vld [vmem:[#allocation32] ss:$0 sm:$0xff] }
0x1d37   :  { %v2641_v41 = vpop.permute.xlu1 %2640 }
0x1d38   :  { %v2643_v48 = vmul.f32 %v3815_v45, %v2641_v41 }
0x1d3a   :  { %v2644_v49 = vadd.f32 %v3816_v30, %v2643_v48 }
0x1d3c   :  { %v2645_v15 = vadd.f32 %v2644_v49, %v2629_v32 }
0x1d3e   :  { %3538 = vmatmul.msk.f32.vlgmr.msra.gmra.mxu2 %vm531_vm2, %v2645_v15 }
0x1dc1   :  { %v2666_v39 = vpop.f32.mrf.mxu2 }
0x1dc2   :  { %v2667_v53 = vadd.f32 %v3817_v10, %v2666_v39 }
0x1dc4   :  { %vm2669_vm3 = vcmp.gt.f32.partialorder %v2667_v53, 0.0  ;;  %v2670_v55 = vmul.f32 0.01, %v2667_v53 }
0x1dc6   :  { %v2671_v43 = vsel %vm2669_vm3, %v2667_v53, %v2670_v55 }
0x1dc7   :  { %3539 = vmatmul.msk.f32.vlgmr.msra.gmra.mxu3 %vm531_vm2, %v2671_v43 }
0x1dc8   :  { %2881 = vmatpush.msra.mxu3 %v5038_v16 }
0x1e4a   :  { %v2692_v42 = vpop.f32.mrf.mxu3 }
0x1e4b   :  { %v2693_v14 = vadd.f32 %v3818_v6, %v2692_v42  ;;  %v3820_v6 = vld [vmem:[%s5316_s24] ss:$0 sm:$0xff] }
0x1e4d   :  { %v2695_v59 = vadd.f32 %v2693_v14, %v2645_v15 }
0x1e4f   :  { %v2696_v35 = vadd.f32 %v2695_v59, %v4992_v5  ;;  %v3821_v59 = vld [vmem:[%s5317_s27] ss:$0 sm:$0xff] }
0x1e51   :  { %v2697_v60 = vmul.f32 %v2696_v35, %v4871_v56 }
0x1e53   :  { %v2698_v27 = vsel %vm531_vm2, %v2697_v60, 0.0  ;;  %v3822_v60 = vld [vmem:[#allocation20] ss:$0 sm:$0xff] }
0x1e54   :  { %v2699_v63 = vrot.slane %v2698_v27, 4 }
0x1e56   :  { %v2700_v0 = vadd.f32 %v2699_v63, %v2698_v27 }
0x1e58   :  { %v2701_v2 = vrot.slane %v2700_v0, 2 }
0x1e5a   :  { %v2702_v50 = vadd.f32 %v2701_v2, %v2700_v0 }
0x1e5c   :  { %v2703_v58 = vrot.slane %v2702_v50, 1 }
0x1e5e   :  { %v2704_v4 = vadd.f32 %v2703_v58, %v2702_v50 }
0x1e60   :  { %v2705_v18 = vadd.f32 %v2704_v4, %v1259_v28 }
0x1e62   :  { %v2706_v16 = vmul.f32 0.5, %v2705_v18 }
0x1e64   :  { %3765 = vtanh.f32 %v2706_v16 }
0x1e6a   :  { %v3766_v19 = vpop.eup %3765 }
0x1e6b   :  { %v2708_v21 = vadd.f32 1.0, %v3766_v19 }
0x1e6d   :  { %v5132_v23 = vmul.f32 0.5, %v2708_v21 }
0x1e6f   :  { %v2710_v56 = vadd.f32 %v5132_v23, %v4992_v5 }
0x1e71   :  { %2726 = vmatpush.msrb.mxu0 %v2710_v56  ;;  %2746 = vmatpush.msrb.mxu1 %v2710_v56 }
0x1e72   :  { %3540 = vmatmul.msk.f32.vlgmr.msrb.gmra.mxu0 %vm531_vm2, %v4715_v11  ;;  %3541 = vmatmul.msk.f32.vlgmr.msrb.gmra.mxu1 %vm531_vm2, %v4717_v12 }
0x1e73   :  { %2815 = vmatpush.msra.mxu0 %v5002_v33 }
0x1e75   :  { %2904 = vmatpush.msrb.mxu0 %v5034_v46 }
0x1e7a   :  { %3544 = vmatmul.msk.f32.vlgmr.msra.gmra.mxu0 %vm531_vm2, %v2710_v56 }
0x1e7b   :  { %3321 = vmatpush.msra.mxu0 %v4981_v9 }
0x1eef   :  { %v2728_v61 = vpop.f32.mrf.mxu0  ;;  %v2748_v28 = vpop.f32.mrf.mxu1 }
0x1ef0   :  { %3542 = vmatmul.msk.f32.vlgmr.msrb.gmra.mxu2 %vm531_vm2, %v2748_v28  ;;  %3543 = vmatmul.msk.f32.vlgmr.msrb.gmra.mxu3 %vm531_vm2, %v2728_v61 }
0x1ef1   :  { %3281 = vmatpush.msrb.mxu3 %v4959_v13 }
0x1ef7   :  { %v2817_v22 = vpop.f32.mrf.mxu0 }
0x1f73   :  { %v2771_v5 = vpop.f32.mrf.mxu2  ;;  %v2794_v29 = vpop.f32.mrf.mxu3 }
0x1f74   :  { %v2795_v57 = vadd.f32 %v2794_v29, %v2771_v5 }
0x1f76   :  { %v2820_v33 = vadd.f32 %v2817_v22, %v2795_v57 }
0x1f78   :  { %v2821_v46 = vadd.f32 %v5019_v51, %v2820_v33 }
0x1f7a   :  { %v2822_v44 = vmax.f32 %v2821_v46, 0.0 }
0x1f7c   :  { %2838 = vmatpush.msra.mxu1 %v2822_v44  ;;  %2858 = vmatpush.msra.mxu2 %v2822_v44 }
0x1f7d   :  { %3545 = vmatmul.msk.f32.vlgmr.msra.gmra.mxu1 %vm531_vm2, %v4715_v11  ;;  %3546 = vmatmul.msk.f32.vlgmr.msra.gmra.mxu2 %vm531_vm2, %v4717_v12 }
0x1f7e   :  { %2927 = vmatpush.msrb.mxu1 %v5023_v54  ;;  %2981 = vmatpush.msrb.mxu2 %v3819_v31 }
0x1f80   :  { %3347 = vmatpush.msra.mxu1 %v4988_v1  ;;  %3370 = vmatpush.msra.mxu2 %v4981_v9 }
0x1f85   :  { %3549 = vmatmul.msk.f32.vlgmr.msrb.gmra.mxu1 %vm531_vm2, %v2822_v44 }
0x1ffa   :  { %v2840_v13 = vpop.f32.mrf.mxu1 }
0x1ffb   :  { %3548 = vmatmul.msk.f32.vlgmr.msrb.gmra.mxu0 %vm531_vm2, %v2840_v13 }
0x2000   :  { %v2860_v51 = vpop.f32.mrf.mxu2 }
0x2001   :  { %3547 = vmatmul.msk.f32.vlgmr.msra.gmra.mxu3 %vm531_vm2, %v2860_v51 }
0x2002   :  { %3396 = vmatpush.msra.mxu3 %v4988_v1  ;;  %v2929_v54 = vpop.f32.mrf.mxu1 }
0x2078   :  { %v2906_v11 = vpop.f32.mrf.mxu0 }
0x2084   :  { %v2883_v12 = vpop.f32.mrf.mxu3 }
0x2085   :  { %v2907_v32 = vadd.f32 %v2906_v11, %v2883_v12 }
0x2087   :  { %v2932_v36 = vadd.f32 %v2929_v54, %v2907_v32 }
0x2089   :  { %v2933_v25 = vadd.f32 %v5046_v3, %v2932_v36 }
0x208b   :  { %v2934_v38 = vmax.f32 %v2933_v25, 0.0 }
0x208d   :  { %v2935_v20 = vadd.f32 %v2934_v38, %v2710_v56 }
0x208f   :  { %v2936_v9 = vmax.f32 %v2935_v20, 0.0 }
0x2091   :  { %v2937_v24 = vmul.f32 2.828427, %v2936_v9 }
0x2093   :  { %v2938_v40 = vadd.f32 %v5051_v62, %v2937_v24 }
0x2095   :  { %v2939_v17 = vsel %vm531_vm2, %v2938_v40, 0.0 }
0x2096   :  { %2940 = vadd.xlane.f32.xlu0 %v2939_v17 }
0x2109   :  { %v2941_v34 = vpop.xlane.xlu0 %2940 }
0x210a   :  { %v2942_v41 = vmul.f32 %v2941_v34, %v4776_v52 }
0x210c   :  { %v2943_v1 = vsub.f32 %v2938_v40, %v2942_v41 }
0x210e   :  { %v2944_v45 = vmul.f32 %v2943_v1, %v2943_v1 }
0x2110   :  { %v2945_v48 = vsel %vm531_vm2, %v2944_v45, 0.0 }
0x2111   :  { %2946 = vadd.xlane.f32.xlu0 %v2945_v48 }
0x2184   :  { %v2947_v30 = vpop.xlane.xlu0 %2946 }
0x2185   :  { %v2948_v3 = vmul.f32 %v2947_v30, %v4776_v52 }
0x2187   :  { %v2949_v49 = vadd.f32 1e-05, %v2948_v3 }
0x2189   :  { %3767 = vrsqrt.f32 %v2949_v49  ;;  %vm2956_vm5 = vweird.f32 %v2949_v49 }
0x218f   :  { %v3768_v15 = vpop.eup %3767 }
0x2190   :  { %v2951_v62 = vmul.f32 %v3768_v15, %v2949_v49  ;;  %vm2957_vm4 = vweird.f32 %v3768_v15 }
0x2191   :  { %vm2958_vm6 = vmor %vm2956_vm5, %vm2957_vm4 }
0x2192   :  { %v2952_v39 = vmul.f32 %v3768_v15, %v2951_v62 }
0x2194   :  { %v2953_v10 = vmul.f32 0.5, %v2952_v39 }
0x2196   :  { %v2954_v53 = vsub.f32 1.5, %v2953_v10 }
0x2198   :  { %v2955_v55 = vmul.f32 %v3768_v15, %v2954_v53 }
0x219a   :  { %v2959_v43 = vsel %vm2958_vm6, %v3768_v15, %v2955_v55 }
0x219b   :  { %v2960_v42 = vmul.f32 %v2959_v43, %v2943_v1 }
0x219d   :  { %v2961_v14 = vmul.f32 %v3820_v6, %v2960_v42 }
0x219f   :  { %v5168_v35 = vadd.f32 %v3821_v59, %v2961_v14 }
0x21a1   :  { %3550 = vmatmul.msk.f32.vlgmr.msrb.gmra.mxu2 %vm531_vm2, %v5168_v35 }
0x2224   :  { %v2983_v52 = vpop.f32.mrf.mxu2 }
0x2225   :  { %v2984_v27 = vadd.f32 %v3822_v60, %v2983_v52 }
0x2227   :  { %2987 = vrot.lane.b32.xlu0 %v2984_v27, %s4443_s23  ;;  %v3057_v63 = vperm.slane %v2984_v27, 0  ;;  %v3078_v0 = vperm.slane %v2984_v27, 3  ;;  %v3064_v2 = vperm.slane %v2984_v27, 1  ;;  %v3092_v50 = vperm.slane %v2984_v27, 5 }
0x2228   :  { %v3071_v58 = vperm.slane %v2984_v27, 2  ;;  %v3106_v4 = vperm.slane %v2984_v27, 7  ;;  %v3085_v18 = vperm.slane %v2984_v27, 4  ;;  %v3099_v16 = vperm.slane %v2984_v27, 6 }
0x2229   :  { %3062 = vperm.xlu1 %3634, %v3057_v63  }
0x222f   :  { %3083 = vperm.xlu0 %3628, %v3078_v0  }
0x2231   :  { %3069 = vperm.xlu1 %3634, %v3064_v2  }
0x2237   :  { %3097 = vperm.xlu0 %3628, %v3092_v50  }
0x2239   :  { %3076 = vperm.xlu1 %3634, %v3071_v58  }
0x223f   :  { %3111 = vperm.xlu0 %3628, %v3106_v4  }
0x2241   :  { %3090 = vperm.xlu1 %3634, %v3085_v18  }
0x2247   :  { %3635 = vset.pattern.permute.xlu0 %v4445_v26 }
0x2249   :  { %3104 = vperm.xlu1 %3634, %v3099_v16  }
0x2299   :  { %v2988_v19 = vpop.permute.xlu0 %2987 }
0x229a   :  { %2990 = vxpose.xlu1.b32.start.end [1/1] (short) (narrow) %v2988_v19, 8 }
0x229b   :  { %v3063_v21 = vpop.permute.xlu1 %3062 }
0x22a1   :  { %v3084_v29 = vpop.permute.xlu0 %3083 }
0x22a3   :  { %v3070_v56 = vpop.permute.xlu1 %3069 }
0x22a9   :  { %v3098_v51 = vpop.permute.xlu0 %3097 }
0x22ab   :  { %v3077_v61 = vpop.permute.xlu1 %3076 }
0x22b1   :  { %v3112_v54 = vpop.permute.xlu0 %3111 }
0x22b3   :  { %v3091_v28 = vpop.permute.xlu1 %3090 }
0x22bb   :  { %v3105_v5 = vpop.permute.xlu1 %3104 }
0x22ed   :  { %3636 = vset.pattern.permute.xlu1 %v4445_v26 }
0x233e   :  { %v3006_v57 = vpop.trf.xlu1 }
0x233f   :  { %v3117_v22 = vmul.f32 %v3091_v28, %v3006_v57  ;;  %v3115_v33 = vmul.f32 %v3077_v61, %v3006_v57  ;;  %v3113_v46 = vmul.f32 %v3063_v21, %v3006_v57  ;;  %v3118_v26 = vmul.f32 %v3098_v51, %v3006_v57 }
0x2340   :  { %v3114_v11 = vmul.f32 %v3070_v56, %v3006_v57  ;;  %v3120_v36 = vmul.f32 %v3112_v54, %v3006_v57  ;;  %v3116_v25 = vmul.f32 %v3084_v29, %v3006_v57  ;;  %v3119_v9 = vmul.f32 %v3105_v5, %v3006_v57 }
0x2341   :  { %v3133_v44 = vsel %vm531_vm2, %v3117_v22, -inf  ;;  %v3127_v31 = vsel %vm531_vm2, %v3115_v33, -inf  ;;  %v3121_v13 = vsel %vm531_vm2, %v3113_v46, -inf  ;;  %v3136_v12 = vsel %vm531_vm2, %v3118_v26, -inf }
0x2342   :  { %3134 = vmax.xlane.f32.xlu1 %v3133_v44  ;;  %3128 = vmax.xlane.f32.xlu2 %v3127_v31  ;;  %v3124_v32 = vsel %vm531_vm2, %v3114_v11, -inf  ;;  %v3142_v38 = vsel %vm531_vm2, %v3120_v36, -inf  ;;  %v3130_v20 = vsel %vm531_vm2, %v3116_v25, -inf  ;;  %v3139_v24 = vsel %vm531_vm2, %v3119_v9, -inf }
0x2343   :  { %3122 = vmax.xlane.f32.xlu0 %v3121_v13 }
0x234a   :  { %3137 = vmax.xlane.f32.xlu2 %v3136_v12 }
0x234b   :  { %3125 = vmax.xlane.f32.xlu0 %v3124_v32 }
0x2352   :  { %3143 = vmax.xlane.f32.xlu2 %v3142_v38 }
0x2353   :  { %3131 = vmax.xlane.f32.xlu0 %v3130_v20 }
0x235b   :  { %3140 = vmax.xlane.f32.xlu0 %v3139_v24 }
0x236f   :  { %3022 = vrot.lane.b32.xlu0 %v2984_v27, %s4444_s2 }
0x23b5   :  { %v3129_v1 = vpop.xlane.xlu2 %3128  ;;  %v3135_v39 = vpop.xlane.xlu1 %3134 }
0x23b6   :  { %v3123_v40 = vpop.xlane.xlu0 %3122  ;;  %v3147_v3 = vsub.f32 %v3115_v33, %v3129_v1  ;;  %v3149_v43 = vsub.f32 %v3117_v22, %v3135_v39 }
0x23b7   :  { %v3145_v17 = vsub.f32 %v3113_v46, %v3123_v40 }
0x23b8   :  { %v3157_v15 = vmul.f32 1.442695, %v3147_v3  ;;  %v3161_v6 = vmul.f32 1.442695, %v3149_v43 }
0x23b9   :  { %v3153_v34 = vmul.f32 1.442695, %v3145_v17 }
0x23bb   :  { %3769 = vpow2.f32 %v3153_v34 }
0x23bd   :  { %v3138_v14 = vpop.xlane.xlu2 %3137 }
0x23be   :  { %v3126_v41 = vpop.xlane.xlu0 %3125  ;;  %v3150_v60 = vsub.f32 %v3118_v26, %v3138_v14 }
0x23bf   :  { %v3146_v45 = vsub.f32 %v3114_v11, %v3126_v41 }
0x23c0   :  { %v3163_v0 = vmul.f32 1.442695, %v3150_v60 }
0x23c1   :  { %v3155_v48 = vmul.f32 1.442695, %v3146_v45  ;;  %v5184_v30 = vpop.eup %3769 }
0x23c2   :  { %v3169_v49 = vsel %vm531_vm2, %v5184_v30, 0.0 }
0x23c3   :  { %3771 = vpow2.f32 %v3155_v48  ;;  %3170 = vadd.xlane.f32.xlu2 %v3169_v49 }
0x23c4   :  { %3773 = vpow2.f32 %v3157_v15 }
0x23c5   :  { %v3144_v16 = vpop.xlane.xlu2 %3143 }
0x23c6   :  { %v3132_v62 = vpop.xlane.xlu0 %3131  ;;  %v3152_v21 = vsub.f32 %v3120_v36, %v3144_v16 }
0x23c7   :  { %v3148_v10 = vsub.f32 %v3116_v25, %v3132_v62 }
0x23c8   :  { %v3167_v61 = vmul.f32 1.442695, %v3152_v21 }
0x23c9   :  { %v5188_v53 = vpop.eup %3771  ;;  %v3159_v55 = vmul.f32 1.442695, %v3148_v10 }
0x23ca   :  { %v3172_v42 = vsel %vm531_vm2, %v5188_v53, 0.0  ;;  %v5192_v59 = vpop.eup %3773 }
0x23cb   :  { %3775 = vpow2.f32 %v3159_v55  ;;  %3173 = vadd.xlane.f32.xlu2 %v3172_v42  ;;  %v3175_v63 = vsel %vm531_vm2, %v5192_v59, 0.0 }
0x23cc   :  { %3777 = vpow2.f32 %v3161_v6 }
0x23cd   :  { %3779 = vpow2.f32 %v3163_v0  ;;  %v485_v0 = vld [vmem:[#allocation5] sm:$0x1] }
0x23ce   :  { %v3141_v2 = vpop.xlane.xlu0 %3140 }
0x23cf   :  { %v3151_v58 = vsub.f32 %v3119_v9, %v3141_v2 }
0x23d1   :  { %v3776_v52 = vpop.eup %3775  ;;  %v3165_v18 = vmul.f32 1.442695, %v3151_v58 }
0x23d2   :  { %v3178_v27 = vsel %vm531_vm2, %v3776_v52, 0.0  ;;  %v5197_v50 = vpop.eup %3777 }
0x23d3   :  { %3179 = vadd.xlane.f32.xlu0 %v3178_v27  ;;  %3176 = vadd.xlane.f32.xlu2 %v3175_v63  ;;  %v3181_v4 = vsel %vm531_vm2, %v5197_v50, 0.0  ;;  %v3780_v19 = vpop.eup %3779  ;;  %3781 = vpow2.f32 %v3165_v18  ;;  %v484_v63 = vld [vmem:[%s4625_s17] sm:$0xff]  ;;  %s4446_s17 = smov [#allocation39]  }
0x23d4   :  { %v3184_v56 = vsel %vm531_vm2, %v3780_v19, 0.0  ;;  %3783 = vpow2.f32 %v3167_v61  ;;  %s3422_s5 = sshll.u32 %s4446_s17, 4  ;;  %s3423_s5 = int_to_ptr.vmem [resolvable:$true] %s3422_s5 }
0x23d9   :  { %v3782_v28 = vpop.eup %3781 }
0x23da   :  { %v3187_v5 = vsel %vm531_vm2, %v3782_v28, 0.0  ;;  %v3784_v29 = vpop.eup %3783 }
0x23db   :  { %3182 = vadd.xlane.f32.xlu2 %v3181_v4  ;;  %v3190_v57 = vsel %vm531_vm2, %v3784_v29, 0.0 }
0x23e1   :  { %v3023_v22 = vpop.permute.xlu0 %3022 }
0x23e3   :  { %3185 = vadd.xlane.f32.xlu2 %v3184_v56 }
0x23eb   :  { %3188 = vadd.xlane.f32.xlu2 %v3187_v5 }
0x23f3   :  { %3191 = vadd.xlane.f32.xlu2 %v3190_v57 }
0x241c   :  { %3025 = vxpose.xlu2.b32.start.end [1/1] (short) (narrow) %v3023_v22, 8  ;;  %v5225_v22 = vld [vmem:[#allocation38] ss:$0 sm:$0xff] }
0x2436   :  { %v3171_v33 = vpop.xlane.xlu2 %3170 }
0x2437   :  { %3785 = vrcp.f32 %v3171_v33  ;;  %v1984_v33 = vadd.f32 %v5225_v22, %v5016_v47 }
0x243d   :  { %v3786_v12 = vpop.eup %3785 }
0x243e   :  { %v3174_v46 = vpop.xlane.xlu2 %3173  ;;  %v3201_v54 = vmul.f32 %v3786_v12, %v5184_v30  ;;  %v1986_v12 = vadd.f32 %v1984_v33, %v5007_v37 }
0x2440   :  { %v1987_v47 = vadd.f32 %v1986_v12, %v4881_v8 }
0x2446   :  { %v3177_v44 = vpop.xlane.xlu2 %3176  ;;  %v3180_v26 = vpop.xlane.xlu0 %3179 }
0x2447   :  { %3787 = vrcp.f32 %v3180_v26 }
0x2448   :  { %3789 = vrcp.f32 %v3174_v46 }
0x244d   :  { %v3788_v32 = vpop.eup %3787 }
0x244e   :  { %v3183_v31 = vpop.xlane.xlu2 %3182  ;;  %v3204_v36 = vmul.f32 %v3788_v32, %v3776_v52  ;;  %v3790_v38 = vpop.eup %3789 }
0x244f   :  { %v3202_v34 = vmul.f32 %v3790_v38, %v5188_v53 }
0x2456   :  { %v3186_v13 = vpop.xlane.xlu2 %3185 }
0x2457   :  { %3791 = vrcp.f32 %v3186_v13 }
0x2458   :  { %3793 = vrcp.f32 %v3177_v44 }
0x245d   :  { %v3792_v24 = vpop.eup %3791 }
0x245e   :  { %v3189_v51 = vpop.xlane.xlu2 %3188  ;;  %v3206_v41 = vmul.f32 %v3792_v24, %v3780_v19  ;;  %v3794_v48 = vpop.eup %3793 }
0x245f   :  { %v3203_v15 = vmul.f32 %v3794_v48, %v5192_v59 }
0x2466   :  { %v3192_v11 = vpop.xlane.xlu2 %3191 }
0x2467   :  { %3795 = vrcp.f32 %v3192_v11 }
0x2468   :  { %3797 = vrcp.f32 %v3183_v31 }
0x2469   :  { %3799 = vrcp.f32 %v3189_v51 }
0x246d   :  { %v3796_v30 = vpop.eup %3795 }
0x246e   :  { %v3208_v62 = vmul.f32 %v3796_v30, %v3784_v29  ;;  %v3798_v55 = vpop.eup %3797 }
0x246f   :  { %v3205_v42 = vmul.f32 %v3798_v55, %v5197_v50  ;;  %v3800_v14 = vpop.eup %3799 }
0x2470   :  { %v3207_v59 = vmul.f32 %v3800_v14, %v3782_v28 }
0x24b5   :  { %v3041_v25 = vpop.trf.xlu2 }
0x24b6   :  { %v3209_v20 = vmul.f32 %v3201_v54, %v3041_v25  ;;  %v3212_v9 = vmul.f32 %v3204_v36, %v3041_v25  ;;  %v3210_v1 = vmul.f32 %v3202_v34, %v3041_v25  ;;  %v3214_v45 = vmul.f32 %v3206_v41, %v3041_v25 }
0x24b7   :  { %v3211_v39 = vmul.f32 %v3203_v15, %v3041_v25  ;;  %v3216_v10 = vmul.f32 %v3208_v62, %v3041_v25  ;;  %v3213_v6 = vmul.f32 %v3205_v42, %v3041_v25  ;;  %v3215_v60 = vmul.f32 %v3207_v59, %v3041_v25  ;;  %v3825_v62 = vld [vmem:[#allocation24] ss:$0 sm:$0xff] }
0x24b8   :  { %v3217_v40 = vsel %vm531_vm2, %v3209_v20, 0.0  ;;  %v3226_v17 = vsel %vm531_vm2, %v3212_v9, 0.0  ;;  %v3220_v3 = vsel %vm531_vm2, %v3210_v1, 0.0  ;;  %v3232_v49 = vsel %vm531_vm2, %v3214_v45, 0.0 }
0x24b9   :  { %3218 = vadd.xlane.f32.xlu0 %v3217_v40  ;;  %3227 = vadd.xlane.f32.xlu1 %v3226_v17  ;;  %v3223_v53 = vsel %vm531_vm2, %v3211_v39, 0.0  ;;  %v3238_v43 = vsel %vm531_vm2, %v3216_v10, 0.0  ;;  %v3229_v52 = vsel %vm531_vm2, %v3213_v6, 0.0  ;;  %v3235_v27 = vsel %vm531_vm2, %v3215_v60, 0.0  ;;  %v3828_v60 = vld [vmem:[#allocation26] ss:$0 sm:$0xff] }
0x24c1   :  { %3221 = vadd.xlane.f32.xlu0 %v3220_v3  ;;  %3233 = vadd.xlane.f32.xlu1 %v3232_v49  ;;  %v3824_v3 = vld [vmem:[#allocation23] ss:$0 sm:$0xff] }
0x24c9   :  { %3224 = vadd.xlane.f32.xlu0 %v3223_v53  ;;  %3239 = vadd.xlane.f32.xlu1 %v3238_v43  ;;  %v3826_v53 = vld [vmem:[#allocation3] ss:$0 sm:$0xff] }
0x24d1   :  { %3230 = vadd.xlane.f32.xlu0 %v3229_v52  ;;  %v3827_v52 = vld [vmem:[%s5318_s11] ss:$0 sm:$0xff] }
0x24d9   :  { %3236 = vadd.xlane.f32.xlu0 %v3235_v27 }
0x24e2   :  { %1990 = vperm.xlu1 %3636, %v484_v63  }
0x24ea   :  { %2003 = vperm.xlu1 %3636, %v485_v0   ;;  %v3829_v0 = vld [vmem:[#allocation35] ss:$0 sm:$0xff] }
0x252c   :  { %v3219_v2 = vpop.xlane.xlu0 %3218  ;;  %v3228_v4 = vpop.xlane.xlu1 %3227 }
0x252d   :  { %v3249_v21 = vperm.slane %v3219_v2, %v4709_v7  ;;  %v3252_v29 = vperm.slane %v3228_v4, %v4709_v7 }
0x2534   :  { %v3222_v58 = vpop.xlane.xlu0 %3221  ;;  %v3234_v16 = vpop.xlane.xlu1 %3233 }
0x2535   :  { %v3250_v50 = vperm.slane %v3222_v58, %v4709_v7  ;;  %v3254_v31 = vperm.slane %v3234_v16, %v4709_v7 }
0x2537   :  { %v3257_v61 = vsel %vm1119_vm7, %v3250_v50, %v3249_v21  ;;  %vm2012_vm7 = vcmask 57344  }
0x253c   :  { %v3225_v18 = vpop.xlane.xlu0 %3224  ;;  %v3240_v46 = vpop.xlane.xlu1 %3239 }
0x253d   :  { %v3251_v19 = vperm.slane %v3225_v18, %v4709_v7  ;;  %v3256_v26 = vperm.slane %v3240_v46, %v4709_v7 }
0x253f   :  { %v3258_v28 = vsel %vm1121_vm8, %v3251_v19, %v3257_v61 }
0x2540   :  { %v3259_v57 = vsel %vm1123_vm9, %v3252_v29, %v3258_v28 }
0x2544   :  { %v3231_v56 = vpop.xlane.xlu0 %3230 }
0x2545   :  { %v3253_v5 = vperm.slane %v3231_v56, %v4709_v7 }
0x2547   :  { %v3260_v44 = vsel %vm1125_vm10, %v3253_v5, %v3259_v57 }
0x2548   :  { %v3261_v11 = vsel %vm1127_vm11, %v3254_v31, %v3260_v44 }
0x254c   :  { %v3237_v13 = vpop.xlane.xlu0 %3236 }
0x254d   :  { %v3255_v51 = vperm.slane %v3237_v13, %v4709_v7 }
0x254f   :  { %v3262_v32 = vsel %vm1129_vm12, %v3255_v51, %v3261_v11 }
0x2550   :  { %v3263_v54 = vsel %vm1131_vm13, %v3256_v26, %v3262_v32 }
0x2551   :  { %3551 = vmatmul.msk.f32.vlgmr.msrb.gmra.mxu3 %vm531_vm2, %v3263_v54 }
0x2554   :  { %v1991_v36 = vpop.permute.xlu1 %1990 }
0x2555   :  { %v1993_v25 = vmul.f32 %v1991_v36, %v1987_v47 }
0x2557   :  { %v1994_v38 = vsel %vm531_vm2, %v1993_v25, 0.0 }
0x2558   :  { %v1995_v20 = vrot.slane %v1994_v38, 4 }
0x255a   :  { %v1996_v9 = vadd.f32 %v1995_v20, %v1994_v38 }
0x255c   :  { %v1997_v24 = vrot.slane %v1996_v9, 2  ;;  %v5240_v7 = vpop.permute.xlu1 %2003 }
0x255d   :  { %v2006_v37 = vperm.slane %v5240_v7, 0 }
0x255e   :  { %v1998_v40 = vadd.f32 %v1997_v24, %v1996_v9 }
0x2560   :  { %v1999_v17 = vrot.slane %v1998_v40, 1 }
0x2562   :  { %v2000_v34 = vadd.f32 %v1999_v17, %v1998_v40 }
0x2564   :  { %v2007_v41 = vadd.f32 %v2006_v37, %v2000_v34 }
0x2566   :  { %v2008_v1 = vmul.f32 0.5, %v2007_v41 }
0x2568   :  { %3801 = vtanh.f32 %v2008_v1 }
0x256e   :  { %v3802_v45 = vpop.eup %3801 }
0x256f   :  { %v2010_v48 = vadd.f32 1.0, %v3802_v45 }
0x2571   :  { %v2011_v8 = vmul.f32 0.5, %v2010_v48 }
0x2573   :  { %2013 = vst.msk [vmem:[#allocation39] sm:$0x1] %vm2012_vm7, %v2011_v8 }
0x25d4   :  { %v3283_v30 = vpop.f32.mrf.mxu3 }
0x25d5   :  { %v3284_v49 = vadd.f32 %v3824_v3, %v3283_v30 }
0x25d7   :  { %v3286_v15 = vadd.f32 %v3284_v49, %v5168_v35 }
0x25d9   :  { %v3287_v39 = vmul.f32 %v3825_v62, %v3286_v15 }
0x25db   :  { %v3288_v10 = vsel %vm531_vm2, %v3287_v39, 0.0 }
0x25dc   :  { %3289 = vadd.xlane.f32.xlu2 %v3288_v10 }
0x264f   :  { %v3290_v55 = vpop.xlane.xlu2 %3289 }
0x2650   :  { %v3291_v43 = vadd.f32 %v3826_v53, %v3290_v55 }
0x2652   :  { %vm3292_vm8 = vcmp.gt.f32.partialorder %v3291_v43, 0.0  ;;  %v3293_v42 = vmul.f32 0.01, %v3291_v43 }
0x2654   :  { %v3294_v6 = vsel %vm3292_vm8, %v3291_v43, %v3293_v42 }
0x2655   :  { %3297 = vperm.xlu0 %3635, %v3294_v6  }
0x26c7   :  { %v3298_v14 = vpop.permute.xlu0 %3297 }
0x26c8   :  { %v3300_v59 = vmul.f32 %v3827_v52, %v3298_v14 }
0x26ca   :  { %v3301_v27 = vadd.f32 %v3828_v60, %v3300_v59 }
0x26cc   :  { %v3302_v63 = vadd.f32 %v3301_v27, %v3286_v15 }
0x26ce   :  { %3552 = vmatmul.msk.f32.vlgmr.msra.gmra.mxu0 %vm531_vm2, %v3302_v63 }
0x274b   :  { %v3323_v35 = vpop.f32.mrf.mxu0 }
0x274c   :  { %v3324_v2 = vadd.f32 %v3829_v0, %v3323_v35 }
0x274e   :  { %vm3326_vm9 = vcmp.gt.f32.partialorder %v3324_v2, 0.0  ;;  %v3327_v58 = vmul.f32 0.01, %v3324_v2 }
0x2750   :  { %v3328_v4 = vsel %vm3326_vm9, %v3324_v2, %v3327_v58 }
0x2751   :  { %3553 = vmatmul.msk.f32.vlgmr.msra.gmra.mxu1 %vm531_vm2, %v3328_v4 }
0x27ce   :  { %v3349_v18 = vpop.f32.mrf.mxu1 }
0x27cf   :  { %v3350_v16 = vadd.f32 %v5225_v22, %v3349_v18 }
0x27d1   :  { %3554 = vmatmul.msk.f32.vlgmr.msra.gmra.mxu2 %vm531_vm2, %v3350_v16 }
0x2854   :  { %v3372_v50 = vpop.f32.mrf.mxu2 }
0x2855   :  { %v3373_v19 = vadd.f32 %v3829_v0, %v3372_v50 }
0x2857   :  { %vm3375_vm10 = vcmp.gt.f32.partialorder %v3373_v19, 0.0  ;;  %v3376_v21 = vmul.f32 0.01, %v3373_v19 }
0x2859   :  { %v3377_v56 = vsel %vm3375_vm10, %v3373_v19, %v3376_v21 }
0x285a   :  { %3555 = vmatmul.msk.f32.vlgmr.msra.gmra.mxu3 %vm531_vm2, %v3377_v56 }
0x28dd   :  { %v3398_v61 = vpop.f32.mrf.mxu3 }
0x28de   :  { %v3399_v28 = vadd.f32 %v5225_v22, %v3398_v61 }
0x28e0   :  { %v3401_v5 = vadd.f32 %v3399_v28, %v3350_v16 }
0x28e2   :  { %v3402_v29 = vadd.f32 %v3401_v5, %v5132_v23 }
0x28e4   :  { %v3403_v57 = vmul.f32 %v3402_v29, %v1991_v36 }
0x28e6   :  { %v3404_v33 = vsel %vm531_vm2, %v3403_v57, 0.0 }
0x28e7   :  { %v3405_v46 = vrot.slane %v3404_v33, 4 }
0x28e9   :  { %v3406_v44 = vadd.f32 %v3405_v46, %v3404_v33 }
0x28eb   :  { %v3407_v31 = vrot.slane %v3406_v44, 2 }
0x28ed   :  { %v3408_v13 = vadd.f32 %v3407_v31, %v3406_v44 }
0x28ef   :  { %v3409_v51 = vrot.slane %v3408_v13, 1 }
0x28f1   :  { %v3410_v26 = vadd.f32 %v3409_v51, %v3408_v13 }
0x28f3   :  { %v3411_v11 = vadd.f32 %v3410_v26, %v2006_v37 }
0x28f5   :  { %v3412_v12 = vmul.f32 0.5, %v3411_v11 }
0x28f7   :  { %3803 = vtanh.f32 %v3412_v12 }
0x28fd   :  { %v3804_v22 = vpop.eup %3803 }
0x28fe   :  { %v3414_v32 = vadd.f32 1.0, %v3804_v22 }
0x2900   :  { %v3415_v23 = vmul.f32 0.5, %v3414_v32 }
0x2902   :  { %3417 = vst.msk [vmem:[#allocation39 + $0x1] sm:$0x1] %vm2012_vm7, %v3415_v23 }
0x2903   :  { %4357 = shalt.err (!%p4354_p11)
}
0x2904   :  { %s4447_s13 = smov 16   ;;  %s4448_s25 = smov 1  }
0x2905   :  { %3430 = dma.vmem_to_hbm [thread:$0]  %s3423_s5, 32, %s3425_s1, [#allocation8], %s4447_s13, %s4447_s13, %s4448_s25  }
0x2906   :  { %4380 = dma.done.wait [#allocation8], 32  }
0x2907   :  { %4381 = vsyncadd [#allocation8], 4294967264 }
0x2908   :  { %3435 = vsyncpa [#allocation7], 1 }
0x2909   :  { %3436 = vsyncpa [#allocation10], 1 }
0x290a   :  { %3437 = vsyncpa [#allocation13], 1 }
0x290b   :  { %3438 = vsyncpa [#allocation16], 1 }
0x290c   :  { %3439 = vsyncpa [#allocation19], 1 }
0x290d   :  { %3440 = vsyncpa [#allocation22], 1 }
0x290e   :  { %3441 = vsyncpa [#allocation25], 1 }
0x290f   :  { %3442 = vsyncpa [#allocation28], 1 }
0x2910   :  { %3443 = vsyncpa [#allocation31], 1 }
0x2911   :  { %3444 = vsyncpa [#allocation34], 1 }
0x2912   :  { %3445 = vsyncpa [#allocation37], 1 }
0x2913   :  { %3446 = vsyncpa [#allocation8], 1 }

</bundles_post_ra>
